<compile_context>
chip_gen: v7x
topology: tpu7x:2x2x1
jax: 0.10.0
libtpu: 0.0.40
codegen_flags: <defaults>
</compile_context>

<pallas_src>
import functools

import jax
import jax.numpy as jnp
from jax.experimental import pallas as pl
from jax.experimental.pallas import tpu as pltpu


# ----------------------------------------------------------------------------
# Pallas kernel 1: 3x3x3, pad=1, stride=1 conv on the padded-flat layout.
#   grid = (N, D); per step: 27 lane-shifted (Cout,Cin)@(Cin,H*Wp) MXU taps.
# ----------------------------------------------------------------------------
def _conv3x3x3_kernel(xm_ref, xc_ref, xp_ref, w_ref, b_ref, m_ref, o_ref,
                      acc_ref, *, D, Wp, LB, Lp, C_out, left, relu):
    d = pl.program_id(1)

    def taps(x_ref, kd):
        acc = None
        for kh in range(3):
            for kw in range(3):
                s = kh * Wp + kw                     # static flat shift
                xs = x_ref[0, 0, :, s:s + LB]        # (Cin, LB) bf16
                c = jnp.dot(w_ref[kd, kh, kw], xs,
                            preferred_element_type=jnp.float32)
                acc = c if acc is None else acc + c
        return acc

    # Center depth tap is always valid.
    acc_ref[...] = taps(xc_ref, 1)

    @pl.when(d > 0)
    def _upper():
        acc_ref[...] += taps(xm_ref, 0)

    @pl.when(d < D - 1)
    def _lower():
        acc_ref[...] += taps(xp_ref, 2)

    r = acc_ref[...] + b_ref[...]                    # bias (Cout, 1)
    if relu:
        r = jnp.maximum(r, 0.0)
    r = r * m_ref[...]                # zero the wrap-around band columns
    # Emit directly in the padded-flat layout of the next conv:
    # [zeros(Wp+1) | band | zeros(tail)] per channel row.
    o_ref[0, 0, :, 0:left] = jnp.zeros((C_out, left), o_ref.dtype)
    o_ref[0, 0, :, left:left + LB] = r.astype(o_ref.dtype)
    tail = Lp - left - LB
    o_ref[0, 0, :, left + LB:Lp] = jnp.zeros((C_out, tail), o_ref.dtype)


def conv3x3x3_flat(xf, w, b, H, W, relu=True):
    """xf: (N, D, Cin, Lp) bf16 padded-flat; w: (Cout, Cin, 3,3,3); b: (Cout,)."""
    N, D, C_in, Lp = xf.shape
    C_out = w.shape[0]
    Hp, Wp = H + 2, W + 2
    LB = H * Wp                          # contiguous "wide band" length
    assert Lp >= Hp * Wp + 2

    wt = jnp.transpose(w, (2, 3, 4, 0, 1)).astype(jnp.bfloat16)  # (3,3,3,Cout,Cin)
    bias = b.reshape(C_out, 1).astype(jnp.float32)
    mask = (jnp.arange(LB, dtype=jnp.int32) % Wp < W)
    mask = mask.astype(jnp.float32).reshape(1, LB)

    kern = functools.partial(_conv3x3x3_kernel, D=D, Wp=Wp, LB=LB, Lp=Lp,
                             C_out=C_out, left=Wp + 1, relu=relu)
    return pl.pallas_call(
        kern,
        out_shape=jax.ShapeDtypeStruct((N, D, C_out, Lp), jnp.bfloat16),
        grid=(N, D),
        in_specs=[
            pl.BlockSpec((1, 1, C_in, Lp),
                         lambda n, d: (n, jnp.maximum(d - 1, 0), 0, 0)),
            pl.BlockSpec((1, 1, C_in, Lp), lambda n, d: (n, d, 0, 0)),
            pl.BlockSpec((1, 1, C_in, Lp),
                         lambda n, d: (n, jnp.minimum(d + 1, D - 1), 0, 0)),
            pl.BlockSpec((3, 3, 3, C_out, C_in),
                         lambda n, d: (0, 0, 0, 0, 0)),
            pl.BlockSpec((C_out, 1), lambda n, d: (0, 0)),
            pl.BlockSpec((1, LB), lambda n, d: (0, 0)),
        ],
        out_specs=pl.BlockSpec((1, 1, C_out, Lp), lambda n, d: (n, d, 0, 0)),
        scratch_shapes=[pltpu.VMEM((C_out, LB), jnp.float32)],
        compiler_params=pltpu.CompilerParams(
            dimension_semantics=("parallel", "parallel"),
            vmem_limit_bytes=32 * 1024 * 1024),
    )(xf, xf, xf, wt, bias, mask)


# ----------------------------------------------------------------------------
# Pallas kernel 2: lane-dense fused GEMM  O = relu(W @ P + b), tiled over M.
# Used only for the kernel=4, stride=2, pad=1 conv of the use_pool=False branch.
# ----------------------------------------------------------------------------
def _gemm_bias_act_kernel(w_ref, x_ref, b_ref, o_ref, *, relu):
    acc = jnp.dot(w_ref[...], x_ref[...], preferred_element_type=jnp.float32)
    acc = acc + b_ref[...]
    if relu:
        acc = jnp.maximum(acc, 0.0)
    o_ref[...] = acc.astype(o_ref.dtype)


def conv3d_k4s2(x, w, b, relu=True, tile_n=1024):
    """x: (N, Cin, D, H, W); w: (Cout, Cin, 4,4,4); b: (Cout,).
    Returns (N, Do, Cout, Ho, Wo) bf16."""
    N, C_in, D, H, W = x.shape
    C_out = w.shape[0]
    Do, Ho, Wo = D // 2, H // 2, W // 2

    # TODO(synk): im2col for this single strided conv is still built in JAX
    # (8x the downsampled activation); the 3x3x3 convs avoid it entirely.
    xpad = jnp.pad(x, ((0, 0), (0, 0), (1, 1), (1, 1), (1, 1)))
    cols = []
    for kd in range(4):
        for kh in range(4):
            for kw in range(4):
                cols.append(xpad[:, :, kd:kd + 2 * Do:2,
                                 kh:kh + 2 * Ho:2, kw:kw + 2 * Wo:2])
    pt = jnp.stack(cols, axis=0)                         # (64, N, Cin, Do, Ho, Wo)
    pt = pt.transpose(0, 2, 1, 3, 4, 5).reshape(64 * C_in, N * Do * Ho * Wo)
    wm = jnp.transpose(w, (0, 2, 3, 4, 1)).reshape(C_out, 64 * C_in)

    M = N * Do * Ho * Wo
    K = 64 * C_in
    tn = M if M <= tile_n else tile_n
    Mp = pl.cdiv(M, tn) * tn
    if Mp != M:
        pt = jnp.pad(pt, ((0, 0), (0, Mp - M)))

    out = pl.pallas_call(
        functools.partial(_gemm_bias_act_kernel, relu=relu),
        out_shape=jax.ShapeDtypeStruct((C_out, Mp), jnp.bfloat16),
        grid=(Mp // tn,),
        in_specs=[
            pl.BlockSpec((C_out, K), lambda i: (0, 0)),
            pl.BlockSpec((K, tn), lambda i: (0, i)),
            pl.BlockSpec((C_out, 1), lambda i: (0, 0)),
        ],
        out_specs=pl.BlockSpec((C_out, tn), lambda i: (0, i)),
        compiler_params=pltpu.CompilerParams(
            dimension_semantics=("parallel",),
            vmem_limit_bytes=32 * 1024 * 1024),
    )(wm.astype(jnp.bfloat16), pt.astype(jnp.bfloat16),
      b.reshape(C_out, 1).astype(jnp.float32))

    out = out[:, :M].reshape(C_out, N, Do, Ho, Wo).transpose(1, 2, 0, 3, 4)
    return out                                           # (N, Do, Cout, Ho, Wo)


# ----------------------------------------------------------------------------
# Layout glue (JAX): padded-flat <-> dense, max-pool
# ----------------------------------------------------------------------------
def to_flat(x_ndchw):
    """(N, D, C, H, W) -> padded-flat (N, D, C, Lp) bf16."""
    N, D, C, H, W = x_ndchw.shape
    Hp, Wp = H + 2, W + 2
    Lp = ((Hp * Wp + 2 + 127) // 128) * 128
    xp = jnp.pad(x_ndchw, ((0, 0), (0, 0), (0, 0), (1, 1), (1, 1)))
    xf = xp.reshape(N, D, C, Hp * Wp)
    xf = jnp.pad(xf, ((0, 0), (0, 0), (0, 0), (0, Lp - Hp * Wp)))
    return xf.astype(jnp.bfloat16)


def from_flat(xf, H, W):
    """padded-flat (N, D, C, Lp) -> (N, C, D, H, W) float32."""
    N, D, C, Lp = xf.shape
    Hp, Wp = H + 2, W + 2
    y = xf[:, :, :, :Hp * Wp].reshape(N, D, C, Hp, Wp)
    y = y[:, :, :, 1:H + 1, 1:W + 1]
    return jnp.transpose(y, (0, 2, 1, 3, 4)).astype(jnp.float32)


def maxpool_1_2_2(x):
    """MaxPool3d(kernel=(1,2,2), stride=(1,2,2)), floor mode. x: (N,C,D,H,W)."""
    # TODO(synk): pooling is memory-bound JAX glue; a Pallas form would need
    # lane-strided loads which Mosaic does not support cleanly.
    N, C, D, H, W = x.shape
    Ho, Wo = H // 2, W // 2
    x = x[:, :, :, :Ho * 2, :Wo * 2]
    x = x.reshape(N, C, D, Ho, 2, Wo, 2)
    return jnp.max(x, axis=(4, 6))


# ----------------------------------------------------------------------------
# Down module: params + forward
# ----------------------------------------------------------------------------
def init_down_params(key, in_channels, out_channels, use_pool):
    k1, k2, k3, k4 = jax.random.split(key, 4)
    ksz = 3 if use_pool else 4
    fan1 = in_channels * ksz ** 3
    fan2 = out_channels * 27
    return {
        "w1": jax.random.normal(k1, (out_channels, in_channels, ksz, ksz, ksz),
                                jnp.float32) * (1.0 / fan1) ** 0.5,
        "b1": jax.random.normal(k2, (out_channels,), jnp.float32) * 0.01,
        "w2": jax.random.normal(k3, (out_channels, out_channels, 3, 3, 3),
                                jnp.float32) * (1.0 / fan2) ** 0.5,
        "b2": jax.random.normal(k4, (out_channels,), jnp.float32) * 0.01,
    }


def down_forward(x, params, use_pool):
    """x: (N, Cin, D, H, W) float32 (PyTorch NCDHW). Returns (N, Cout, D', H', W').
    TODO(synk): norm_layer assumed identity, activation assumed ReLU."""
    if use_pool:
        xp = maxpool_1_2_2(x)                              # (N, C, D, H/2, W/2)
        xndchw = jnp.transpose(xp, (0, 2, 1, 3, 4))        # (N, D, C, H/2, W/2)
        H, W = xndchw.shape[3], xndchw.shape[4]
        xf = to_flat(xndchw)
        xf = conv3x3x3_flat(xf, params["w1"], params["b1"], H, W, relu=True)
    else:
        y = conv3d_k4s2(x, params["w1"], params["b1"], relu=True)
        H, W = y.shape[3], y.shape[4]
        xf = to_flat(y)
    xf = conv3x3x3_flat(xf, params["w2"], params["b2"], H, W, relu=True)
    return from_flat(xf, H, W)


# ----------------------------------------------------------------------------
# Demo
# ----------------------------------------------------------------------------
if __name__ == "__main__":
    key = jax.random.PRNGKey(0)
    N, C_in, C_out, D, H, W = 2, 4, 8, 4, 16, 16

    key, kx, kp1, kp2 = jax.random.split(key, 4)
    x = jax.random.normal(kx, (N, C_in, D, H, W), jnp.float32)

    params_pool = init_down_params(kp1, C_in, C_out, use_pool=True)
    params_stride = init_down_params(kp2, C_in, C_out, use_pool=False)

    fwd_pool = jax.jit(functools.partial(down_forward, use_pool=True))
    fwd_stride = jax.jit(functools.partial(down_forward, use_pool=False))

    y1 = jax.block_until_ready(fwd_pool(x, params_pool))
    y2 = jax.block_until_ready(fwd_stride(x, params_stride))

    assert y1.shape == (N, C_out, D, H // 2, W // 2), y1.shape
    assert y2.shape == (N, C_out, D // 2, H // 2, W // 2), y2.shape
    assert bool(jnp.all(jnp.isfinite(y1))) and bool(jnp.all(jnp.isfinite(y2)))
    print("KERNEL_OK")
</pallas_src>

<mosaic_0001>
module attributes {stable_mosaic.version = 11 : i64} {
  func.func @_conv3x3x3_kernel(%arg0: i32, %arg1: i32, %arg2: memref<1x1x4x128xbf16, #tpu.memory_space<vmem>>, %arg3: memref<1x1x4x128xbf16, #tpu.memory_space<vmem>>, %arg4: memref<1x1x4x128xbf16, #tpu.memory_space<vmem>>, %arg5: memref<3x3x3x8x4xbf16, #tpu.memory_space<vmem>>, %arg6: memref<8x1xf32, #tpu.memory_space<vmem>>, %arg7: memref<1x80xf32, #tpu.memory_space<vmem>>, %arg8: memref<1x1x8x128xbf16, #tpu.memory_space<vmem>>, %arg9: memref<8x80xf32, #tpu.memory_space<vmem>>) attributes {dimension_semantics = [#tpu.dimension_semantics<parallel>, #tpu.dimension_semantics<parallel>], iteration_bounds = array<i64: 2, 4>, scalar_prefetch = 0 : i64, scratch_operands = 1 : i64, tpu.core_type = #tpu.core_type<tc>, window_params = [{transform_indices = @transform_0, window_bounds = array<i64: 1, 1, 4, 128>}, {transform_indices = @transform_1, window_bounds = array<i64: 1, 1, 4, 128>}, {transform_indices = @transform_2, window_bounds = array<i64: 1, 1, 4, 128>}, {pipeline_mode = #tpu.pipeline_mode<synchronous>, transform_indices = @transform_3, window_bounds = array<i64: 3, 3, 3, 8, 4>}, {pipeline_mode = #tpu.pipeline_mode<synchronous>, transform_indices = @transform_4, window_bounds = array<i64: 8, 1>}, {pipeline_mode = #tpu.pipeline_mode<synchronous>, transform_indices = @transform_5, window_bounds = array<i64: 1, 80>}, {transform_indices = @transform_6, window_bounds = array<i64: 1, 1, 8, 128>}]} {
    %c0 = arith.constant 0 : index
    %c0_0 = arith.constant 0 : index
    %c0_1 = arith.constant 0 : index
    %c0_2 = arith.constant 0 : index
    %0 = vector.load %arg3[%c0, %c0_0, %c0_1, %c0_2] : memref<1x1x4x128xbf16, #tpu.memory_space<vmem>>, vector<1x1x4x80xbf16>
    %1 = vector.shape_cast %0 : vector<1x1x4x80xbf16> to vector<4x80xbf16>
    %c1 = arith.constant 1 : index
    %c0_3 = arith.constant 0 : index
    %c0_4 = arith.constant 0 : index
    %c0_5 = arith.constant 0 : index
    %c0_6 = arith.constant 0 : index
    %2 = vector.load %arg5[%c1, %c0_3, %c0_4, %c0_5, %c0_6] : memref<3x3x3x8x4xbf16, #tpu.memory_space<vmem>>, vector<1x1x1x8x4xbf16>
    %3 = vector.shape_cast %2 : vector<1x1x1x8x4xbf16> to vector<8x4xbf16>
    %cst = arith.constant dense<0.000000e+00> : vector<8x80xf32>
    %4 = tpu.matmul %3, %1, %cst {dimension_numbers = #tpu.dot_dimension_numbers<[1], [0], [0], [1], [0, 0, 1, 1], [], []>} : vector<8x4xbf16>, vector<4x80xbf16>, vector<8x80xf32> -> vector<8x80xf32>
    %c0_7 = arith.constant 0 : index
    %c0_8 = arith.constant 0 : index
    %c0_9 = arith.constant 0 : index
    %c1_10 = arith.constant 1 : index
    %5 = vector.load %arg3[%c0_7, %c0_8, %c0_9, %c1_10] : memref<1x1x4x128xbf16, #tpu.memory_space<vmem>>, vector<1x1x4x80xbf16>
    %6 = vector.shape_cast %5 : vector<1x1x4x80xbf16> to vector<4x80xbf16>
    %c1_11 = arith.constant 1 : index
    %c0_12 = arith.constant 0 : index
    %c1_13 = arith.constant 1 : index
    %c0_14 = arith.constant 0 : index
    %c0_15 = arith.constant 0 : index
    %7 = vector.load %arg5[%c1_11, %c0_12, %c1_13, %c0_14, %c0_15] : memref<3x3x3x8x4xbf16, #tpu.memory_space<vmem>>, vector<1x1x1x8x4xbf16>
    %8 = vector.shape_cast %7 : vector<1x1x1x8x4xbf16> to vector<8x4xbf16>
    %cst_16 = arith.constant dense<0.000000e+00> : vector<8x80xf32>
    %9 = tpu.matmul %8, %6, %cst_16 {dimension_numbers = #tpu.dot_dimension_numbers<[1], [0], [0], [1], [0, 0, 1, 1], [], []>} : vector<8x4xbf16>, vector<4x80xbf16>, vector<8x80xf32> -> vector<8x80xf32>
    %10 = arith.addf %4, %9 : vector<8x80xf32>
    %c0_17 = arith.constant 0 : index
    %c0_18 = arith.constant 0 : index
    %c0_19 = arith.constant 0 : index
    %c2 = arith.constant 2 : index
    %11 = vector.load %arg3[%c0_17, %c0_18, %c0_19, %c2] : memref<1x1x4x128xbf16, #tpu.memory_space<vmem>>, vector<1x1x4x80xbf16>
    %12 = vector.shape_cast %11 : vector<1x1x4x80xbf16> to vector<4x80xbf16>
    %c1_20 = arith.constant 1 : index
    %c0_21 = arith.constant 0 : index
    %c2_22 = arith.constant 2 : index
    %c0_23 = arith.constant 0 : index
    %c0_24 = arith.constant 0 : index
    %13 = vector.load %arg5[%c1_20, %c0_21, %c2_22, %c0_23, %c0_24] : memref<3x3x3x8x4xbf16, #tpu.memory_space<vmem>>, vector<1x1x1x8x4xbf16>
    %14 = vector.shape_cast %13 : vector<1x1x1x8x4xbf16> to vector<8x4xbf16>
    %cst_25 = arith.constant dense<0.000000e+00> : vector<8x80xf32>
    %15 = tpu.matmul %14, %12, %cst_25 {dimension_numbers = #tpu.dot_dimension_numbers<[1], [0], [0], [1], [0, 0, 1, 1], [], []>} : vector<8x4xbf16>, vector<4x80xbf16>, vector<8x80xf32> -> vector<8x80xf32>
    %16 = arith.addf %10, %15 : vector<8x80xf32>
    %c0_26 = arith.constant 0 : index
    %c0_27 = arith.constant 0 : index
    %c0_28 = arith.constant 0 : index
    %c10 = arith.constant 10 : index
    %17 = vector.load %arg3[%c0_26, %c0_27, %c0_28, %c10] : memref<1x1x4x128xbf16, #tpu.memory_space<vmem>>, vector<1x1x4x80xbf16>
    %18 = vector.shape_cast %17 : vector<1x1x4x80xbf16> to vector<4x80xbf16>
    %c1_29 = arith.constant 1 : index
    %c1_30 = arith.constant 1 : index
    %c0_31 = arith.constant 0 : index
    %c0_32 = arith.constant 0 : index
    %c0_33 = arith.constant 0 : index
    %19 = vector.load %arg5[%c1_29, %c1_30, %c0_31, %c0_32, %c0_33] : memref<3x3x3x8x4xbf16, #tpu.memory_space<vmem>>, vector<1x1x1x8x4xbf16>
    %20 = vector.shape_cast %19 : vector<1x1x1x8x4xbf16> to vector<8x4xbf16>
    %cst_34 = arith.constant dense<0.000000e+00> : vector<8x80xf32>
    %21 = tpu.matmul %20, %18, %cst_34 {dimension_numbers = #tpu.dot_dimension_numbers<[1], [0], [0], [1], [0, 0, 1, 1], [], []>} : vector<8x4xbf16>, vector<4x80xbf16>, vector<8x80xf32> -> vector<8x80xf32>
    %22 = arith.addf %16, %21 : vector<8x80xf32>
    %c0_35 = arith.constant 0 : index
    %c0_36 = arith.constant 0 : index
    %c0_37 = arith.constant 0 : index
    %c11 = arith.constant 11 : index
    %23 = vector.load %arg3[%c0_35, %c0_36, %c0_37, %c11] : memref<1x1x4x128xbf16, #tpu.memory_space<vmem>>, vector<1x1x4x80xbf16>
    %24 = vector.shape_cast %23 : vector<1x1x4x80xbf16> to vector<4x80xbf16>
    %c1_38 = arith.constant 1 : index
    %c1_39 = arith.constant 1 : index
    %c1_40 = arith.constant 1 : index
    %c0_41 = arith.constant 0 : index
    %c0_42 = arith.constant 0 : index
    %25 = vector.load %arg5[%c1_38, %c1_39, %c1_40, %c0_41, %c0_42] : memref<3x3x3x8x4xbf16, #tpu.memory_space<vmem>>, vector<1x1x1x8x4xbf16>
    %26 = vector.shape_cast %25 : vector<1x1x1x8x4xbf16> to vector<8x4xbf16>
    %cst_43 = arith.constant dense<0.000000e+00> : vector<8x80xf32>
    %27 = tpu.matmul %26, %24, %cst_43 {dimension_numbers = #tpu.dot_dimension_numbers<[1], [0], [0], [1], [0, 0, 1, 1], [], []>} : vector<8x4xbf16>, vector<4x80xbf16>, vector<8x80xf32> -> vector<8x80xf32>
    %28 = arith.addf %22, %27 : vector<8x80xf32>
    %c0_44 = arith.constant 0 : index
    %c0_45 = arith.constant 0 : index
    %c0_46 = arith.constant 0 : index
    %c12 = arith.constant 12 : index
    %29 = vector.load %arg3[%c0_44, %c0_45, %c0_46, %c12] : memref<1x1x4x128xbf16, #tpu.memory_space<vmem>>, vector<1x1x4x80xbf16>
    %30 = vector.shape_cast %29 : vector<1x1x4x80xbf16> to vector<4x80xbf16>
    %c1_47 = arith.constant 1 : index
    %c1_48 = arith.constant 1 : index
    %c2_49 = arith.constant 2 : index
    %c0_50 = arith.constant 0 : index
    %c0_51 = arith.constant 0 : index
    %31 = vector.load %arg5[%c1_47, %c1_48, %c2_49, %c0_50, %c0_51] : memref<3x3x3x8x4xbf16, #tpu.memory_space<vmem>>, vector<1x1x1x8x4xbf16>
    %32 = vector.shape_cast %31 : vector<1x1x1x8x4xbf16> to vector<8x4xbf16>
    %cst_52 = arith.constant dense<0.000000e+00> : vector<8x80xf32>
    %33 = tpu.matmul %32, %30, %cst_52 {dimension_numbers = #tpu.dot_dimension_numbers<[1], [0], [0], [1], [0, 0, 1, 1], [], []>} : vector<8x4xbf16>, vector<4x80xbf16>, vector<8x80xf32> -> vector<8x80xf32>
    %34 = arith.addf %28, %33 : vector<8x80xf32>
    %c0_53 = arith.constant 0 : index
    %c0_54 = arith.constant 0 : index
    %c0_55 = arith.constant 0 : index
    %c20 = arith.constant 20 : index
    %35 = vector.load %arg3[%c0_53, %c0_54, %c0_55, %c20] : memref<1x1x4x128xbf16, #tpu.memory_space<vmem>>, vector<1x1x4x80xbf16>
    %36 = vector.shape_cast %35 : vector<1x1x4x80xbf16> to vector<4x80xbf16>
    %c1_56 = arith.constant 1 : index
    %c2_57 = arith.constant 2 : index
    %c0_58 = arith.constant 0 : index
    %c0_59 = arith.constant 0 : index
    %c0_60 = arith.constant 0 : index
    %37 = vector.load %arg5[%c1_56, %c2_57, %c0_58, %c0_59, %c0_60] : memref<3x3x3x8x4xbf16, #tpu.memory_space<vmem>>, vector<1x1x1x8x4xbf16>
    %38 = vector.shape_cast %37 : vector<1x1x1x8x4xbf16> to vector<8x4xbf16>
    %cst_61 = arith.constant dense<0.000000e+00> : vector<8x80xf32>
    %39 = tpu.matmul %38, %36, %cst_61 {dimension_numbers = #tpu.dot_dimension_numbers<[1], [0], [0], [1], [0, 0, 1, 1], [], []>} : vector<8x4xbf16>, vector<4x80xbf16>, vector<8x80xf32> -> vector<8x80xf32>
    %40 = arith.addf %34, %39 : vector<8x80xf32>
    %c0_62 = arith.constant 0 : index
    %c0_63 = arith.constant 0 : index
    %c0_64 = arith.constant 0 : index
    %c21 = arith.constant 21 : index
    %41 = vector.load %arg3[%c0_62, %c0_63, %c0_64, %c21] : memref<1x1x4x128xbf16, #tpu.memory_space<vmem>>, vector<1x1x4x80xbf16>
    %42 = vector.shape_cast %41 : vector<1x1x4x80xbf16> to vector<4x80xbf16>
    %c1_65 = arith.constant 1 : index
    %c2_66 = arith.constant 2 : index
    %c1_67 = arith.constant 1 : index
    %c0_68 = arith.constant 0 : index
    %c0_69 = arith.constant 0 : index
    %43 = vector.load %arg5[%c1_65, %c2_66, %c1_67, %c0_68, %c0_69] : memref<3x3x3x8x4xbf16, #tpu.memory_space<vmem>>, vector<1x1x1x8x4xbf16>
    %44 = vector.shape_cast %43 : vector<1x1x1x8x4xbf16> to vector<8x4xbf16>
    %cst_70 = arith.constant dense<0.000000e+00> : vector<8x80xf32>
    %45 = tpu.matmul %44, %42, %cst_70 {dimension_numbers = #tpu.dot_dimension_numbers<[1], [0], [0], [1], [0, 0, 1, 1], [], []>} : vector<8x4xbf16>, vector<4x80xbf16>, vector<8x80xf32> -> vector<8x80xf32>
    %46 = arith.addf %40, %45 : vector<8x80xf32>
    %c0_71 = arith.constant 0 : index
    %c0_72 = arith.constant 0 : index
    %c0_73 = arith.constant 0 : index
    %c22 = arith.constant 22 : index
    %47 = vector.load %arg3[%c0_71, %c0_72, %c0_73, %c22] : memref<1x1x4x128xbf16, #tpu.memory_space<vmem>>, vector<1x1x4x80xbf16>
    %48 = vector.shape_cast %47 : vector<1x1x4x80xbf16> to vector<4x80xbf16>
    %c1_74 = arith.constant 1 : index
    %c2_75 = arith.constant 2 : index
    %c2_76 = arith.constant 2 : index
    %c0_77 = arith.constant 0 : index
    %c0_78 = arith.constant 0 : index
    %49 = vector.load %arg5[%c1_74, %c2_75, %c2_76, %c0_77, %c0_78] : memref<3x3x3x8x4xbf16, #tpu.memory_space<vmem>>, vector<1x1x1x8x4xbf16>
    %50 = vector.shape_cast %49 : vector<1x1x1x8x4xbf16> to vector<8x4xbf16>
    %cst_79 = arith.constant dense<0.000000e+00> : vector<8x80xf32>
    %51 = tpu.matmul %50, %48, %cst_79 {dimension_numbers = #tpu.dot_dimension_numbers<[1], [0], [0], [1], [0, 0, 1, 1], [], []>} : vector<8x4xbf16>, vector<4x80xbf16>, vector<8x80xf32> -> vector<8x80xf32>
    %52 = arith.addf %46, %51 : vector<8x80xf32>
    %c0_80 = arith.constant 0 : index
    %c0_81 = arith.constant 0 : index
    %53 = vector.load %arg9[%c0_80, %c0_81] : memref<8x80xf32, #tpu.memory_space<vmem>>, vector<8x80xf32>
    tpu.vector_store %arg9[%c0_80, %c0_81], %52 {strides = array<i32>} : memref<8x80xf32, #tpu.memory_space<vmem>>, vector<8x80xf32>,
    %c0_i32 = arith.constant 0 : i32
    %54 = arith.cmpi sgt, %arg1, %c0_i32 : i32
    %55 = arith.extui %54 : i1 to i32
    %c0_i32_82 = arith.constant 0 : i32
    %56 = arith.cmpi ne, %55, %c0_i32_82 : i32
    scf.if %56 {
      %c0_104 = arith.constant 0 : index
      %c0_105 = arith.constant 0 : index
      %81 = vector.load %arg9[%c0_104, %c0_105] : memref<8x80xf32, #tpu.memory_space<vmem>>, vector<8x80xf32>
      %c0_106 = arith.constant 0 : index
      %c0_107 = arith.constant 0 : index
      %c0_108 = arith.constant 0 : index
      %c0_109 = arith.constant 0 : index
      %82 = vector.load %arg2[%c0_106, %c0_107, %c0_108, %c0_109] : memref<1x1x4x128xbf16, #tpu.memory_space<vmem>>, vector<1x1x4x80xbf16>
      %83 = vector.shape_cast %82 : vector<1x1x4x80xbf16> to vector<4x80xbf16>
      %c0_110 = arith.constant 0 : index
      %c0_111 = arith.constant 0 : index
      %c0_112 = arith.constant 0 : index
      %c0_113 = arith.constant 0 : index
      %c0_114 = arith.constant 0 : index
      %84 = vector.load %arg5[%c0_110, %c0_111, %c0_112, %c0_113, %c0_114] : memref<3x3x3x8x4xbf16, #tpu.memory_space<vmem>>, vector<1x1x1x8x4xbf16>
      %85 = vector.shape_cast %84 : vector<1x1x1x8x4xbf16> to vector<8x4xbf16>
      %cst_115 = arith.constant dense<0.000000e+00> : vector<8x80xf32>
      %86 = tpu.matmul %85, %83, %cst_115 {dimension_numbers = #tpu.dot_dimension_numbers<[1], [0], [0], [1], [0, 0, 1, 1], [], []>} : vector<8x4xbf16>, vector<4x80xbf16>, vector<8x80xf32> -> vector<8x80xf32>
      %c0_116 = arith.constant 0 : index
      %c0_117 = arith.constant 0 : index
      %c0_118 = arith.constant 0 : index
      %c1_119 = arith.constant 1 : index
      %87 = vector.load %arg2[%c0_116, %c0_117, %c0_118, %c1_119] : memref<1x1x4x128xbf16, #tpu.memory_space<vmem>>, vector<1x1x4x80xbf16>
      %88 = vector.shape_cast %87 : vector<1x1x4x80xbf16> to vector<4x80xbf16>
      %c0_120 = arith.constant 0 : index
      %c0_121 = arith.constant 0 : index
      %c1_122 = arith.constant 1 : index
      %c0_123 = arith.constant 0 : index
      %c0_124 = arith.constant 0 : index
      %89 = vector.load %arg5[%c0_120, %c0_121, %c1_122, %c0_123, %c0_124] : memref<3x3x3x8x4xbf16, #tpu.memory_space<vmem>>, vector<1x1x1x8x4xbf16>
      %90 = vector.shape_cast %89 : vector<1x1x1x8x4xbf16> to vector<8x4xbf16>
      %cst_125 = arith.constant dense<0.000000e+00> : vector<8x80xf32>
      %91 = tpu.matmul %90, %88, %cst_125 {dimension_numbers = #tpu.dot_dimension_numbers<[1], [0], [0], [1], [0, 0, 1, 1], [], []>} : vector<8x4xbf16>, vector<4x80xbf16>, vector<8x80xf32> -> vector<8x80xf32>
      %92 = arith.addf %86, %91 : vector<8x80xf32>
      %c0_126 = arith.constant 0 : index
      %c0_127 = arith.constant 0 : index
      %c0_128 = arith.constant 0 : index
      %c2_129 = arith.constant 2 : index
      %93 = vector.load %arg2[%c0_126, %c0_127, %c0_128, %c2_129] : memref<1x1x4x128xbf16, #tpu.memory_space<vmem>>, vector<1x1x4x80xbf16>
      %94 = vector.shape_cast %93 : vector<1x1x4x80xbf16> to vector<4x80xbf16>
      %c0_130 = arith.constant 0 : index
      %c0_131 = arith.constant 0 : index
      %c2_132 = arith.constant 2 : index
      %c0_133 = arith.constant 0 : index
      %c0_134 = arith.constant 0 : index
      %95 = vector.load %arg5[%c0_130, %c0_131, %c2_132, %c0_133, %c0_134] : memref<3x3x3x8x4xbf16, #tpu.memory_space<vmem>>, vector<1x1x1x8x4xbf16>
      %96 = vector.shape_cast %95 : vector<1x1x1x8x4xbf16> to vector<8x4xbf16>
      %cst_135 = arith.constant dense<0.000000e+00> : vector<8x80xf32>
      %97 = tpu.matmul %96, %94, %cst_135 {dimension_numbers = #tpu.dot_dimension_numbers<[1], [0], [0], [1], [0, 0, 1, 1], [], []>} : vector<8x4xbf16>, vector<4x80xbf16>, vector<8x80xf32> -> vector<8x80xf32>
      %98 = arith.addf %92, %97 : vector<8x80xf32>
      %c0_136 = arith.constant 0 : index
      %c0_137 = arith.constant 0 : index
      %c0_138 = arith.constant 0 : index
      %c10_139 = arith.constant 10 : index
      %99 = vector.load %arg2[%c0_136, %c0_137, %c0_138, %c10_139] : memref<1x1x4x128xbf16, #tpu.memory_space<vmem>>, vector<1x1x4x80xbf16>
      %100 = vector.shape_cast %99 : vector<1x1x4x80xbf16> to vector<4x80xbf16>
      %c0_140 = arith.constant 0 : index
      %c1_141 = arith.constant 1 : index
      %c0_142 = arith.constant 0 : index
      %c0_143 = arith.constant 0 : index
      %c0_144 = arith.constant 0 : index
      %101 = vector.load %arg5[%c0_140, %c1_141, %c0_142, %c0_143, %c0_144] : memref<3x3x3x8x4xbf16, #tpu.memory_space<vmem>>, vector<1x1x1x8x4xbf16>
      %102 = vector.shape_cast %101 : vector<1x1x1x8x4xbf16> to vector<8x4xbf16>
      %cst_145 = arith.constant dense<0.000000e+00> : vector<8x80xf32>
      %103 = tpu.matmul %102, %100, %cst_145 {dimension_numbers = #tpu.dot_dimension_numbers<[1], [0], [0], [1], [0, 0, 1, 1], [], []>} : vector<8x4xbf16>, vector<4x80xbf16>, vector<8x80xf32> -> vector<8x80xf32>
      %104 = arith.addf %98, %103 : vector<8x80xf32>
      %c0_146 = arith.constant 0 : index
      %c0_147 = arith.constant 0 : index
      %c0_148 = arith.constant 0 : index
      %c11_149 = arith.constant 11 : index
      %105 = vector.load %arg2[%c0_146, %c0_147, %c0_148, %c11_149] : memref<1x1x4x128xbf16, #tpu.memory_space<vmem>>, vector<1x1x4x80xbf16>
      %106 = vector.shape_cast %105 : vector<1x1x4x80xbf16> to vector<4x80xbf16>
      %c0_150 = arith.constant 0 : index
      %c1_151 = arith.constant 1 : index
      %c1_152 = arith.constant 1 : index
      %c0_153 = arith.constant 0 : index
      %c0_154 = arith.constant 0 : index
      %107 = vector.load %arg5[%c0_150, %c1_151, %c1_152, %c0_153, %c0_154] : memref<3x3x3x8x4xbf16, #tpu.memory_space<vmem>>, vector<1x1x1x8x4xbf16>
      %108 = vector.shape_cast %107 : vector<1x1x1x8x4xbf16> to vector<8x4xbf16>
      %cst_155 = arith.constant dense<0.000000e+00> : vector<8x80xf32>
      %109 = tpu.matmul %108, %106, %cst_155 {dimension_numbers = #tpu.dot_dimension_numbers<[1], [0], [0], [1], [0, 0, 1, 1], [], []>} : vector<8x4xbf16>, vector<4x80xbf16>, vector<8x80xf32> -> vector<8x80xf32>
      %110 = arith.addf %104, %109 : vector<8x80xf32>
      %c0_156 = arith.constant 0 : index
      %c0_157 = arith.constant 0 : index
      %c0_158 = arith.constant 0 : index
      %c12_159 = arith.constant 12 : index
      %111 = vector.load %arg2[%c0_156, %c0_157, %c0_158, %c12_159] : memref<1x1x4x128xbf16, #tpu.memory_space<vmem>>, vector<1x1x4x80xbf16>
      %112 = vector.shape_cast %111 : vector<1x1x4x80xbf16> to vector<4x80xbf16>
      %c0_160 = arith.constant 0 : index
      %c1_161 = arith.constant 1 : index
      %c2_162 = arith.constant 2 : index
      %c0_163 = arith.constant 0 : index
      %c0_164 = arith.constant 0 : index
      %113 = vector.load %arg5[%c0_160, %c1_161, %c2_162, %c0_163, %c0_164] : memref<3x3x3x8x4xbf16, #tpu.memory_space<vmem>>, vector<1x1x1x8x4xbf16>
      %114 = vector.shape_cast %113 : vector<1x1x1x8x4xbf16> to vector<8x4xbf16>
      %cst_165 = arith.constant dense<0.000000e+00> : vector<8x80xf32>
      %115 = tpu.matmul %114, %112, %cst_165 {dimension_numbers = #tpu.dot_dimension_numbers<[1], [0], [0], [1], [0, 0, 1, 1], [], []>} : vector<8x4xbf16>, vector<4x80xbf16>, vector<8x80xf32> -> vector<8x80xf32>
      %116 = arith.addf %110, %115 : vector<8x80xf32>
      %c0_166 = arith.constant 0 : index
      %c0_167 = arith.constant 0 : index
      %c0_168 = arith.constant 0 : index
      %c20_169 = arith.constant 20 : index
      %117 = vector.load %arg2[%c0_166, %c0_167, %c0_168, %c20_169] : memref<1x1x4x128xbf16, #tpu.memory_space<vmem>>, vector<1x1x4x80xbf16>
      %118 = vector.shape_cast %117 : vector<1x1x4x80xbf16> to vector<4x80xbf16>
      %c0_170 = arith.constant 0 : index
      %c2_171 = arith.constant 2 : index
      %c0_172 = arith.constant 0 : index
      %c0_173 = arith.constant 0 : index
      %c0_174 = arith.constant 0 : index
      %119 = vector.load %arg5[%c0_170, %c2_171, %c0_172, %c0_173, %c0_174] : memref<3x3x3x8x4xbf16, #tpu.memory_space<vmem>>, vector<1x1x1x8x4xbf16>
      %120 = vector.shape_cast %119 : vector<1x1x1x8x4xbf16> to vector<8x4xbf16>
      %cst_175 = arith.constant dense<0.000000e+00> : vector<8x80xf32>
      %121 = tpu.matmul %120, %118, %cst_175 {dimension_numbers = #tpu.dot_dimension_numbers<[1], [0], [0], [1], [0, 0, 1, 1], [], []>} : vector<8x4xbf16>, vector<4x80xbf16>, vector<8x80xf32> -> vector<8x80xf32>
      %122 = arith.addf %116, %121 : vector<8x80xf32>
      %c0_176 = arith.constant 0 : index
      %c0_177 = arith.constant 0 : index
      %c0_178 = arith.constant 0 : index
      %c21_179 = arith.constant 21 : index
      %123 = vector.load %arg2[%c0_176, %c0_177, %c0_178, %c21_179] : memref<1x1x4x128xbf16, #tpu.memory_space<vmem>>, vector<1x1x4x80xbf16>
      %124 = vector.shape_cast %123 : vector<1x1x4x80xbf16> to vector<4x80xbf16>
      %c0_180 = arith.constant 0 : index
      %c2_181 = arith.constant 2 : index
      %c1_182 = arith.constant 1 : index
      %c0_183 = arith.constant 0 : index
      %c0_184 = arith.constant 0 : index
      %125 = vector.load %arg5[%c0_180, %c2_181, %c1_182, %c0_183, %c0_184] : memref<3x3x3x8x4xbf16, #tpu.memory_space<vmem>>, vector<1x1x1x8x4xbf16>
      %126 = vector.shape_cast %125 : vector<1x1x1x8x4xbf16> to vector<8x4xbf16>
      %cst_185 = arith.constant dense<0.000000e+00> : vector<8x80xf32>
      %127 = tpu.matmul %126, %124, %cst_185 {dimension_numbers = #tpu.dot_dimension_numbers<[1], [0], [0], [1], [0, 0, 1, 1], [], []>} : vector<8x4xbf16>, vector<4x80xbf16>, vector<8x80xf32> -> vector<8x80xf32>
      %128 = arith.addf %122, %127 : vector<8x80xf32>
      %c0_186 = arith.constant 0 : index
      %c0_187 = arith.constant 0 : index
      %c0_188 = arith.constant 0 : index
      %c22_189 = arith.constant 22 : index
      %129 = vector.load %arg2[%c0_186, %c0_187, %c0_188, %c22_189] : memref<1x1x4x128xbf16, #tpu.memory_space<vmem>>, vector<1x1x4x80xbf16>
      %130 = vector.shape_cast %129 : vector<1x1x4x80xbf16> to vector<4x80xbf16>
      %c0_190 = arith.constant 0 : index
      %c2_191 = arith.constant 2 : index
      %c2_192 = arith.constant 2 : index
      %c0_193 = arith.constant 0 : index
      %c0_194 = arith.constant 0 : index
      %131 = vector.load %arg5[%c0_190, %c2_191, %c2_192, %c0_193, %c0_194] : memref<3x3x3x8x4xbf16, #tpu.memory_space<vmem>>, vector<1x1x1x8x4xbf16>
      %132 = vector.shape_cast %131 : vector<1x1x1x8x4xbf16> to vector<8x4xbf16>
      %cst_195 = arith.constant dense<0.000000e+00> : vector<8x80xf32>
      %133 = tpu.matmul %132, %130, %cst_195 {dimension_numbers = #tpu.dot_dimension_numbers<[1], [0], [0], [1], [0, 0, 1, 1], [], []>} : vector<8x4xbf16>, vector<4x80xbf16>, vector<8x80xf32> -> vector<8x80xf32>
      %134 = arith.addf %128, %133 : vector<8x80xf32>
      %135 = arith.addf %81, %134 : vector<8x80xf32>
      %c0_196 = arith.constant 0 : index
      %c0_197 = arith.constant 0 : index
      %136 = vector.load %arg9[%c0_196, %c0_197] : memref<8x80xf32, #tpu.memory_space<vmem>>, vector<8x80xf32>
      tpu.vector_store %arg9[%c0_196, %c0_197], %135 {strides = array<i32>} : memref<8x80xf32, #tpu.memory_space<vmem>>, vector<8x80xf32>,
    } else {
    }
    %c3_i32 = arith.constant 3 : i32
    %57 = arith.cmpi slt, %arg1, %c3_i32 : i32
    %58 = arith.extui %57 : i1 to i32
    %c0_i32_83 = arith.constant 0 : i32
    %59 = arith.cmpi ne, %58, %c0_i32_83 : i32
    scf.if %59 {
      %c0_104 = arith.constant 0 : index
      %c0_105 = arith.constant 0 : index
      %81 = vector.load %arg9[%c0_104, %c0_105] : memref<8x80xf32, #tpu.memory_space<vmem>>, vector<8x80xf32>
      %c0_106 = arith.constant 0 : index
      %c0_107 = arith.constant 0 : index
      %c0_108 = arith.constant 0 : index
      %c0_109 = arith.constant 0 : index
      %82 = vector.load %arg4[%c0_106, %c0_107, %c0_108, %c0_109] : memref<1x1x4x128xbf16, #tpu.memory_space<vmem>>, vector<1x1x4x80xbf16>
      %83 = vector.shape_cast %82 : vector<1x1x4x80xbf16> to vector<4x80xbf16>
      %c2_110 = arith.constant 2 : index
      %c0_111 = arith.constant 0 : index
      %c0_112 = arith.constant 0 : index
      %c0_113 = arith.constant 0 : index
      %c0_114 = arith.constant 0 : index
      %84 = vector.load %arg5[%c2_110, %c0_111, %c0_112, %c0_113, %c0_114] : memref<3x3x3x8x4xbf16, #tpu.memory_space<vmem>>, vector<1x1x1x8x4xbf16>
      %85 = vector.shape_cast %84 : vector<1x1x1x8x4xbf16> to vector<8x4xbf16>
      %cst_115 = arith.constant dense<0.000000e+00> : vector<8x80xf32>
      %86 = tpu.matmul %85, %83, %cst_115 {dimension_numbers = #tpu.dot_dimension_numbers<[1], [0], [0], [1], [0, 0, 1, 1], [], []>} : vector<8x4xbf16>, vector<4x80xbf16>, vector<8x80xf32> -> vector<8x80xf32>
      %c0_116 = arith.constant 0 : index
      %c0_117 = arith.constant 0 : index
      %c0_118 = arith.constant 0 : index
      %c1_119 = arith.constant 1 : index
      %87 = vector.load %arg4[%c0_116, %c0_117, %c0_118, %c1_119] : memref<1x1x4x128xbf16, #tpu.memory_space<vmem>>, vector<1x1x4x80xbf16>
      %88 = vector.shape_cast %87 : vector<1x1x4x80xbf16> to vector<4x80xbf16>
      %c2_120 = arith.constant 2 : index
      %c0_121 = arith.constant 0 : index
      %c1_122 = arith.constant 1 : index
      %c0_123 = arith.constant 0 : index
      %c0_124 = arith.constant 0 : index
      %89 = vector.load %arg5[%c2_120, %c0_121, %c1_122, %c0_123, %c0_124] : memref<3x3x3x8x4xbf16, #tpu.memory_space<vmem>>, vector<1x1x1x8x4xbf16>
      %90 = vector.shape_cast %89 : vector<1x1x1x8x4xbf16> to vector<8x4xbf16>
      %cst_125 = arith.constant dense<0.000000e+00> : vector<8x80xf32>
      %91 = tpu.matmul %90, %88, %cst_125 {dimension_numbers = #tpu.dot_dimension_numbers<[1], [0], [0], [1], [0, 0, 1, 1], [], []>} : vector<8x4xbf16>, vector<4x80xbf16>, vector<8x80xf32> -> vector<8x80xf32>
      %92 = arith.addf %86, %91 : vector<8x80xf32>
      %c0_126 = arith.constant 0 : index
      %c0_127 = arith.constant 0 : index
      %c0_128 = arith.constant 0 : index
      %c2_129 = arith.constant 2 : index
      %93 = vector.load %arg4[%c0_126, %c0_127, %c0_128, %c2_129] : memref<1x1x4x128xbf16, #tpu.memory_space<vmem>>, vector<1x1x4x80xbf16>
      %94 = vector.shape_cast %93 : vector<1x1x4x80xbf16> to vector<4x80xbf16>
      %c2_130 = arith.constant 2 : index
      %c0_131 = arith.constant 0 : index
      %c2_132 = arith.constant 2 : index
      %c0_133 = arith.constant 0 : index
      %c0_134 = arith.constant 0 : index
      %95 = vector.load %arg5[%c2_130, %c0_131, %c2_132, %c0_133, %c0_134] : memref<3x3x3x8x4xbf16, #tpu.memory_space<vmem>>, vector<1x1x1x8x4xbf16>
      %96 = vector.shape_cast %95 : vector<1x1x1x8x4xbf16> to vector<8x4xbf16>
      %cst_135 = arith.constant dense<0.000000e+00> : vector<8x80xf32>
      %97 = tpu.matmul %96, %94, %cst_135 {dimension_numbers = #tpu.dot_dimension_numbers<[1], [0], [0], [1], [0, 0, 1, 1], [], []>} : vector<8x4xbf16>, vector<4x80xbf16>, vector<8x80xf32> -> vector<8x80xf32>
      %98 = arith.addf %92, %97 : vector<8x80xf32>
      %c0_136 = arith.constant 0 : index
      %c0_137 = arith.constant 0 : index
      %c0_138 = arith.constant 0 : index
      %c10_139 = arith.constant 10 : index
      %99 = vector.load %arg4[%c0_136, %c0_137, %c0_138, %c10_139] : memref<1x1x4x128xbf16, #tpu.memory_space<vmem>>, vector<1x1x4x80xbf16>
      %100 = vector.shape_cast %99 : vector<1x1x4x80xbf16> to vector<4x80xbf16>
      %c2_140 = arith.constant 2 : index
      %c1_141 = arith.constant 1 : index
      %c0_142 = arith.constant 0 : index
      %c0_143 = arith.constant 0 : index
      %c0_144 = arith.constant 0 : index
      %101 = vector.load %arg5[%c2_140, %c1_141, %c0_142, %c0_143, %c0_144] : memref<3x3x3x8x4xbf16, #tpu.memory_space<vmem>>, vector<1x1x1x8x4xbf16>
      %102 = vector.shape_cast %101 : vector<1x1x1x8x4xbf16> to vector<8x4xbf16>
      %cst_145 = arith.constant dense<0.000000e+00> : vector<8x80xf32>
      %103 = tpu.matmul %102, %100, %cst_145 {dimension_numbers = #tpu.dot_dimension_numbers<[1], [0], [0], [1], [0, 0, 1, 1], [], []>} : vector<8x4xbf16>, vector<4x80xbf16>, vector<8x80xf32> -> vector<8x80xf32>
      %104 = arith.addf %98, %103 : vector<8x80xf32>
      %c0_146 = arith.constant 0 : index
      %c0_147 = arith.constant 0 : index
      %c0_148 = arith.constant 0 : index
      %c11_149 = arith.constant 11 : index
      %105 = vector.load %arg4[%c0_146, %c0_147, %c0_148, %c11_149] : memref<1x1x4x128xbf16, #tpu.memory_space<vmem>>, vector<1x1x4x80xbf16>
      %106 = vector.shape_cast %105 : vector<1x1x4x80xbf16> to vector<4x80xbf16>
      %c2_150 = arith.constant 2 : index
      %c1_151 = arith.constant 1 : index
      %c1_152 = arith.constant 1 : index
      %c0_153 = arith.constant 0 : index
      %c0_154 = arith.constant 0 : index
      %107 = vector.load %arg5[%c2_150, %c1_151, %c1_152, %c0_153, %c0_154] : memref<3x3x3x8x4xbf16, #tpu.memory_space<vmem>>, vector<1x1x1x8x4xbf16>
      %108 = vector.shape_cast %107 : vector<1x1x1x8x4xbf16> to vector<8x4xbf16>
      %cst_155 = arith.constant dense<0.000000e+00> : vector<8x80xf32>
      %109 = tpu.matmul %108, %106, %cst_155 {dimension_numbers = #tpu.dot_dimension_numbers<[1], [0], [0], [1], [0, 0, 1, 1], [], []>} : vector<8x4xbf16>, vector<4x80xbf16>, vector<8x80xf32> -> vector<8x80xf32>
      %110 = arith.addf %104, %109 : vector<8x80xf32>
      %c0_156 = arith.constant 0 : index
      %c0_157 = arith.constant 0 : index
      %c0_158 = arith.constant 0 : index
      %c12_159 = arith.constant 12 : index
      %111 = vector.load %arg4[%c0_156, %c0_157, %c0_158, %c12_159] : memref<1x1x4x128xbf16, #tpu.memory_space<vmem>>, vector<1x1x4x80xbf16>
      %112 = vector.shape_cast %111 : vector<1x1x4x80xbf16> to vector<4x80xbf16>
      %c2_160 = arith.constant 2 : index
      %c1_161 = arith.constant 1 : index
      %c2_162 = arith.constant 2 : index
      %c0_163 = arith.constant 0 : index
      %c0_164 = arith.constant 0 : index
      %113 = vector.load %arg5[%c2_160, %c1_161, %c2_162, %c0_163, %c0_164] : memref<3x3x3x8x4xbf16, #tpu.memory_space<vmem>>, vector<1x1x1x8x4xbf16>
      %114 = vector.shape_cast %113 : vector<1x1x1x8x4xbf16> to vector<8x4xbf16>
      %cst_165 = arith.constant dense<0.000000e+00> : vector<8x80xf32>
      %115 = tpu.matmul %114, %112, %cst_165 {dimension_numbers = #tpu.dot_dimension_numbers<[1], [0], [0], [1], [0, 0, 1, 1], [], []>} : vector<8x4xbf16>, vector<4x80xbf16>, vector<8x80xf32> -> vector<8x80xf32>
      %116 = arith.addf %110, %115 : vector<8x80xf32>
      %c0_166 = arith.constant 0 : index
      %c0_167 = arith.constant 0 : index
      %c0_168 = arith.constant 0 : index
      %c20_169 = arith.constant 20 : index
      %117 = vector.load %arg4[%c0_166, %c0_167, %c0_168, %c20_169] : memref<1x1x4x128xbf16, #tpu.memory_space<vmem>>, vector<1x1x4x80xbf16>
      %118 = vector.shape_cast %117 : vector<1x1x4x80xbf16> to vector<4x80xbf16>
      %c2_170 = arith.constant 2 : index
      %c2_171 = arith.constant 2 : index
      %c0_172 = arith.constant 0 : index
      %c0_173 = arith.constant 0 : index
      %c0_174 = arith.constant 0 : index
      %119 = vector.load %arg5[%c2_170, %c2_171, %c0_172, %c0_173, %c0_174] : memref<3x3x3x8x4xbf16, #tpu.memory_space<vmem>>, vector<1x1x1x8x4xbf16>
      %120 = vector.shape_cast %119 : vector<1x1x1x8x4xbf16> to vector<8x4xbf16>
      %cst_175 = arith.constant dense<0.000000e+00> : vector<8x80xf32>
      %121 = tpu.matmul %120, %118, %cst_175 {dimension_numbers = #tpu.dot_dimension_numbers<[1], [0], [0], [1], [0, 0, 1, 1], [], []>} : vector<8x4xbf16>, vector<4x80xbf16>, vector<8x80xf32> -> vector<8x80xf32>
      %122 = arith.addf %116, %121 : vector<8x80xf32>
      %c0_176 = arith.constant 0 : index
      %c0_177 = arith.constant 0 : index
      %c0_178 = arith.constant 0 : index
      %c21_179 = arith.constant 21 : index
      %123 = vector.load %arg4[%c0_176, %c0_177, %c0_178, %c21_179] : memref<1x1x4x128xbf16, #tpu.memory_space<vmem>>, vector<1x1x4x80xbf16>
      %124 = vector.shape_cast %123 : vector<1x1x4x80xbf16> to vector<4x80xbf16>
      %c2_180 = arith.constant 2 : index
      %c2_181 = arith.constant 2 : index
      %c1_182 = arith.constant 1 : index
      %c0_183 = arith.constant 0 : index
      %c0_184 = arith.constant 0 : index
      %125 = vector.load %arg5[%c2_180, %c2_181, %c1_182, %c0_183, %c0_184] : memref<3x3x3x8x4xbf16, #tpu.memory_space<vmem>>, vector<1x1x1x8x4xbf16>
      %126 = vector.shape_cast %125 : vector<1x1x1x8x4xbf16> to vector<8x4xbf16>
      %cst_185 = arith.constant dense<0.000000e+00> : vector<8x80xf32>
      %127 = tpu.matmul %126, %124, %cst_185 {dimension_numbers = #tpu.dot_dimension_numbers<[1], [0], [0], [1], [0, 0, 1, 1], [], []>} : vector<8x4xbf16>, vector<4x80xbf16>, vector<8x80xf32> -> vector<8x80xf32>
      %128 = arith.addf %122, %127 : vector<8x80xf32>
      %c0_186 = arith.constant 0 : index
      %c0_187 = arith.constant 0 : index
      %c0_188 = arith.constant 0 : index
      %c22_189 = arith.constant 22 : index
      %129 = vector.load %arg4[%c0_186, %c0_187, %c0_188, %c22_189] : memref<1x1x4x128xbf16, #tpu.memory_space<vmem>>, vector<1x1x4x80xbf16>
      %130 = vector.shape_cast %129 : vector<1x1x4x80xbf16> to vector<4x80xbf16>
      %c2_190 = arith.constant 2 : index
      %c2_191 = arith.constant 2 : index
      %c2_192 = arith.constant 2 : index
      %c0_193 = arith.constant 0 : index
      %c0_194 = arith.constant 0 : index
      %131 = vector.load %arg5[%c2_190, %c2_191, %c2_192, %c0_193, %c0_194] : memref<3x3x3x8x4xbf16, #tpu.memory_space<vmem>>, vector<1x1x1x8x4xbf16>
      %132 = vector.shape_cast %131 : vector<1x1x1x8x4xbf16> to vector<8x4xbf16>
      %cst_195 = arith.constant dense<0.000000e+00> : vector<8x80xf32>
      %133 = tpu.matmul %132, %130, %cst_195 {dimension_numbers = #tpu.dot_dimension_numbers<[1], [0], [0], [1], [0, 0, 1, 1], [], []>} : vector<8x4xbf16>, vector<4x80xbf16>, vector<8x80xf32> -> vector<8x80xf32>
      %134 = arith.addf %128, %133 : vector<8x80xf32>
      %135 = arith.addf %81, %134 : vector<8x80xf32>
      %c0_196 = arith.constant 0 : index
      %c0_197 = arith.constant 0 : index
      %136 = vector.load %arg9[%c0_196, %c0_197] : memref<8x80xf32, #tpu.memory_space<vmem>>, vector<8x80xf32>
      tpu.vector_store %arg9[%c0_196, %c0_197], %135 {strides = array<i32>} : memref<8x80xf32, #tpu.memory_space<vmem>>, vector<8x80xf32>,
    } else {
    }
    %c0_84 = arith.constant 0 : index
    %c0_85 = arith.constant 0 : index
    %60 = vector.load %arg9[%c0_84, %c0_85] : memref<8x80xf32, #tpu.memory_space<vmem>>, vector<8x80xf32>
    %c0_86 = arith.constant 0 : index
    %c0_87 = arith.constant 0 : index
    %61 = vector.load %arg6[%c0_86, %c0_87] : memref<8x1xf32, #tpu.memory_space<vmem>>, vector<8x1xf32>
    %62 = vector.broadcast %61 : vector<8x1xf32> to vector<8x80xf32>
    %63 = arith.addf %60, %62 : vector<8x80xf32>
    %cst_88 = arith.constant 0.000000e+00 : f32
    %64 = vector.broadcast %cst_88 : f32 to vector<8x80xf32>
    %65 = arith.maximumf %63, %64 : vector<8x80xf32>
    %c0_89 = arith.constant 0 : index
    %c0_90 = arith.constant 0 : index
    %66 = vector.load %arg7[%c0_89, %c0_90] : memref<1x80xf32, #tpu.memory_space<vmem>>, vector<1x80xf32>
    %67 = vector.broadcast %66 : vector<1x80xf32> to vector<8x80xf32>
    %68 = arith.mulf %65, %67 : vector<8x80xf32>
    %cst_91 = arith.constant 0.000000e+00 : bf16
    %69 = vector.broadcast %cst_91 : bf16 to vector<8x11xbf16>
    %c0_92 = arith.constant 0 : index
    %c0_93 = arith.constant 0 : index
    %c0_94 = arith.constant 0 : index
    %c0_95 = arith.constant 0 : index
    %70 = vector.load %arg8[%c0_92, %c0_93, %c0_94, %c0_95] : memref<1x1x8x128xbf16, #tpu.memory_space<vmem>>, vector<1x1x8x11xbf16>
    %71 = vector.shape_cast %70 : vector<1x1x8x11xbf16> to vector<8x11xbf16>
    %72 = vector.shape_cast %69 : vector<8x11xbf16> to vector<1x1x8x11xbf16>
    tpu.vector_store %arg8[%c0_92, %c0_93, %c0_94, %c0_95], %72 {strides = array<i32>} : memref<1x1x8x128xbf16, #tpu.memory_space<vmem>>, vector<1x1x8x11xbf16>,
    %73 = arith.truncf %68 : vector<8x80xf32> to vector<8x80xbf16>
    %c0_96 = arith.constant 0 : index
    %c0_97 = arith.constant 0 : index
    %c0_98 = arith.constant 0 : index
    %c11_99 = arith.constant 11 : index
    %74 = vector.load %arg8[%c0_96, %c0_97, %c0_98, %c11_99] : memref<1x1x8x128xbf16, #tpu.memory_space<vmem>>, vector<1x1x8x80xbf16>
    %75 = vector.shape_cast %74 : vector<1x1x8x80xbf16> to vector<8x80xbf16>
    %76 = vector.shape_cast %73 : vector<8x80xbf16> to vector<1x1x8x80xbf16>
    tpu.vector_store %arg8[%c0_96, %c0_97, %c0_98, %c11_99], %76 {strides = array<i32>} : memref<1x1x8x128xbf16, #tpu.memory_space<vmem>>, vector<1x1x8x80xbf16>,
    %cst_100 = arith.constant 0.000000e+00 : bf16
    %77 = vector.broadcast %cst_100 : bf16 to vector<8x37xbf16>
    %c0_101 = arith.constant 0 : index
    %c0_102 = arith.constant 0 : index
    %c0_103 = arith.constant 0 : index
    %c91 = arith.constant 91 : index
    %78 = vector.load %arg8[%c0_101, %c0_102, %c0_103, %c91] : memref<1x1x8x128xbf16, #tpu.memory_space<vmem>>, vector<1x1x8x37xbf16>
    %79 = vector.shape_cast %78 : vector<1x1x8x37xbf16> to vector<8x37xbf16>
    %80 = vector.shape_cast %77 : vector<8x37xbf16> to vector<1x1x8x37xbf16>
    tpu.vector_store %arg8[%c0_101, %c0_102, %c0_103, %c91], %80 {strides = array<i32>} : memref<1x1x8x128xbf16, #tpu.memory_space<vmem>>, vector<1x1x8x37xbf16>,
    return
  }
  func.func @transform_0(%arg0: i32, %arg1: i32) -> (i32, i32, i32, i32) {
    %c1_i32 = arith.constant 1 : i32
    %0 = arith.subi %arg1, %c1_i32 : i32
    %c0_i32 = arith.constant 0 : i32
    %1 = arith.maxsi %0, %c0_i32 : i32
    %c0_i32_0 = arith.constant 0 : i32
    %c0_i32_1 = arith.constant 0 : i32
    %c0_i32_2 = arith.constant 0 : i32
    return %arg0, %1, %c0_i32_0, %c0_i32_1 : i32, i32, i32, i32
  }
  func.func @transform_1(%arg0: i32, %arg1: i32) -> (i32, i32, i32, i32) {
    %c0_i32 = arith.constant 0 : i32
    %c0_i32_0 = arith.constant 0 : i32
    %c0_i32_1 = arith.constant 0 : i32
    return %arg0, %arg1, %c0_i32, %c0_i32_0 : i32, i32, i32, i32
  }
  func.func @transform_2(%arg0: i32, %arg1: i32) -> (i32, i32, i32, i32) {
    %c1_i32 = arith.constant 1 : i32
    %0 = arith.addi %arg1, %c1_i32 : i32
    %c3_i32 = arith.constant 3 : i32
    %1 = arith.minsi %0, %c3_i32 : i32
    %c0_i32 = arith.constant 0 : i32
    %c0_i32_0 = arith.constant 0 : i32
    %c0_i32_1 = arith.constant 0 : i32
    return %arg0, %1, %c0_i32, %c0_i32_0 : i32, i32, i32, i32
  }
  func.func @transform_3(%arg0: i32, %arg1: i32) -> (i32, i32, i32, i32, i32) {
    %c0_i32 = arith.constant 0 : i32
    %c0_i32_0 = arith.constant 0 : i32
    %c0_i32_1 = arith.constant 0 : i32
    %c0_i32_2 = arith.constant 0 : i32
    %c0_i32_3 = arith.constant 0 : i32
    %c0_i32_4 = arith.constant 0 : i32
    return %c0_i32, %c0_i32_0, %c0_i32_1, %c0_i32_2, %c0_i32_3 : i32, i32, i32, i32, i32
  }
  func.func @transform_4(%arg0: i32, %arg1: i32) -> (i32, i32) {
    %c0_i32 = arith.constant 0 : i32
    %c0_i32_0 = arith.constant 0 : i32
    %c0_i32_1 = arith.constant 0 : i32
    return %c0_i32, %c0_i32_0 : i32, i32
  }
  func.func @transform_5(%arg0: i32, %arg1: i32) -> (i32, i32) {
    %c0_i32 = arith.constant 0 : i32
    %c0_i32_0 = arith.constant 0 : i32
    %c0_i32_1 = arith.constant 0 : i32
    return %c0_i32, %c0_i32_0 : i32, i32
  }
  func.func @transform_6(%arg0: i32, %arg1: i32) -> (i32, i32, i32, i32) {
    %c0_i32 = arith.constant 0 : i32
    %c0_i32_0 = arith.constant 0 : i32
    %c0_i32_1 = arith.constant 0 : i32
    return %arg0, %arg1, %c0_i32, %c0_i32_0 : i32, i32, i32, i32
  }
}

module attributes {stable_mosaic.version = 11 : i64} {
  func.func @_conv3x3x3_kernel(%arg0: i32, %arg1: i32, %arg2: memref<1x1x8x128xbf16, #tpu.memory_space<vmem>>, %arg3: memref<1x1x8x128xbf16, #tpu.memory_space<vmem>>, %arg4: memref<1x1x8x128xbf16, #tpu.memory_space<vmem>>, %arg5: memref<3x3x3x8x8xbf16, #tpu.memory_space<vmem>>, %arg6: memref<8x1xf32, #tpu.memory_space<vmem>>, %arg7: memref<1x80xf32, #tpu.memory_space<vmem>>, %arg8: memref<1x1x8x128xbf16, #tpu.memory_space<vmem>>, %arg9: memref<8x80xf32, #tpu.memory_space<vmem>>) attributes {dimension_semantics = [#tpu.dimension_semantics<parallel>, #tpu.dimension_semantics<parallel>], iteration_bounds = array<i64: 2, 4>, scalar_prefetch = 0 : i64, scratch_operands = 1 : i64, tpu.core_type = #tpu.core_type<tc>, window_params = [{transform_indices = @transform_0, window_bounds = array<i64: 1, 1, 8, 128>}, {transform_indices = @transform_1, window_bounds = array<i64: 1, 1, 8, 128>}, {transform_indices = @transform_2, window_bounds = array<i64: 1, 1, 8, 128>}, {pipeline_mode = #tpu.pipeline_mode<synchronous>, transform_indices = @transform_3, window_bounds = array<i64: 3, 3, 3, 8, 8>}, {pipeline_mode = #tpu.pipeline_mode<synchronous>, transform_indices = @transform_4, window_bounds = array<i64: 8, 1>}, {pipeline_mode = #tpu.pipeline_mode<synchronous>, transform_indices = @transform_5, window_bounds = array<i64: 1, 80>}, {transform_indices = @transform_6, window_bounds = array<i64: 1, 1, 8, 128>}]} {
    %c0 = arith.constant 0 : index
    %c0_0 = arith.constant 0 : index
    %c0_1 = arith.constant 0 : index
    %c0_2 = arith.constant 0 : index
    %0 = vector.load %arg3[%c0, %c0_0, %c0_1, %c0_2] : memref<1x1x8x128xbf16, #tpu.memory_space<vmem>>, vector<1x1x8x80xbf16>
    %1 = vector.shape_cast %0 : vector<1x1x8x80xbf16> to vector<8x80xbf16>
    %c1 = arith.constant 1 : index
    %c0_3 = arith.constant 0 : index
    %c0_4 = arith.constant 0 : index
    %c0_5 = arith.constant 0 : index
    %c0_6 = arith.constant 0 : index
    %2 = vector.load %arg5[%c1, %c0_3, %c0_4, %c0_5, %c0_6] : memref<3x3x3x8x8xbf16, #tpu.memory_space<vmem>>, vector<1x1x1x8x8xbf16>
    %3 = vector.shape_cast %2 : vector<1x1x1x8x8xbf16> to vector<8x8xbf16>
    %cst = arith.constant dense<0.000000e+00> : vector<8x80xf32>
    %4 = tpu.matmul %3, %1, %cst {dimension_numbers = #tpu.dot_dimension_numbers<[1], [0], [0], [1], [0, 0, 1, 1], [], []>} : vector<8x8xbf16>, vector<8x80xbf16>, vector<8x80xf32> -> vector<8x80xf32>
    %c0_7 = arith.constant 0 : index
    %c0_8 = arith.constant 0 : index
    %c0_9 = arith.constant 0 : index
    %c1_10 = arith.constant 1 : index
    %5 = vector.load %arg3[%c0_7, %c0_8, %c0_9, %c1_10] : memref<1x1x8x128xbf16, #tpu.memory_space<vmem>>, vector<1x1x8x80xbf16>
    %6 = vector.shape_cast %5 : vector<1x1x8x80xbf16> to vector<8x80xbf16>
    %c1_11 = arith.constant 1 : index
    %c0_12 = arith.constant 0 : index
    %c1_13 = arith.constant 1 : index
    %c0_14 = arith.constant 0 : index
    %c0_15 = arith.constant 0 : index
    %7 = vector.load %arg5[%c1_11, %c0_12, %c1_13, %c0_14, %c0_15] : memref<3x3x3x8x8xbf16, #tpu.memory_space<vmem>>, vector<1x1x1x8x8xbf16>
    %8 = vector.shape_cast %7 : vector<1x1x1x8x8xbf16> to vector<8x8xbf16>
    %cst_16 = arith.constant dense<0.000000e+00> : vector<8x80xf32>
    %9 = tpu.matmul %8, %6, %cst_16 {dimension_numbers = #tpu.dot_dimension_numbers<[1], [0], [0], [1], [0, 0, 1, 1], [], []>} : vector<8x8xbf16>, vector<8x80xbf16>, vector<8x80xf32> -> vector<8x80xf32>
    %10 = arith.addf %4, %9 : vector<8x80xf32>
    %c0_17 = arith.constant 0 : index
    %c0_18 = arith.constant 0 : index
    %c0_19 = arith.constant 0 : index
    %c2 = arith.constant 2 : index
    %11 = vector.load %arg3[%c0_17, %c0_18, %c0_19, %c2] : memref<1x1x8x128xbf16, #tpu.memory_space<vmem>>, vector<1x1x8x80xbf16>
    %12 = vector.shape_cast %11 : vector<1x1x8x80xbf16> to vector<8x80xbf16>
    %c1_20 = arith.constant 1 : index
    %c0_21 = arith.constant 0 : index
    %c2_22 = arith.constant 2 : index
    %c0_23 = arith.constant 0 : index
    %c0_24 = arith.constant 0 : index
    %13 = vector.load %arg5[%c1_20, %c0_21, %c2_22, %c0_23, %c0_24] : memref<3x3x3x8x8xbf16, #tpu.memory_space<vmem>>, vector<1x1x1x8x8xbf16>
    %14 = vector.shape_cast %13 : vector<1x1x1x8x8xbf16> to vector<8x8xbf16>
    %cst_25 = arith.constant dense<0.000000e+00> : vector<8x80xf32>
    %15 = tpu.matmul %14, %12, %cst_25 {dimension_numbers = #tpu.dot_dimension_numbers<[1], [0], [0], [1], [0, 0, 1, 1], [], []>} : vector<8x8xbf16>, vector<8x80xbf16>, vector<8x80xf32> -> vector<8x80xf32>
    %16 = arith.addf %10, %15 : vector<8x80xf32>
    %c0_26 = arith.constant 0 : index
    %c0_27 = arith.constant 0 : index
    %c0_28 = arith.constant 0 : index
    %c10 = arith.constant 10 : index
    %17 = vector.load %arg3[%c0_26, %c0_27, %c0_28, %c10] : memref<1x1x8x128xbf16, #tpu.memory_space<vmem>>, vector<1x1x8x80xbf16>
    %18 = vector.shape_cast %17 : vector<1x1x8x80xbf16> to vector<8x80xbf16>
    %c1_29 = arith.constant 1 : index
    %c1_30 = arith.constant 1 : index
    %c0_31 = arith.constant 0 : index
    %c0_32 = arith.constant 0 : index
    %c0_33 = arith.constant 0 : index
    %19 = vector.load %arg5[%c1_29, %c1_30, %c0_31, %c0_32, %c0_33] : memref<3x3x3x8x8xbf16, #tpu.memory_space<vmem>>, vector<1x1x1x8x8xbf16>
    %20 = vector.shape_cast %19 : vector<1x1x1x8x8xbf16> to vector<8x8xbf16>
    %cst_34 = arith.constant dense<0.000000e+00> : vector<8x80xf32>
    %21 = tpu.matmul %20, %18, %cst_34 {dimension_numbers = #tpu.dot_dimension_numbers<[1], [0], [0], [1], [0, 0, 1, 1], [], []>} : vector<8x8xbf16>, vector<8x80xbf16>, vector<8x80xf32> -> vector<8x80xf32>
    %22 = arith.addf %16, %21 : vector<8x80xf32>
    %c0_35 = arith.constant 0 : index
    %c0_36 = arith.constant 0 : index
    %c0_37 = arith.constant 0 : index
    %c11 = arith.constant 11 : index
    %23 = vector.load %arg3[%c0_35, %c0_36, %c0_37, %c11] : memref<1x1x8x128xbf16, #tpu.memory_space<vmem>>, vector<1x1x8x80xbf16>
    %24 = vector.shape_cast %23 : vector<1x1x8x80xbf16> to vector<8x80xbf16>
    %c1_38 = arith.constant 1 : index
    %c1_39 = arith.constant 1 : index
    %c1_40 = arith.constant 1 : index
    %c0_41 = arith.constant 0 : index
    %c0_42 = arith.constant 0 : index
    %25 = vector.load %arg5[%c1_38, %c1_39, %c1_40, %c0_41, %c0_42] : memref<3x3x3x8x8xbf16, #tpu.memory_space<vmem>>, vector<1x1x1x8x8xbf16>
    %26 = vector.shape_cast %25 : vector<1x1x1x8x8xbf16> to vector<8x8xbf16>
    %cst_43 = arith.constant dense<0.000000e+00> : vector<8x80xf32>
    %27 = tpu.matmul %26, %24, %cst_43 {dimension_numbers = #tpu.dot_dimension_numbers<[1], [0], [0], [1], [0, 0, 1, 1], [], []>} : vector<8x8xbf16>, vector<8x80xbf16>, vector<8x80xf32> -> vector<8x80xf32>
    %28 = arith.addf %22, %27 : vector<8x80xf32>
    %c0_44 = arith.constant 0 : index
    %c0_45 = arith.constant 0 : index
    %c0_46 = arith.constant 0 : index
    %c12 = arith.constant 12 : index
    %29 = vector.load %arg3[%c0_44, %c0_45, %c0_46, %c12] : memref<1x1x8x128xbf16, #tpu.memory_space<vmem>>, vector<1x1x8x80xbf16>
    %30 = vector.shape_cast %29 : vector<1x1x8x80xbf16> to vector<8x80xbf16>
    %c1_47 = arith.constant 1 : index
    %c1_48 = arith.constant 1 : index
    %c2_49 = arith.constant 2 : index
    %c0_50 = arith.constant 0 : index
    %c0_51 = arith.constant 0 : index
    %31 = vector.load %arg5[%c1_47, %c1_48, %c2_49, %c0_50, %c0_51] : memref<3x3x3x8x8xbf16, #tpu.memory_space<vmem>>, vector<1x1x1x8x8xbf16>
    %32 = vector.shape_cast %31 : vector<1x1x1x8x8xbf16> to vector<8x8xbf16>
    %cst_52 = arith.constant dense<0.000000e+00> : vector<8x80xf32>
    %33 = tpu.matmul %32, %30, %cst_52 {dimension_numbers = #tpu.dot_dimension_numbers<[1], [0], [0], [1], [0, 0, 1, 1], [], []>} : vector<8x8xbf16>, vector<8x80xbf16>, vector<8x80xf32> -> vector<8x80xf32>
    %34 = arith.addf %28, %33 : vector<8x80xf32>
    %c0_53 = arith.constant 0 : index
    %c0_54 = arith.constant 0 : index
    %c0_55 = arith.constant 0 : index
    %c20 = arith.constant 20 : index
    %35 = vector.load %arg3[%c0_53, %c0_54, %c0_55, %c20] : memref<1x1x8x128xbf16, #tpu.memory_space<vmem>>, vector<1x1x8x80xbf16>
    %36 = vector.shape_cast %35 : vector<1x1x8x80xbf16> to vector<8x80xbf16>
    %c1_56 = arith.constant 1 : index
    %c2_57 = arith.constant 2 : index
    %c0_58 = arith.constant 0 : index
    %c0_59 = arith.constant 0 : index
    %c0_60 = arith.constant 0 : index
    %37 = vector.load %arg5[%c1_56, %c2_57, %c0_58, %c0_59, %c0_60] : memref<3x3x3x8x8xbf16, #tpu.memory_space<vmem>>, vector<1x1x1x8x8xbf16>
    %38 = vector.shape_cast %37 : vector<1x1x1x8x8xbf16> to vector<8x8xbf16>
    %cst_61 = arith.constant dense<0.000000e+00> : vector<8x80xf32>
    %39 = tpu.matmul %38, %36, %cst_61 {dimension_numbers = #tpu.dot_dimension_numbers<[1], [0], [0], [1], [0, 0, 1, 1], [], []>} : vector<8x8xbf16>, vector<8x80xbf16>, vector<8x80xf32> -> vector<8x80xf32>
    %40 = arith.addf %34, %39 : vector<8x80xf32>
    %c0_62 = arith.constant 0 : index
    %c0_63 = arith.constant 0 : index
    %c0_64 = arith.constant 0 : index
    %c21 = arith.constant 21 : index
    %41 = vector.load %arg3[%c0_62, %c0_63, %c0_64, %c21] : memref<1x1x8x128xbf16, #tpu.memory_space<vmem>>, vector<1x1x8x80xbf16>
    %42 = vector.shape_cast %41 : vector<1x1x8x80xbf16> to vector<8x80xbf16>
    %c1_65 = arith.constant 1 : index
    %c2_66 = arith.constant 2 : index
    %c1_67 = arith.constant 1 : index
    %c0_68 = arith.constant 0 : index
    %c0_69 = arith.constant 0 : index
    %43 = vector.load %arg5[%c1_65, %c2_66, %c1_67, %c0_68, %c0_69] : memref<3x3x3x8x8xbf16, #tpu.memory_space<vmem>>, vector<1x1x1x8x8xbf16>
    %44 = vector.shape_cast %43 : vector<1x1x1x8x8xbf16> to vector<8x8xbf16>
    %cst_70 = arith.constant dense<0.000000e+00> : vector<8x80xf32>
    %45 = tpu.matmul %44, %42, %cst_70 {dimension_numbers = #tpu.dot_dimension_numbers<[1], [0], [0], [1], [0, 0, 1, 1], [], []>} : vector<8x8xbf16>, vector<8x80xbf16>, vector<8x80xf32> -> vector<8x80xf32>
    %46 = arith.addf %40, %45 : vector<8x80xf32>
    %c0_71 = arith.constant 0 : index
    %c0_72 = arith.constant 0 : index
    %c0_73 = arith.constant 0 : index
    %c22 = arith.constant 22 : index
    %47 = vector.load %arg3[%c0_71, %c0_72, %c0_73, %c22] : memref<1x1x8x128xbf16, #tpu.memory_space<vmem>>, vector<1x1x8x80xbf16>
    %48 = vector.shape_cast %47 : vector<1x1x8x80xbf16> to vector<8x80xbf16>
    %c1_74 = arith.constant 1 : index
    %c2_75 = arith.constant 2 : index
    %c2_76 = arith.constant 2 : index
    %c0_77 = arith.constant 0 : index
    %c0_78 = arith.constant 0 : index
    %49 = vector.load %arg5[%c1_74, %c2_75, %c2_76, %c0_77, %c0_78] : memref<3x3x3x8x8xbf16, #tpu.memory_space<vmem>>, vector<1x1x1x8x8xbf16>
    %50 = vector.shape_cast %49 : vector<1x1x1x8x8xbf16> to vector<8x8xbf16>
    %cst_79 = arith.constant dense<0.000000e+00> : vector<8x80xf32>
    %51 = tpu.matmul %50, %48, %cst_79 {dimension_numbers = #tpu.dot_dimension_numbers<[1], [0], [0], [1], [0, 0, 1, 1], [], []>} : vector<8x8xbf16>, vector<8x80xbf16>, vector<8x80xf32> -> vector<8x80xf32>
    %52 = arith.addf %46, %51 : vector<8x80xf32>
    %c0_80 = arith.constant 0 : index
    %c0_81 = arith.constant 0 : index
    %53 = vector.load %arg9[%c0_80, %c0_81] : memref<8x80xf32, #tpu.memory_space<vmem>>, vector<8x80xf32>
    tpu.vector_store %arg9[%c0_80, %c0_81], %52 {strides = array<i32>} : memref<8x80xf32, #tpu.memory_space<vmem>>, vector<8x80xf32>,
    %c0_i32 = arith.constant 0 : i32
    %54 = arith.cmpi sgt, %arg1, %c0_i32 : i32
    %55 = arith.extui %54 : i1 to i32
    %c0_i32_82 = arith.constant 0 : i32
    %56 = arith.cmpi ne, %55, %c0_i32_82 : i32
    scf.if %56 {
      %c0_104 = arith.constant 0 : index
      %c0_105 = arith.constant 0 : index
      %81 = vector.load %arg9[%c0_104, %c0_105] : memref<8x80xf32, #tpu.memory_space<vmem>>, vector<8x80xf32>
      %c0_106 = arith.constant 0 : index
      %c0_107 = arith.constant 0 : index
      %c0_108 = arith.constant 0 : index
      %c0_109 = arith.constant 0 : index
      %82 = vector.load %arg2[%c0_106, %c0_107, %c0_108, %c0_109] : memref<1x1x8x128xbf16, #tpu.memory_space<vmem>>, vector<1x1x8x80xbf16>
      %83 = vector.shape_cast %82 : vector<1x1x8x80xbf16> to vector<8x80xbf16>
      %c0_110 = arith.constant 0 : index
      %c0_111 = arith.constant 0 : index
      %c0_112 = arith.constant 0 : index
      %c0_113 = arith.constant 0 : index
      %c0_114 = arith.constant 0 : index
      %84 = vector.load %arg5[%c0_110, %c0_111, %c0_112, %c0_113, %c0_114] : memref<3x3x3x8x8xbf16, #tpu.memory_space<vmem>>, vector<1x1x1x8x8xbf16>
      %85 = vector.shape_cast %84 : vector<1x1x1x8x8xbf16> to vector<8x8xbf16>
      %cst_115 = arith.constant dense<0.000000e+00> : vector<8x80xf32>
      %86 = tpu.matmul %85, %83, %cst_115 {dimension_numbers = #tpu.dot_dimension_numbers<[1], [0], [0], [1], [0, 0, 1, 1], [], []>} : vector<8x8xbf16>, vector<8x80xbf16>, vector<8x80xf32> -> vector<8x80xf32>
      %c0_116 = arith.constant 0 : index
      %c0_117 = arith.constant 0 : index
      %c0_118 = arith.constant 0 : index
      %c1_119 = arith.constant 1 : index
      %87 = vector.load %arg2[%c0_116, %c0_117, %c0_118, %c1_119] : memref<1x1x8x128xbf16, #tpu.memory_space<vmem>>, vector<1x1x8x80xbf16>
      %88 = vector.shape_cast %87 : vector<1x1x8x80xbf16> to vector<8x80xbf16>
      %c0_120 = arith.constant 0 : index
      %c0_121 = arith.constant 0 : index
      %c1_122 = arith.constant 1 : index
      %c0_123 = arith.constant 0 : index
      %c0_124 = arith.constant 0 : index
      %89 = vector.load %arg5[%c0_120, %c0_121, %c1_122, %c0_123, %c0_124] : memref<3x3x3x8x8xbf16, #tpu.memory_space<vmem>>, vector<1x1x1x8x8xbf16>
      %90 = vector.shape_cast %89 : vector<1x1x1x8x8xbf16> to vector<8x8xbf16>
      %cst_125 = arith.constant dense<0.000000e+00> : vector<8x80xf32>
      %91 = tpu.matmul %90, %88, %cst_125 {dimension_numbers = #tpu.dot_dimension_numbers<[1], [0], [0], [1], [0, 0, 1, 1], [], []>} : vector<8x8xbf16>, vector<8x80xbf16>, vector<8x80xf32> -> vector<8x80xf32>
      %92 = arith.addf %86, %91 : vector<8x80xf32>
      %c0_126 = arith.constant 0 : index
      %c0_127 = arith.constant 0 : index
      %c0_128 = arith.constant 0 : index
      %c2_129 = arith.constant 2 : index
      %93 = vector.load %arg2[%c0_126, %c0_127, %c0_128, %c2_129] : memref<1x1x8x128xbf16, #tpu.memory_space<vmem>>, vector<1x1x8x80xbf16>
      %94 = vector.shape_cast %93 : vector<1x1x8x80xbf16> to vector<8x80xbf16>
      %c0_130 = arith.constant 0 : index
      %c0_131 = arith.constant 0 : index
      %c2_132 = arith.constant 2 : index
      %c0_133 = arith.constant 0 : index
      %c0_134 = arith.constant 0 : index
      %95 = vector.load %arg5[%c0_130, %c0_131, %c2_132, %c0_133, %c0_134] : memref<3x3x3x8x8xbf16, #tpu.memory_space<vmem>>, vector<1x1x1x8x8xbf16>
      %96 = vector.shape_cast %95 : vector<1x1x1x8x8xbf16> to vector<8x8xbf16>
      %cst_135 = arith.constant dense<0.000000e+00> : vector<8x80xf32>
      %97 = tpu.matmul %96, %94, %cst_135 {dimension_numbers = #tpu.dot_dimension_numbers<[1], [0], [0], [1], [0, 0, 1, 1], [], []>} : vector<8x8xbf16>, vector<8x80xbf16>, vector<8x80xf32> -> vector<8x80xf32>
      %98 = arith.addf %92, %97 : vector<8x80xf32>
      %c0_136 = arith.constant 0 : index
      %c0_137 = arith.constant 0 : index
      %c0_138 = arith.constant 0 : index
      %c10_139 = arith.constant 10 : index
      %99 = vector.load %arg2[%c0_136, %c0_137, %c0_138, %c10_139] : memref<1x1x8x128xbf16, #tpu.memory_space<vmem>>, vector<1x1x8x80xbf16>
      %100 = vector.shape_cast %99 : vector<1x1x8x80xbf16> to vector<8x80xbf16>
      %c0_140 = arith.constant 0 : index
      %c1_141 = arith.constant 1 : index
      %c0_142 = arith.constant 0 : index
      %c0_143 = arith.constant 0 : index
      %c0_144 = arith.constant 0 : index
      %101 = vector.load %arg5[%c0_140, %c1_141, %c0_142, %c0_143, %c0_144] : memref<3x3x3x8x8xbf16, #tpu.memory_space<vmem>>, vector<1x1x1x8x8xbf16>
      %102 = vector.shape_cast %101 : vector<1x1x1x8x8xbf16> to vector<8x8xbf16>
      %cst_145 = arith.constant dense<0.000000e+00> : vector<8x80xf32>
      %103 = tpu.matmul %102, %100, %cst_145 {dimension_numbers = #tpu.dot_dimension_numbers<[1], [0], [0], [1], [0, 0, 1, 1], [], []>} : vector<8x8xbf16>, vector<8x80xbf16>, vector<8x80xf32> -> vector<8x80xf32>
      %104 = arith.addf %98, %103 : vector<8x80xf32>
      %c0_146 = arith.constant 0 : index
      %c0_147 = arith.constant 0 : index
      %c0_148 = arith.constant 0 : index
      %c11_149 = arith.constant 11 : index
      %105 = vector.load %arg2[%c0_146, %c0_147, %c0_148, %c11_149] : memref<1x1x8x128xbf16, #tpu.memory_space<vmem>>, vector<1x1x8x80xbf16>
      %106 = vector.shape_cast %105 : vector<1x1x8x80xbf16> to vector<8x80xbf16>
      %c0_150 = arith.constant 0 : index
      %c1_151 = arith.constant 1 : index
      %c1_152 = arith.constant 1 : index
      %c0_153 = arith.constant 0 : index
      %c0_154 = arith.constant 0 : index
      %107 = vector.load %arg5[%c0_150, %c1_151, %c1_152, %c0_153, %c0_154] : memref<3x3x3x8x8xbf16, #tpu.memory_space<vmem>>, vector<1x1x1x8x8xbf16>
      %108 = vector.shape_cast %107 : vector<1x1x1x8x8xbf16> to vector<8x8xbf16>
      %cst_155 = arith.constant dense<0.000000e+00> : vector<8x80xf32>
      %109 = tpu.matmul %108, %106, %cst_155 {dimension_numbers = #tpu.dot_dimension_numbers<[1], [0], [0], [1], [0, 0, 1, 1], [], []>} : vector<8x8xbf16>, vector<8x80xbf16>, vector<8x80xf32> -> vector<8x80xf32>
      %110 = arith.addf %104, %109 : vector<8x80xf32>
      %c0_156 = arith.constant 0 : index
      %c0_157 = arith.constant 0 : index
      %c0_158 = arith.constant 0 : index
      %c12_159 = arith.constant 12 : index
      %111 = vector.load %arg2[%c0_156, %c0_157, %c0_158, %c12_159] : memref<1x1x8x128xbf16, #tpu.memory_space<vmem>>, vector<1x1x8x80xbf16>
      %112 = vector.shape_cast %111 : vector<1x1x8x80xbf16> to vector<8x80xbf16>
      %c0_160 = arith.constant 0 : index
      %c1_161 = arith.constant 1 : index
      %c2_162 = arith.constant 2 : index
      %c0_163 = arith.constant 0 : index
      %c0_164 = arith.constant 0 : index
      %113 = vector.load %arg5[%c0_160, %c1_161, %c2_162, %c0_163, %c0_164] : memref<3x3x3x8x8xbf16, #tpu.memory_space<vmem>>, vector<1x1x1x8x8xbf16>
      %114 = vector.shape_cast %113 : vector<1x1x1x8x8xbf16> to vector<8x8xbf16>
      %cst_165 = arith.constant dense<0.000000e+00> : vector<8x80xf32>
      %115 = tpu.matmul %114, %112, %cst_165 {dimension_numbers = #tpu.dot_dimension_numbers<[1], [0], [0], [1], [0, 0, 1, 1], [], []>} : vector<8x8xbf16>, vector<8x80xbf16>, vector<8x80xf32> -> vector<8x80xf32>
      %116 = arith.addf %110, %115 : vector<8x80xf32>
      %c0_166 = arith.constant 0 : index
      %c0_167 = arith.constant 0 : index
      %c0_168 = arith.constant 0 : index
      %c20_169 = arith.constant 20 : index
      %117 = vector.load %arg2[%c0_166, %c0_167, %c0_168, %c20_169] : memref<1x1x8x128xbf16, #tpu.memory_space<vmem>>, vector<1x1x8x80xbf16>
      %118 = vector.shape_cast %117 : vector<1x1x8x80xbf16> to vector<8x80xbf16>
      %c0_170 = arith.constant 0 : index
      %c2_171 = arith.constant 2 : index
      %c0_172 = arith.constant 0 : index
      %c0_173 = arith.constant 0 : index
      %c0_174 = arith.constant 0 : index
      %119 = vector.load %arg5[%c0_170, %c2_171, %c0_172, %c0_173, %c0_174] : memref<3x3x3x8x8xbf16, #tpu.memory_space<vmem>>, vector<1x1x1x8x8xbf16>
      %120 = vector.shape_cast %119 : vector<1x1x1x8x8xbf16> to vector<8x8xbf16>
      %cst_175 = arith.constant dense<0.000000e+00> : vector<8x80xf32>
      %121 = tpu.matmul %120, %118, %cst_175 {dimension_numbers = #tpu.dot_dimension_numbers<[1], [0], [0], [1], [0, 0, 1, 1], [], []>} : vector<8x8xbf16>, vector<8x80xbf16>, vector<8x80xf32> -> vector<8x80xf32>
      %122 = arith.addf %116, %121 : vector<8x80xf32>
      %c0_176 = arith.constant 0 : index
      %c0_177 = arith.constant 0 : index
      %c0_178 = arith.constant 0 : index
      %c21_179 = arith.constant 21 : index
      %123 = vector.load %arg2[%c0_176, %c0_177, %c0_178, %c21_179] : memref<1x1x8x128xbf16, #tpu.memory_space<vmem>>, vector<1x1x8x80xbf16>
      %124 = vector.shape_cast %123 : vector<1x1x8x80xbf16> to vector<8x80xbf16>
      %c0_180 = arith.constant 0 : index
      %c2_181 = arith.constant 2 : index
      %c1_182 = arith.constant 1 : index
      %c0_183 = arith.constant 0 : index
      %c0_184 = arith.constant 0 : index
      %125 = vector.load %arg5[%c0_180, %c2_181, %c1_182, %c0_183, %c0_184] : memref<3x3x3x8x8xbf16, #tpu.memory_space<vmem>>, vector<1x1x1x8x8xbf16>
      %126 = vector.shape_cast %125 : vector<1x1x1x8x8xbf16> to vector<8x8xbf16>
      %cst_185 = arith.constant dense<0.000000e+00> : vector<8x80xf32>
      %127 = tpu.matmul %126, %124, %cst_185 {dimension_numbers = #tpu.dot_dimension_numbers<[1], [0], [0], [1], [0, 0, 1, 1], [], []>} : vector<8x8xbf16>, vector<8x80xbf16>, vector<8x80xf32> -> vector<8x80xf32>
      %128 = arith.addf %122, %127 : vector<8x80xf32>
      %c0_186 = arith.constant 0 : index
      %c0_187 = arith.constant 0 : index
      %c0_188 = arith.constant 0 : index
      %c22_189 = arith.constant 22 : index
      %129 = vector.load %arg2[%c0_186, %c0_187, %c0_188, %c22_189] : memref<1x1x8x128xbf16, #tpu.memory_space<vmem>>, vector<1x1x8x80xbf16>
      %130 = vector.shape_cast %129 : vector<1x1x8x80xbf16> to vector<8x80xbf16>
      %c0_190 = arith.constant 0 : index
      %c2_191 = arith.constant 2 : index
      %c2_192 = arith.constant 2 : index
      %c0_193 = arith.constant 0 : index
      %c0_194 = arith.constant 0 : index
      %131 = vector.load %arg5[%c0_190, %c2_191, %c2_192, %c0_193, %c0_194] : memref<3x3x3x8x8xbf16, #tpu.memory_space<vmem>>, vector<1x1x1x8x8xbf16>
      %132 = vector.shape_cast %131 : vector<1x1x1x8x8xbf16> to vector<8x8xbf16>
      %cst_195 = arith.constant dense<0.000000e+00> : vector<8x80xf32>
      %133 = tpu.matmul %132, %130, %cst_195 {dimension_numbers = #tpu.dot_dimension_numbers<[1], [0], [0], [1], [0, 0, 1, 1], [], []>} : vector<8x8xbf16>, vector<8x80xbf16>, vector<8x80xf32> -> vector<8x80xf32>
      %134 = arith.addf %128, %133 : vector<8x80xf32>
      %135 = arith.addf %81, %134 : vector<8x80xf32>
      %c0_196 = arith.constant 0 : index
      %c0_197 = arith.constant 0 : index
      %136 = vector.load %arg9[%c0_196, %c0_197] : memref<8x80xf32, #tpu.memory_space<vmem>>, vector<8x80xf32>
      tpu.vector_store %arg9[%c0_196, %c0_197], %135 {strides = array<i32>} : memref<8x80xf32, #tpu.memory_space<vmem>>, vector<8x80xf32>,
    } else {
    }
    %c3_i32 = arith.constant 3 : i32
    %57 = arith.cmpi slt, %arg1, %c3_i32 : i32
    %58 = arith.extui %57 : i1 to i32
    %c0_i32_83 = arith.constant 0 : i32
    %59 = arith.cmpi ne, %58, %c0_i32_83 : i32
    scf.if %59 {
      %c0_104 = arith.constant 0 : index
      %c0_105 = arith.constant 0 : index
      %81 = vector.load %arg9[%c0_104, %c0_105] : memref<8x80xf32, #tpu.memory_space<vmem>>, vector<8x80xf32>
      %c0_106 = arith.constant 0 : index
      %c0_107 = arith.constant 0 : index
      %c0_108 = arith.constant 0 : index
      %c0_109 = arith.constant 0 : index
      %82 = vector.load %arg4[%c0_106, %c0_107, %c0_108, %c0_109] : memref<1x1x8x128xbf16, #tpu.memory_space<vmem>>, vector<1x1x8x80xbf16>
      %83 = vector.shape_cast %82 : vector<1x1x8x80xbf16> to vector<8x80xbf16>
      %c2_110 = arith.constant 2 : index
      %c0_111 = arith.constant 0 : index
      %c0_112 = arith.constant 0 : index
      %c0_113 = arith.constant 0 : index
      %c0_114 = arith.constant 0 : index
      %84 = vector.load %arg5[%c2_110, %c0_111, %c0_112, %c0_113, %c0_114] : memref<3x3x3x8x8xbf16, #tpu.memory_space<vmem>>, vector<1x1x1x8x8xbf16>
      %85 = vector.shape_cast %84 : vector<1x1x1x8x8xbf16> to vector<8x8xbf16>
      %cst_115 = arith.constant dense<0.000000e+00> : vector<8x80xf32>
      %86 = tpu.matmul %85, %83, %cst_115 {dimension_numbers = #tpu.dot_dimension_numbers<[1], [0], [0], [1], [0, 0, 1, 1], [], []>} : vector<8x8xbf16>, vector<8x80xbf16>, vector<8x80xf32> -> vector<8x80xf32>
      %c0_116 = arith.constant 0 : index
      %c0_117 = arith.constant 0 : index
      %c0_118 = arith.constant 0 : index
      %c1_119 = arith.constant 1 : index
      %87 = vector.load %arg4[%c0_116, %c0_117, %c0_118, %c1_119] : memref<1x1x8x128xbf16, #tpu.memory_space<vmem>>, vector<1x1x8x80xbf16>
      %88 = vector.shape_cast %87 : vector<1x1x8x80xbf16> to vector<8x80xbf16>
      %c2_120 = arith.constant 2 : index
      %c0_121 = arith.constant 0 : index
      %c1_122 = arith.constant 1 : index
      %c0_123 = arith.constant 0 : index
      %c0_124 = arith.constant 0 : index
      %89 = vector.load %arg5[%c2_120, %c0_121, %c1_122, %c0_123, %c0_124] : memref<3x3x3x8x8xbf16, #tpu.memory_space<vmem>>, vector<1x1x1x8x8xbf16>
      %90 = vector.shape_cast %89 : vector<1x1x1x8x8xbf16> to vector<8x8xbf16>
      %cst_125 = arith.constant dense<0.000000e+00> : vector<8x80xf32>
      %91 = tpu.matmul %90, %88, %cst_125 {dimension_numbers = #tpu.dot_dimension_numbers<[1], [0], [0], [1], [0, 0, 1, 1], [], []>} : vector<8x8xbf16>, vector<8x80xbf16>, vector<8x80xf32> -> vector<8x80xf32>
      %92 = arith.addf %86, %91 : vector<8x80xf32>
      %c0_126 = arith.constant 0 : index
      %c0_127 = arith.constant 0 : index
      %c0_128 = arith.constant 0 : index
      %c2_129 = arith.constant 2 : index
      %93 = vector.load %arg4[%c0_126, %c0_127, %c0_128, %c2_129] : memref<1x1x8x128xbf16, #tpu.memory_space<vmem>>, vector<1x1x8x80xbf16>
      %94 = vector.shape_cast %93 : vector<1x1x8x80xbf16> to vector<8x80xbf16>
      %c2_130 = arith.constant 2 : index
      %c0_131 = arith.constant 0 : index
      %c2_132 = arith.constant 2 : index
      %c0_133 = arith.constant 0 : index
      %c0_134 = arith.constant 0 : index
      %95 = vector.load %arg5[%c2_130, %c0_131, %c2_132, %c0_133, %c0_134] : memref<3x3x3x8x8xbf16, #tpu.memory_space<vmem>>, vector<1x1x1x8x8xbf16>
      %96 = vector.shape_cast %95 : vector<1x1x1x8x8xbf16> to vector<8x8xbf16>
      %cst_135 = arith.constant dense<0.000000e+00> : vector<8x80xf32>
      %97 = tpu.matmul %96, %94, %cst_135 {dimension_numbers = #tpu.dot_dimension_numbers<[1], [0], [0], [1], [0, 0, 1, 1], [], []>} : vector<8x8xbf16>, vector<8x80xbf16>, vector<8x80xf32> -> vector<8x80xf32>
      %98 = arith.addf %92, %97 : vector<8x80xf32>
      %c0_136 = arith.constant 0 : index
      %c0_137 = arith.constant 0 : index
      %c0_138 = arith.constant 0 : index
      %c10_139 = arith.constant 10 : index
      %99 = vector.load %arg4[%c0_136, %c0_137, %c0_138, %c10_139] : memref<1x1x8x128xbf16, #tpu.memory_space<vmem>>, vector<1x1x8x80xbf16>
      %100 = vector.shape_cast %99 : vector<1x1x8x80xbf16> to vector<8x80xbf16>
      %c2_140 = arith.constant 2 : index
      %c1_141 = arith.constant 1 : index
      %c0_142 = arith.constant 0 : index
      %c0_143 = arith.constant 0 : index
      %c0_144 = arith.constant 0 : index
      %101 = vector.load %arg5[%c2_140, %c1_141, %c0_142, %c0_143, %c0_144] : memref<3x3x3x8x8xbf16, #tpu.memory_space<vmem>>, vector<1x1x1x8x8xbf16>
      %102 = vector.shape_cast %101 : vector<1x1x1x8x8xbf16> to vector<8x8xbf16>
      %cst_145 = arith.constant dense<0.000000e+00> : vector<8x80xf32>
      %103 = tpu.matmul %102, %100, %cst_145 {dimension_numbers = #tpu.dot_dimension_numbers<[1], [0], [0], [1], [0, 0, 1, 1], [], []>} : vector<8x8xbf16>, vector<8x80xbf16>, vector<8x80xf32> -> vector<8x80xf32>
      %104 = arith.addf %98, %103 : vector<8x80xf32>
      %c0_146 = arith.constant 0 : index
      %c0_147 = arith.constant 0 : index
      %c0_148 = arith.constant 0 : index
      %c11_149 = arith.constant 11 : index
      %105 = vector.load %arg4[%c0_146, %c0_147, %c0_148, %c11_149] : memref<1x1x8x128xbf16, #tpu.memory_space<vmem>>, vector<1x1x8x80xbf16>
      %106 = vector.shape_cast %105 : vector<1x1x8x80xbf16> to vector<8x80xbf16>
      %c2_150 = arith.constant 2 : index
      %c1_151 = arith.constant 1 : index
      %c1_152 = arith.constant 1 : index
      %c0_153 = arith.constant 0 : index
      %c0_154 = arith.constant 0 : index
      %107 = vector.load %arg5[%c2_150, %c1_151, %c1_152, %c0_153, %c0_154] : memref<3x3x3x8x8xbf16, #tpu.memory_space<vmem>>, vector<1x1x1x8x8xbf16>
      %108 = vector.shape_cast %107 : vector<1x1x1x8x8xbf16> to vector<8x8xbf16>
      %cst_155 = arith.constant dense<0.000000e+00> : vector<8x80xf32>
      %109 = tpu.matmul %108, %106, %cst_155 {dimension_numbers = #tpu.dot_dimension_numbers<[1], [0], [0], [1], [0, 0, 1, 1], [], []>} : vector<8x8xbf16>, vector<8x80xbf16>, vector<8x80xf32> -> vector<8x80xf32>
      %110 = arith.addf %104, %109 : vector<8x80xf32>
      %c0_156 = arith.constant 0 : index
      %c0_157 = arith.constant 0 : index
      %c0_158 = arith.constant 0 : index
      %c12_159 = arith.constant 12 : index
      %111 = vector.load %arg4[%c0_156, %c0_157, %c0_158, %c12_159] : memref<1x1x8x128xbf16, #tpu.memory_space<vmem>>, vector<1x1x8x80xbf16>
      %112 = vector.shape_cast %111 : vector<1x1x8x80xbf16> to vector<8x80xbf16>
      %c2_160 = arith.constant 2 : index
      %c1_161 = arith.constant 1 : index
      %c2_162 = arith.constant 2 : index
      %c0_163 = arith.constant 0 : index
      %c0_164 = arith.constant 0 : index
      %113 = vector.load %arg5[%c2_160, %c1_161, %c2_162, %c0_163, %c0_164] : memref<3x3x3x8x8xbf16, #tpu.memory_space<vmem>>, vector<1x1x1x8x8xbf16>
      %114 = vector.shape_cast %113 : vector<1x1x1x8x8xbf16> to vector<8x8xbf16>
      %cst_165 = arith.constant dense<0.000000e+00> : vector<8x80xf32>
      %115 = tpu.matmul %114, %112, %cst_165 {dimension_numbers = #tpu.dot_dimension_numbers<[1], [0], [0], [1], [0, 0, 1, 1], [], []>} : vector<8x8xbf16>, vector<8x80xbf16>, vector<8x80xf32> -> vector<8x80xf32>
      %116 = arith.addf %110, %115 : vector<8x80xf32>
      %c0_166 = arith.constant 0 : index
      %c0_167 = arith.constant 0 : index
      %c0_168 = arith.constant 0 : index
      %c20_169 = arith.constant 20 : index
      %117 = vector.load %arg4[%c0_166, %c0_167, %c0_168, %c20_169] : memref<1x1x8x128xbf16, #tpu.memory_space<vmem>>, vector<1x1x8x80xbf16>
      %118 = vector.shape_cast %117 : vector<1x1x8x80xbf16> to vector<8x80xbf16>
      %c2_170 = arith.constant 2 : index
      %c2_171 = arith.constant 2 : index
      %c0_172 = arith.constant 0 : index
      %c0_173 = arith.constant 0 : index
      %c0_174 = arith.constant 0 : index
      %119 = vector.load %arg5[%c2_170, %c2_171, %c0_172, %c0_173, %c0_174] : memref<3x3x3x8x8xbf16, #tpu.memory_space<vmem>>, vector<1x1x1x8x8xbf16>
      %120 = vector.shape_cast %119 : vector<1x1x1x8x8xbf16> to vector<8x8xbf16>
      %cst_175 = arith.constant dense<0.000000e+00> : vector<8x80xf32>
      %121 = tpu.matmul %120, %118, %cst_175 {dimension_numbers = #tpu.dot_dimension_numbers<[1], [0], [0], [1], [0, 0, 1, 1], [], []>} : vector<8x8xbf16>, vector<8x80xbf16>, vector<8x80xf32> -> vector<8x80xf32>
      %122 = arith.addf %116, %121 : vector<8x80xf32>
      %c0_176 = arith.constant 0 : index
      %c0_177 = arith.constant 0 : index
      %c0_178 = arith.constant 0 : index
      %c21_179 = arith.constant 21 : index
      %123 = vector.load %arg4[%c0_176, %c0_177, %c0_178, %c21_179] : memref<1x1x8x128xbf16, #tpu.memory_space<vmem>>, vector<1x1x8x80xbf16>
      %124 = vector.shape_cast %123 : vector<1x1x8x80xbf16> to vector<8x80xbf16>
      %c2_180 = arith.constant 2 : index
      %c2_181 = arith.constant 2 : index
      %c1_182 = arith.constant 1 : index
      %c0_183 = arith.constant 0 : index
      %c0_184 = arith.constant 0 : index
      %125 = vector.load %arg5[%c2_180, %c2_181, %c1_182, %c0_183, %c0_184] : memref<3x3x3x8x8xbf16, #tpu.memory_space<vmem>>, vector<1x1x1x8x8xbf16>
      %126 = vector.shape_cast %125 : vector<1x1x1x8x8xbf16> to vector<8x8xbf16>
      %cst_185 = arith.constant dense<0.000000e+00> : vector<8x80xf32>
      %127 = tpu.matmul %126, %124, %cst_185 {dimension_numbers = #tpu.dot_dimension_numbers<[1], [0], [0], [1], [0, 0, 1, 1], [], []>} : vector<8x8xbf16>, vector<8x80xbf16>, vector<8x80xf32> -> vector<8x80xf32>
      %128 = arith.addf %122, %127 : vector<8x80xf32>
      %c0_186 = arith.constant 0 : index
      %c0_187 = arith.constant 0 : index
      %c0_188 = arith.constant 0 : index
      %c22_189 = arith.constant 22 : index
      %129 = vector.load %arg4[%c0_186, %c0_187, %c0_188, %c22_189] : memref<1x1x8x128xbf16, #tpu.memory_space<vmem>>, vector<1x1x8x80xbf16>
      %130 = vector.shape_cast %129 : vector<1x1x8x80xbf16> to vector<8x80xbf16>
      %c2_190 = arith.constant 2 : index
      %c2_191 = arith.constant 2 : index
      %c2_192 = arith.constant 2 : index
      %c0_193 = arith.constant 0 : index
      %c0_194 = arith.constant 0 : index
      %131 = vector.load %arg5[%c2_190, %c2_191, %c2_192, %c0_193, %c0_194] : memref<3x3x3x8x8xbf16, #tpu.memory_space<vmem>>, vector<1x1x1x8x8xbf16>
      %132 = vector.shape_cast %131 : vector<1x1x1x8x8xbf16> to vector<8x8xbf16>
      %cst_195 = arith.constant dense<0.000000e+00> : vector<8x80xf32>
      %133 = tpu.matmul %132, %130, %cst_195 {dimension_numbers = #tpu.dot_dimension_numbers<[1], [0], [0], [1], [0, 0, 1, 1], [], []>} : vector<8x8xbf16>, vector<8x80xbf16>, vector<8x80xf32> -> vector<8x80xf32>
      %134 = arith.addf %128, %133 : vector<8x80xf32>
      %135 = arith.addf %81, %134 : vector<8x80xf32>
      %c0_196 = arith.constant 0 : index
      %c0_197 = arith.constant 0 : index
      %136 = vector.load %arg9[%c0_196, %c0_197] : memref<8x80xf32, #tpu.memory_space<vmem>>, vector<8x80xf32>
      tpu.vector_store %arg9[%c0_196, %c0_197], %135 {strides = array<i32>} : memref<8x80xf32, #tpu.memory_space<vmem>>, vector<8x80xf32>,
    } else {
    }
    %c0_84 = arith.constant 0 : index
    %c0_85 = arith.constant 0 : index
    %60 = vector.load %arg9[%c0_84, %c0_85] : memref<8x80xf32, #tpu.memory_space<vmem>>, vector<8x80xf32>
    %c0_86 = arith.constant 0 : index
    %c0_87 = arith.constant 0 : index
    %61 = vector.load %arg6[%c0_86, %c0_87] : memref<8x1xf32, #tpu.memory_space<vmem>>, vector<8x1xf32>
    %62 = vector.broadcast %61 : vector<8x1xf32> to vector<8x80xf32>
    %63 = arith.addf %60, %62 : vector<8x80xf32>
    %cst_88 = arith.constant 0.000000e+00 : f32
    %64 = vector.broadcast %cst_88 : f32 to vector<8x80xf32>
    %65 = arith.maximumf %63, %64 : vector<8x80xf32>
    %c0_89 = arith.constant 0 : index
    %c0_90 = arith.constant 0 : index
    %66 = vector.load %arg7[%c0_89, %c0_90] : memref<1x80xf32, #tpu.memory_space<vmem>>, vector<1x80xf32>
    %67 = vector.broadcast %66 : vector<1x80xf32> to vector<8x80xf32>
    %68 = arith.mulf %65, %67 : vector<8x80xf32>
    %cst_91 = arith.constant 0.000000e+00 : bf16
    %69 = vector.broadcast %cst_91 : bf16 to vector<8x11xbf16>
    %c0_92 = arith.constant 0 : index
    %c0_93 = arith.constant 0 : index
    %c0_94 = arith.constant 0 : index
    %c0_95 = arith.constant 0 : index
    %70 = vector.load %arg8[%c0_92, %c0_93, %c0_94, %c0_95] : memref<1x1x8x128xbf16, #tpu.memory_space<vmem>>, vector<1x1x8x11xbf16>
    %71 = vector.shape_cast %70 : vector<1x1x8x11xbf16> to vector<8x11xbf16>
    %72 = vector.shape_cast %69 : vector<8x11xbf16> to vector<1x1x8x11xbf16>
    tpu.vector_store %arg8[%c0_92, %c0_93, %c0_94, %c0_95], %72 {strides = array<i32>} : memref<1x1x8x128xbf16, #tpu.memory_space<vmem>>, vector<1x1x8x11xbf16>,
    %73 = arith.truncf %68 : vector<8x80xf32> to vector<8x80xbf16>
    %c0_96 = arith.constant 0 : index
    %c0_97 = arith.constant 0 : index
    %c0_98 = arith.constant 0 : index
    %c11_99 = arith.constant 11 : index
    %74 = vector.load %arg8[%c0_96, %c0_97, %c0_98, %c11_99] : memref<1x1x8x128xbf16, #tpu.memory_space<vmem>>, vector<1x1x8x80xbf16>
    %75 = vector.shape_cast %74 : vector<1x1x8x80xbf16> to vector<8x80xbf16>
    %76 = vector.shape_cast %73 : vector<8x80xbf16> to vector<1x1x8x80xbf16>
    tpu.vector_store %arg8[%c0_96, %c0_97, %c0_98, %c11_99], %76 {strides = array<i32>} : memref<1x1x8x128xbf16, #tpu.memory_space<vmem>>, vector<1x1x8x80xbf16>,
    %cst_100 = arith.constant 0.000000e+00 : bf16
    %77 = vector.broadcast %cst_100 : bf16 to vector<8x37xbf16>
    %c0_101 = arith.constant 0 : index
    %c0_102 = arith.constant 0 : index
    %c0_103 = arith.constant 0 : index
    %c91 = arith.constant 91 : index
    %78 = vector.load %arg8[%c0_101, %c0_102, %c0_103, %c91] : memref<1x1x8x128xbf16, #tpu.memory_space<vmem>>, vector<1x1x8x37xbf16>
    %79 = vector.shape_cast %78 : vector<1x1x8x37xbf16> to vector<8x37xbf16>
    %80 = vector.shape_cast %77 : vector<8x37xbf16> to vector<1x1x8x37xbf16>
    tpu.vector_store %arg8[%c0_101, %c0_102, %c0_103, %c91], %80 {strides = array<i32>} : memref<1x1x8x128xbf16, #tpu.memory_space<vmem>>, vector<1x1x8x37xbf16>,
    return
  }
  func.func @transform_0(%arg0: i32, %arg1: i32) -> (i32, i32, i32, i32) {
    %c1_i32 = arith.constant 1 : i32
    %0 = arith.subi %arg1, %c1_i32 : i32
    %c0_i32 = arith.constant 0 : i32
    %1 = arith.maxsi %0, %c0_i32 : i32
    %c0_i32_0 = arith.constant 0 : i32
    %c0_i32_1 = arith.constant 0 : i32
    %c0_i32_2 = arith.constant 0 : i32
    return %arg0, %1, %c0_i32_0, %c0_i32_1 : i32, i32, i32, i32
  }
  func.func @transform_1(%arg0: i32, %arg1: i32) -> (i32, i32, i32, i32) {
    %c0_i32 = arith.constant 0 : i32
    %c0_i32_0 = arith.constant 0 : i32
    %c0_i32_1 = arith.constant 0 : i32
    return %arg0, %arg1, %c0_i32, %c0_i32_0 : i32, i32, i32, i32
  }
  func.func @transform_2(%arg0: i32, %arg1: i32) -> (i32, i32, i32, i32) {
    %c1_i32 = arith.constant 1 : i32
    %0 = arith.addi %arg1, %c1_i32 : i32
    %c3_i32 = arith.constant 3 : i32
    %1 = arith.minsi %0, %c3_i32 : i32
    %c0_i32 = arith.constant 0 : i32
    %c0_i32_0 = arith.constant 0 : i32
    %c0_i32_1 = arith.constant 0 : i32
    return %arg0, %1, %c0_i32, %c0_i32_0 : i32, i32, i32, i32
  }
  func.func @transform_3(%arg0: i32, %arg1: i32) -> (i32, i32, i32, i32, i32) {
    %c0_i32 = arith.constant 0 : i32
    %c0_i32_0 = arith.constant 0 : i32
    %c0_i32_1 = arith.constant 0 : i32
    %c0_i32_2 = arith.constant 0 : i32
    %c0_i32_3 = arith.constant 0 : i32
    %c0_i32_4 = arith.constant 0 : i32
    return %c0_i32, %c0_i32_0, %c0_i32_1, %c0_i32_2, %c0_i32_3 : i32, i32, i32, i32, i32
  }
  func.func @transform_4(%arg0: i32, %arg1: i32) -> (i32, i32) {
    %c0_i32 = arith.constant 0 : i32
    %c0_i32_0 = arith.constant 0 : i32
    %c0_i32_1 = arith.constant 0 : i32
    return %c0_i32, %c0_i32_0 : i32, i32
  }
  func.func @transform_5(%arg0: i32, %arg1: i32) -> (i32, i32) {
    %c0_i32 = arith.constant 0 : i32
    %c0_i32_0 = arith.constant 0 : i32
    %c0_i32_1 = arith.constant 0 : i32
    return %c0_i32, %c0_i32_0 : i32, i32
  }
  func.func @transform_6(%arg0: i32, %arg1: i32) -> (i32, i32, i32, i32) {
    %c0_i32 = arith.constant 0 : i32
    %c0_i32_0 = arith.constant 0 : i32
    %c0_i32_1 = arith.constant 0 : i32
    return %arg0, %arg1, %c0_i32, %c0_i32_0 : i32, i32, i32, i32
  }
}

</mosaic_0001>

<bundles_post_ra>
// kernel: down_forward.3
= control target key start
LH: loop header
LB: loop body
LE: loop exit
PB: predicated region body
PF: predicated region fallthrough
CT: control target
= control target key end

     0   :  { %s2451_s21 = smov 0   ;;  %s2453_s22 = smov 0   ;;  %s2765_s0 = inlined_call_operand.vmem [shape: bf16[2,4,8,128], index: 0, kind: input, shape index: {}, may-alias: {0,1,2}]   ;;  %s2766_s1 = inlined_call_operand.vmem [shape: bf16[2,4,8,128], index: 1, kind: input, shape index: {}, may-alias: {0,1,2}]   ;;  %s2767_s2 = inlined_call_operand.vmem [shape: bf16[2,4,8,128], index: 2, kind: input, shape index: {}, may-alias: {0,1,2}]   ;;  %s2768_s3 = inlined_call_operand.vmem [shape: bf16[3,3,3,8,8], index: 3, kind: input, shape index: {}]   ;;  %s2769_s4 = inlined_call_operand.vmem [shape: f32[8,1], index: 4, kind: input, shape index: {}]   ;;  %s2770_s5 = inlined_call_operand.vmem [shape: f32[1,80], index: 5, kind: input, shape index: {}]   ;;  %s2771_s6 = inlined_call_operand.vmem [shape: bf16[2,4,8,128], index: 6, kind: output, shape index: {}]  }
   0x1   :  { %s2455_s23 = smov 0   ;;  %s2457_s24 = smov 0  }
   0x2   :  { %s2459_s25 = smov 0  }
   0x3 LB: > { %s25_s26 = sadd.s32 1, %s2374_s23  ;;  %s28_s27 = sadd.s32 1, %s2378_s24  ;;  %s2382_s25 = sphi %s2459_s25, %s16_s25   ;;  %s2378_s24 = sphi %s2457_s24, %s2776_s24   ;;  %s2374_s23 = sphi %s2455_s23, %s2775_s23   ;;  %s2370_s22 = sphi %s2453_s22, %s2774_s22   ;;  %s2366_s21 = sphi %s2451_s21, %s2773_s21  }
   0x4   : > { %p26_p0 = scmp.ge.s32.totalorder %s25_s26, 4  ;;  %p1940_p1 = scmp.ge.s32.totalorder %s2382_s25, 1 }
   0x5   : > { %p285_p2 = scmp.lt.s32.totalorder %s2382_s25, 9 }
   0x6   : > { %s2778_s26 = smov (%p26_p0, %s25_s26), 0  ;;  %s2780_s27 = smov (!%p26_p0, %s28_s27), %s2378_s24 }
   0x7   : > { %p286_p3 = pnand %p1940_p1, %p285_p2  ;;  %p30_p4 = scmp.ge.s32.totalorder %s2780_s27, 2 }
   0x8   : > { %p346_p5 = scmp.lt.s32.totalorder (!%p286_p3), %s2370_s22, 1  ;;  %p359_p6 = scmp.lt.s32.totalorder (!%p286_p3), %s2366_s21, 3  ;;  %v2384_v0 = vmov (!%p286_p3), 0.0   ;;  %vm2385_vm0 = vmmov (!%p286_p3), 0   ;;  %vm402_vm1 = vcmask (!%p286_p3), 1043456   ;;  %vm398_vm2 = vcmask (!%p286_p3), 64512  }
   0x9   : > { %s2782_s27 = smov (%p30_p4, %s2780_s27), 0  ;;  %289 = sbr.rel (%p286_p3) target bundleno = 1282 (0x502), region = 44 }
   0xa   : > { %s365_s28 = sadd.s32 (!%p286_p3), 1, %s2366_s21  ;;  %2101 = vmatprep.subr.bf16.mxu0 (!%p286_p3), %v2384_v0  ;;  %2103 = vmatprep.mubr.msk.bf16.mxu0 (!%p286_p3), %vm2385_vm0, %v2384_v0  ;;  %s1941_s9 = sadd.s32 (!%p286_p3), 4294967295, %s2366_s21  ;;  %v1967_v6 = vld [vmem:[%s2768_s3 + $0x34] sm:$0xf] (!%p286_p3)  ;;  %v1959_v10 = vld [vmem:[%s2768_s3 + $0x28] sm:$0xf] (!%p286_p3) }
   0xb   : > { %2077 = vmatprep.subr.bf16.mxu1 (!%p286_p3), %v2384_v0  ;;  %2079 = vmatprep.mubr.msk.bf16.mxu1 (!%p286_p3), %vm2385_vm0, %v2384_v0  ;;  %p2492_p7 = scmp.lt.s32.totalorder (!%p286_p3), %s365_s28, 3  ;;  %p344_p8 = scmp.gt.s32.totalorder (!%p286_p3), %s1941_s9, 0  ;;  %v1969_v13 = vld [vmem:[%s2768_s3 + $0x38] sm:$0xf] (!%p286_p3)  ;;  %v1958_v16 = vld [vmem:[%s2768_s3 + $0x24] sm:$0xf] (!%p286_p3) }
   0xc   : > { %s2386_s18 = smov (!%p286_p3), 117   ;;  %p1942_p9 = scmp.lt.s32.totalorder (!%p286_p3), %s1941_s9, 3  ;;  %v1971_v19 = vld [vmem:[%s2768_s3 + $0x3c] sm:$0xf] (!%p286_p3)  ;;  %v1963_v22 = vld [vmem:[%s2768_s3 + $0x2c] sm:$0xf] (!%p286_p3) }
   0xd   : > { %s2387_s20 = smov (!%p286_p3), 116   ;;  %s2389_s12 = smov (!%p286_p3), 108   ;;  %v1973_v25 = vld [vmem:[%s2768_s3 + $0x40] sm:$0xf] (!%p286_p3)  ;;  %v1965_v27 = vld [vmem:[%s2768_s3 + $0x30] sm:$0xf] (!%p286_p3) }
   0xe   : > { %s2390_s15 = smov (!%p286_p3), 126   ;;  %v1975_v28 = vld [vmem:[%s2768_s3 + $0x44] sm:$0xf] (!%p286_p3)  ;;  %vm849_vm3 = vcmask (!%p286_p3), 654336   ;;  %p1977_p10 = scmp.le.s32.totalorder (!%p286_p3), %s2366_s21, 0 }
  0x10   : > { %s2784_s22 = smov (!%p346_p5, %s2370_s22), 1  ;;  %s2786_s28 = smov (!%p2492_p7, %s365_s28), 3 }
  0x11   : > { %s360_s29 = scalar_select %p359_p6, %s2366_s21, 3 }
  0x12   : > { %s1947_s30 = sshll.u32 %s2784_s22, 2  ;;  %s2788_s28 = smov (!%p2492_p7, %s2786_s28), 3  ;;  %v2394_v40 = vmov (!%p1977_p10), 0.0   ;;  %vm2395_vm4 = vmmov (!%p1977_p10), 0   ;;  %v857_v42 = vld [vmem:[%s2768_s3] sm:$0xf] (!%p1977_p10) }
  0x13   : > { %s362_s8 = sadd.s32 %s1947_s30, %s360_s29  ;;  %s373_s19 = sadd.s32 %s1947_s30, %s2788_s28  ;;  %v1978_v47 = vld [vmem:[%s2768_s3 + $0x4] sm:$0xf] (!%p1977_p10)  ;;  %v1984_v48 = vld [vmem:[%s2768_s3 + $0xc] sm:$0xf] (!%p1977_p10)  ;;  %v1982_v54 = vld [vmem:[%s2768_s3 + $0x8] sm:$0xf] (!%p1977_p10) }
  0x14   : > { %s1950_s10 = sshll.u32 %s362_s8, 2  ;;  %s1955_s22 = sshll.u32 %s373_s19, 2  ;;  %v1988_v55 = vld [vmem:[%s2768_s3 + $0x14] sm:$0xf] (!%p1977_p10)  ;;  %v1986_v60 = vld [vmem:[%s2768_s3 + $0x10] sm:$0xf] (!%p1977_p10) }
  0x15   : > { %s364_s13 = scalar_lea.vmem %s2766_s1, %s1950_s10  ;;  %s2503_s16 = scalar_lea.vmem %s2771_s6, %s1950_s10  ;;  %v1992_v61 = vld [vmem:[%s2768_s3 + $0x1c] sm:$0xf] (!%p1977_p10) }
  0x16   : > { %v388_v1 = vld [vmem:[%s364_s13] sm:$0xf]  ;;  %s345_s17 = scalar_select %p344_p8, %s1941_s9, 0 }
  0x17   : > { %v1960_v2 = vcombine.low %v388_v1, %v388_v1  ;;  %s2512_s11 = scalar_lea.vmem %s2767_s2, %s1955_s22  ;;  %s2388_s10 = smov 127   ;;  %v450_v11 = vsel %vm402_vm1, %v388_v1, 0 }
  0x18   : > { %s2790_s17 = smov (!%p1942_p9, %s345_s17), 3  ;;  %s2392_s19 = smov 118  }
  0x19   : > { %596 = vrot.lane.b32.xlu0 %v1960_v2, %s2386_s18  ;;  %647 = vrot.lane.b32.xlu1 %v1960_v2, %s2387_s20  ;;  %s351_s13 = sadd.s32 %s2790_s17, %s1947_s30  ;;  %s2391_s18 = smov 107  }
  0x1a   : > { %s2514_s7 = sshll.u32 %s351_s13, 2  ;;  %s2393_s20 = smov 106  }
  0x1b   : > { %s353_s28 = scalar_lea.vmem %s2765_s0, %s2514_s7  ;;  %s2396_s14 = smov (!%p1977_p10), 127  }
  0x1c   : > { %v856_v38 = vld [vmem:[%s353_s28] sm:$0xf] (!%p1977_p10)  ;;  %s2397_s7 = smov (!%p1977_p10), 118   ;;  %s2398_s28 = smov (!%p1977_p10), 126  }
  0x1d   : > { %396 = vrot.lane.b32.xlu0 %v1960_v2, %s2388_s10  ;;  %698 = vrot.lane.b32.xlu1 %v1960_v2, %s2389_s12  ;;  %v1979_v39 = vcombine.low (!%p1977_p10), %v856_v38, %v856_v38  ;;  %v915_v41 = vsel (!%p1977_p10), %vm402_vm1, %v856_v38, 0  ;;  %s2399_s9 = smov (!%p1977_p10), 117  }
  0x21   : > { %494 = vrot.lane.b32.xlu0 %v1960_v2, %s2390_s15  ;;  %749 = vrot.lane.b32.xlu1 %v1960_v2, %s2391_s18  ;;  %s2400_s15 = smov (!%p1977_p10), 116   ;;  %s2401_s18 = smov (!%p1977_p10), 108  }
  0x25   : > { %545 = vrot.lane.b32.xlu0 %v1960_v2, %s2392_s19  ;;  %800 = vrot.lane.b32.xlu1 %v1960_v2, %s2393_s20  ;;  %s2402_s19 = smov (!%p1977_p10), 107   ;;  %s2403_s20 = smov (!%p1977_p10), 106   ;;  %v1994_v2 = vld [vmem:[%s2768_s3 + $0x20] sm:$0xf] (!%p1977_p10) }
  0x29   : > { %863 = vrot.lane.b32.xlu0 (!%p1977_p10), %v1979_v39, %s2396_s14  ;;  %1010 = vrot.lane.b32.xlu1 (!%p1977_p10), %v1979_v39, %s2397_s7 }
  0x2d   : > { %959 = vrot.lane.b32.xlu0 (!%p1977_p10), %v1979_v39, %s2398_s28  ;;  %1061 = vrot.lane.b32.xlu1 (!%p1977_p10), %v1979_v39, %s2399_s9 }
  0x31   : > { %1112 = vrot.lane.b32.xlu0 (!%p1977_p10), %v1979_v39, %s2400_s15  ;;  %1163 = vrot.lane.b32.xlu1 (!%p1977_p10), %v1979_v39, %s2401_s18 }
  0x35   : > { %1214 = vrot.lane.b32.xlu0 (!%p1977_p10), %v1979_v39, %s2402_s19  ;;  %1265 = vrot.lane.b32.xlu1 (!%p1977_p10), %v1979_v39, %s2403_s20 }
  0x8b   : > { %v597_v3 = vpop.permute.xlu0 %596  ;;  %v648_v5 = vpop.permute.xlu1 %647 }
  0x8c   : > { %v602_v4 = vsel %vm402_vm1, %v597_v3, 0  ;;  %v653_v7 = vsel %vm402_vm1, %v648_v5, 0 }
  0x8d   : > { %2102 = vmatpush3.bf16.msra.mxu0 %v602_v4 }
  0x8e   : > { %2107 = vmatprep.subr.bf16.mxu0 %v2384_v0 }
  0x8f   : > { %v397_v8 = vpop.permute.xlu0 %396  ;;  %v699_v12 = vpop.permute.xlu1 %698 }
  0x90   : > { %2104 = vmatmul.mubr.msk.bf16.vlgmr.msra.gmra.mrb[0].mxu0 %vm398_vm2, %v1967_v6  ;;  %v404_v9 = vsel %vm402_vm1, %v397_v8, 0  ;;  %v704_v14 = vsel %vm402_vm1, %v699_v12, 0 }
  0x91   : > { %2078 = vmatpush3.bf16.msra.mxu1 %v404_v9  ;;  %2108 = vmatpush3.bf16.msra.mxu0 %v653_v7 }
  0x92   : > { %2109 = vmatprep.mubr.msk.bf16.mxu0 %vm2385_vm0, %v2384_v0  ;;  %2083 = vmatprep.subr.bf16.mxu1 %v2384_v0 }
  0x93   : > { %2113 = vmatprep.subr.bf16.mxu0 %v2384_v0  ;;  %v495_v15 = vpop.permute.xlu0 %494  ;;  %v750_v18 = vpop.permute.xlu1 %749 }
  0x94   : > { %2080 = vmatmul.mubr.msk.bf16.vlgmr.msra.gmra.mrb[0].mxu1 %vm398_vm2, %v1959_v10  ;;  %v500_v17 = vsel %vm402_vm1, %v495_v15, 0  ;;  %v755_v20 = vsel %vm402_vm1, %v750_v18, 0 }
  0x95   : > { %2084 = vmatpush3.bf16.msra.mxu1 %v450_v11  ;;  %2085 = vmatprep.mubr.msk.bf16.mxu1 %vm2385_vm0, %v2384_v0 }
  0x96   : > { %2089 = vmatprep.subr.bf16.mxu1 %v2384_v0 }
  0x97   : > { %v546_v21 = vpop.permute.xlu0 %545  ;;  %v801_v24 = vpop.permute.xlu1 %800 }
  0x98   : > { %v551_v23 = vsel %vm402_vm1, %v546_v21, 0  ;;  %v806_v26 = vsel %vm402_vm1, %v801_v24, 0 }
  0x9b   : > { %v864_v43 = vpop.permute.xlu0 (!%p1977_p10), %863  ;;  %v1011_v44 = vpop.permute.xlu1 (!%p1977_p10), %1010 }
  0x9c   : > { %2110 = vmatmul.mubr.msk.bf16.vlgmr.msra.gmra.mrb[0].mxu0 %vm398_vm2, %v1969_v13  ;;  %v869_v45 = vsel (!%p1977_p10), %vm402_vm1, %v864_v43, 0  ;;  %v1016_v46 = vsel (!%p1977_p10), %vm402_vm1, %v1011_v44, 0 }
  0x9d   : > { %2114 = vmatpush3.bf16.msra.mxu0 %v704_v14  ;;  %2115 = vmatprep.mubr.msk.bf16.mxu0 %vm2385_vm0, %v2384_v0 }
  0x9e   : > { %2119 = vmatprep.subr.bf16.mxu0 %v2384_v0 }
  0x9f   : > { %v960_v49 = vpop.permute.xlu0 (!%p1977_p10), %959  ;;  %v1062_v51 = vpop.permute.xlu1 (!%p1977_p10), %1061 }
  0xa0   : > { %2086 = vmatmul.mubr.msk.bf16.vlgmr.msra.gmra.mrb[0].mxu1 %vm398_vm2, %v1958_v16  ;;  %v965_v50 = vsel (!%p1977_p10), %vm402_vm1, %v960_v49, 0  ;;  %v1067_v56 = vsel (!%p1977_p10), %vm402_vm1, %v1062_v51, 0 }
  0xa1   : > { %2090 = vmatpush3.bf16.msra.mxu1 %v500_v17  ;;  %2091 = vmatprep.mubr.msk.bf16.mxu1 %vm2385_vm0, %v2384_v0 }
  0xa2   : > { %2095 = vmatprep.subr.bf16.mxu1 %v2384_v0 }
  0xa3   : > { %v1113_v52 = vpop.permute.xlu0 (!%p1977_p10), %1112  ;;  %v1164_v59 = vpop.permute.xlu1 (!%p1977_p10), %1163 }
  0xa4   : > { %v1118_v53 = vsel (!%p1977_p10), %vm402_vm1, %v1113_v52, 0  ;;  %v1169_v62 = vsel (!%p1977_p10), %vm402_vm1, %v1164_v59, 0 }
  0xa7   : > { %v1215_v57 = vpop.permute.xlu0 (!%p1977_p10), %1214  ;;  %v1266_v63 = vpop.permute.xlu1 (!%p1977_p10), %1265 }
  0xa8   : > { %2116 = vmatmul.mubr.msk.bf16.vlgmr.msra.gmra.mrb[0].mxu0 %vm398_vm2, %v1971_v19  ;;  %v1220_v58 = vsel (!%p1977_p10), %vm402_vm1, %v1215_v57, 0  ;;  %v1271_v1 = vsel (!%p1977_p10), %vm402_vm1, %v1266_v63, 0 }
  0xa9   : > { %2120 = vmatpush3.bf16.msra.mxu0 %v755_v20  ;;  %2121 = vmatprep.mubr.msk.bf16.mxu0 %vm2385_vm0, %v2384_v0 }
  0xaa   : > { %2125 = vmatprep.subr.bf16.mxu0 %v2384_v0 }
  0xac   : > { %2092 = vmatmul.mubr.msk.bf16.vlgmr.msra.gmra.mrb[0].mxu1 %vm398_vm2, %v1963_v22 }
  0xad   : > { %2096 = vmatpush3.bf16.msra.mxu1 %v551_v23  ;;  %2097 = vmatprep.mubr.msk.bf16.mxu1 %vm2385_vm0, %v2384_v0 }
  0xae   : > { %2137 = vmatprep.subr.bf16.mxu1 (!%p1977_p10), %v2394_v40 }
  0xb4   : > { %2122 = vmatmul.mubr.msk.bf16.vlgmr.msra.gmra.mrb[0].mxu0 %vm398_vm2, %v1973_v25 }
  0xb5   : > { %2126 = vmatpush3.bf16.msra.mxu0 %v806_v26  ;;  %2127 = vmatprep.mubr.msk.bf16.mxu0 %vm2385_vm0, %v2384_v0  ;;  %v1990_v0 = vld [vmem:[%s2768_s3 + $0x18] sm:$0xf] (!%p1977_p10) }
  0xb6   : > { %2131 = vmatprep.subr.bf16.mxu0 (!%p1977_p10), %v2394_v40 }
  0xb8   : > { %2098 = vmatmul.mubr.msk.bf16.vlgmr.msra.gmra.mrb[0].mxu1 %vm398_vm2, %v1965_v27 }
  0xb9   : > { %2138 = vmatpush3.bf16.msra.mxu1 (!%p1977_p10), %v915_v41  ;;  %2139 = vmatprep.mubr.msk.bf16.mxu1 (!%p1977_p10), %vm2395_vm4, %v2394_v40 }
  0xba   : > { %2149 = vmatprep.subr.bf16.mxu1 (!%p1977_p10), %v2394_v40 }
  0xc0   : > { %2128 = vmatmul.mubr.msk.bf16.vlgmr.msra.gmra.mrb[0].mxu0 %vm398_vm2, %v1975_v28 }
  0xc1   : > { %2133 = vmatprep.mubr.msk.bf16.mxu0 (!%p1977_p10), %vm2395_vm4, %v2394_v40  ;;  %2132 = vmatpush3.bf16.msra.mxu0 (!%p1977_p10), %v869_v45 }
  0xc2   : > { %2143 = vmatprep.subr.bf16.mxu0 (!%p1977_p10), %v2394_v40 }
 0x18b   : > { %v587_v29 = vpop.f32.mrb[0].mxu1 }
 0x18c   : > { %v2099_v30 = vpop.f32.mrb[1].mxu1 }
 0x18d   : > { %v590_v31 = vpop.f32.mrb[2].mxu1 }
 0x18e   : > { %v2100_v32 = vpop.f32.mrb[3].mxu1  ;;  %2140 = vmatmul.mubr.msk.bf16.vlgmr.msra.gmra.mrb[0].mxu1 (!%p1977_p10), %vm398_vm2, %v857_v42 }
 0x18f   : > { %2151 = vmatprep.mubr.msk.bf16.mxu1 (!%p1977_p10), %vm2395_vm4, %v2394_v40  ;;  %2150 = vmatpush3.bf16.msra.mxu1 (!%p1977_p10), %v1016_v46 }
 0x190   : > { %854 = sbr.rel (%p1977_p10) target bundleno = 655 (0x28f), region = 48  ;;  %2161 = vmatprep.subr.bf16.mxu1 (!%p1977_p10), %v2394_v40 }
 0x193   : > { %v842_v33 = vpop.f32.mrb[0].mxu0 }
 0x194   : > { %v2239_v34 = vadd.f32 %v842_v33, %v587_v29  ;;  %v2129_v35 = vpop.f32.mrb[1].mxu0 }
 0x195   : > { %v845_v36 = vpop.f32.mrb[2].mxu0 }
 0x196   : > { %850 = vst.msk [vmem:[#allocation2] sm:$0xff] %vm849_vm3, %v2239_v34  ;;  %v2130_v37 = vpop.f32.mrb[3].mxu0  ;;  %2134 = vmatmul.mubr.msk.bf16.vlgmr.msra.gmra.mrb[0].mxu0 (!%p1977_p10), %vm398_vm2, %v1978_v47  ;;  %2152 = vmatmul.mubr.msk.bf16.vlgmr.msra.gmra.mrb[4].mxu1 (!%p1977_p10), %vm398_vm2, %v1984_v48 }
 0x197   : > { %2144 = vmatpush3.bf16.msra.mxu0 %v965_v50  ;;  %2145 = vmatprep.mubr.msk.bf16.mxu0 %vm2395_vm4, %v2394_v40 }
 0x198   : > { %2155 = vmatprep.subr.bf16.mxu0 %v2394_v40  ;;  %2163 = vmatprep.mubr.msk.bf16.mxu1 %vm2395_vm4, %v2394_v40 }
 0x199   : > { %2162 = vmatpush3.bf16.msra.mxu1 %v1118_v53 }
 0x19a   : > { %2173 = vmatprep.subr.bf16.mxu1 %v2394_v40 }
 0x19d   : > { %v855_v42 = vld [vmem:[#allocation2] sm:$0xff] }
 0x19e   : > { %2146 = vmatmul.mubr.msk.bf16.vlgmr.msra.gmra.mrb[4].mxu0 %vm398_vm2, %v1982_v54  ;;  %2164 = vmatmul.mubr.msk.bf16.vlgmr.msra.gmra.mrb[8].mxu1 %vm398_vm2, %v1988_v55 }
 0x19f   : > { %2156 = vmatpush3.bf16.msra.mxu0 %v1067_v56  ;;  %2157 = vmatprep.mubr.msk.bf16.mxu0 %vm2395_vm4, %v2394_v40 }
 0x1a0   : > { %2167 = vmatprep.subr.bf16.mxu0 %v2394_v40  ;;  %2174 = vmatpush3.bf16.msra.mxu1 %v1220_v58 }
 0x1a1   : > { %2175 = vmatprep.mubr.msk.bf16.mxu1 %vm2395_vm4, %v2394_v40 }
 0x1a6   : > { %2158 = vmatmul.mubr.msk.bf16.vlgmr.msra.gmra.mrb[8].mxu0 %vm398_vm2, %v1986_v60  ;;  %2176 = vmatmul.mubr.msk.bf16.vlgmr.msra.gmra.mrb[12].mxu1 %vm398_vm2, %v1992_v61 }
 0x1a7   : > { %2168 = vmatpush3.bf16.msra.mxu0 %v1169_v62  ;;  %2169 = vmatprep.mubr.msk.bf16.mxu0 %vm2395_vm4, %v2394_v40 }
 0x1a8   : > { %2179 = vmatprep.subr.bf16.mxu0 %v2394_v40 }
 0x1ae   : > { %2170 = vmatmul.mubr.msk.bf16.vlgmr.msra.gmra.mrb[12].mxu0 %vm398_vm2, %v1990_v0 }
 0x1af   : > { %2180 = vmatpush3.bf16.msra.mxu0 %v1271_v1  ;;  %2181 = vmatprep.mubr.msk.bf16.mxu0 %vm2395_vm4, %v2394_v40 }
 0x1b6   : > { %2182 = vmatmul.mubr.msk.bf16.vlgmr.msra.gmra.mrb[16].mxu0 %vm398_vm2, %v1994_v2 }
 0x261   : > { %v951_v3 = vpop.f32.mrb[0].mxu1 }
 0x262   : > { %v2141_v4 = vpop.f32.mrb[1].mxu1 }
 0x263   : > { %v954_v5 = vpop.f32.mrb[2].mxu1 }
 0x264   : > { %v2142_v6 = vpop.f32.mrb[3].mxu1 }
 0x269   : > { %v905_v7 = vpop.f32.mrb[0].mxu0  ;;  %v1052_v8 = vpop.f32.mrb[4].mxu1 }
 0x26a   : > { %v2135_v9 = vpop.f32.mrb[1].mxu0  ;;  %v952_v10 = vadd.f32 %v951_v3, %v905_v7  ;;  %v2153_v11 = vpop.f32.mrb[5].mxu1 }
 0x26b   : > { %v908_v12 = vpop.f32.mrb[2].mxu0  ;;  %v1055_v13 = vpop.f32.mrb[6].mxu1 }
 0x26c   : > { %v2136_v14 = vpop.f32.mrb[3].mxu0  ;;  %v2154_v15 = vpop.f32.mrb[7].mxu1 }
 0x271   : > { %v1001_v16 = vpop.f32.mrb[4].mxu0  ;;  %v1154_v17 = vpop.f32.mrb[8].mxu1 }
 0x272   : > { %v1007_v18 = vadd.f32 %v1001_v16, %v952_v10  ;;  %v2147_v19 = vpop.f32.mrb[5].mxu0  ;;  %v2165_v20 = vpop.f32.mrb[9].mxu1 }
 0x273   : > { %v1004_v21 = vpop.f32.mrb[6].mxu0  ;;  %v1157_v22 = vpop.f32.mrb[10].mxu1 }
 0x274   : > { %v1058_v23 = vadd.f32 %v1052_v8, %v1007_v18  ;;  %v2148_v24 = vpop.f32.mrb[7].mxu0  ;;  %v2166_v25 = vpop.f32.mrb[11].mxu1 }
 0x279   : > { %v1103_v26 = vpop.f32.mrb[8].mxu0  ;;  %v1256_v27 = vpop.f32.mrb[12].mxu1 }
 0x27a   : > { %v1109_v28 = vadd.f32 %v1103_v26, %v1058_v23  ;;  %v2159_v29 = vpop.f32.mrb[9].mxu0  ;;  %v2177_v30 = vpop.f32.mrb[13].mxu1 }
 0x27b   : > { %v1106_v31 = vpop.f32.mrb[10].mxu0  ;;  %v1259_v32 = vpop.f32.mrb[14].mxu1 }
 0x27c   : > { %v1160_v33 = vadd.f32 %v1154_v17, %v1109_v28  ;;  %v2160_v34 = vpop.f32.mrb[11].mxu0  ;;  %v2178_v35 = vpop.f32.mrb[15].mxu1 }
 0x281   : > { %v1205_v36 = vpop.f32.mrb[12].mxu0 }
 0x282   : > { %v1211_v37 = vadd.f32 %v1205_v36, %v1160_v33  ;;  %v2171_v38 = vpop.f32.mrb[13].mxu0 }
 0x283   : > { %v1208_v39 = vpop.f32.mrb[14].mxu0 }
 0x284   : > { %v1262_v40 = vadd.f32 %v1256_v27, %v1211_v37  ;;  %v2172_v41 = vpop.f32.mrb[15].mxu0 }
 0x289   : > { %v1307_v43 = vpop.f32.mrb[16].mxu0 }
 0x28a   : > { %v1313_v44 = vadd.f32 %v1307_v43, %v1262_v40  ;;  %v2183_v45 = vpop.f32.mrb[17].mxu0 }
 0x28b   : > { %v1310_v46 = vpop.f32.mrb[18].mxu0 }
 0x28c   : > { %v1314_v47 = vadd.f32 %v1313_v44, %v855_v42  ;;  %v2184_v48 = vpop.f32.mrb[19].mxu0 }
 0x28e   : > { %1315 = vst.msk [vmem:[#allocation2] sm:$0xff] %vm849_vm3, %v1314_v47 }
 0x28f PF: > { %p1996_p11 = scmp.ge.s32.totalorder %s2366_s21, 3 }
 0x290   : > { %v1321_v49 = vld [vmem:[%s2512_s11] sm:$0xf] (!%p1996_p11)  ;;  %v2404_v51 = vmov (!%p1996_p11), 0.0   ;;  %vm2405_vm5 = vmmov (!%p1996_p11), 0   ;;  %v1997_v53 = vld [vmem:[%s2768_s3 + $0x48] sm:$0xf] (!%p1996_p11) }
 0x291   : > { %1319 = sbr.rel (%p1996_p11) target bundleno = 1027 (0x403), region = 52  ;;  %v1999_v50 = vcombine.low (!%p1996_p11), %v1321_v49, %v1321_v49  ;;  %2185 = vmatprep.subr.bf16.mxu0 (!%p1996_p11), %v2404_v51  ;;  %2191 = vmatprep.subr.bf16.mxu1 (!%p1996_p11), %v2404_v51  ;;  %v1381_v52 = vsel (!%p1996_p11), %vm402_vm1, %v1321_v49, 0  ;;  %s2406_s21 = smov (!%p1996_p11), 127   ;;  %v1998_v58 = vld [vmem:[%s2768_s3 + $0x4c] sm:$0xf] (!%p1996_p11) }
 0x292   : > { %2192 = vmatpush3.bf16.msra.mxu1 (!%p1996_p11), %v1381_v52  ;;  %2187 = vmatprep.mubr.msk.bf16.mxu0 (!%p1996_p11), %vm2405_vm5, %v2404_v51  ;;  %s2407_s11 = smov (!%p1996_p11), 118   ;;  %s2408_s22 = smov (!%p1996_p11), 126   ;;  %v2004_v59 = vld [vmem:[%s2768_s3 + $0x54] sm:$0xf] (!%p1996_p11)  ;;  %v2002_v1 = vld [vmem:[%s2768_s3 + $0x50] sm:$0xf] (!%p1996_p11) }
 0x293   : > { %1329 = vrot.lane.b32.xlu0 (!%p1996_p11), %v1999_v50, %s2406_s21  ;;  %1476 = vrot.lane.b32.xlu1 (!%p1996_p11), %v1999_v50, %s2407_s11  ;;  %s2409_s29 = smov (!%p1996_p11), 117   ;;  %s2410_s8 = smov (!%p1996_p11), 116   ;;  %v2008_v2 = vld [vmem:[%s2768_s3 + $0x5c] sm:$0xf] (!%p1996_p11)  ;;  %v2006_v7 = vld [vmem:[%s2768_s3 + $0x58] sm:$0xf] (!%p1996_p11) }
 0x294   : > { %2193 = vmatprep.mubr.msk.bf16.mxu1 (!%p1996_p11), %vm2405_vm5, %v2404_v51  ;;  %2203 = vmatprep.subr.bf16.mxu1 (!%p1996_p11), %v2404_v51  ;;  %s2411_s10 = smov (!%p1996_p11), 108   ;;  %s2412_s12 = smov (!%p1996_p11), 107   ;;  %v2012_v8 = vld [vmem:[%s2768_s3 + $0x64] sm:$0xf] (!%p1996_p11)  ;;  %v2010_v11 = vld [vmem:[%s2768_s3 + $0x60] sm:$0xf] (!%p1996_p11) }
 0x295   : > { %2194 = vmatmul.mubr.msk.bf16.vlgmr.msra.gmra.mrb[0].mxu1 (!%p1996_p11), %vm398_vm2, %v1997_v53  ;;  %s2413_s13 = smov (!%p1996_p11), 106   ;;  %v2014_v13 = vld [vmem:[%s2768_s3 + $0x68] sm:$0xf] (!%p1996_p11)  ;;  %v1320_v53 = vld [vmem:[#allocation2] sm:$0xff] (!%p1996_p11) }
 0x296   : > { %2205 = vmatprep.mubr.msk.bf16.mxu1 (!%p1996_p11), %vm2405_vm5, %v2404_v51 }
 0x297   : > { %1425 = vrot.lane.b32.xlu0 (!%p1996_p11), %v1999_v50, %s2408_s22  ;;  %1527 = vrot.lane.b32.xlu1 (!%p1996_p11), %v1999_v50, %s2409_s29 }
 0x29b   : > { %1578 = vrot.lane.b32.xlu0 %v1999_v50, %s2410_s8  ;;  %1629 = vrot.lane.b32.xlu1 %v1999_v50, %s2411_s10 }
 0x29f   : > { %1680 = vrot.lane.b32.xlu0 %v1999_v50, %s2412_s12  ;;  %1731 = vrot.lane.b32.xlu1 %v1999_v50, %s2413_s13 }
 0x305   : > { %v1330_v54 = vpop.permute.xlu0 %1329  ;;  %v1477_v55 = vpop.permute.xlu1 %1476 }
 0x306   : > { %v1335_v56 = vsel %vm402_vm1, %v1330_v54, 0  ;;  %v1482_v57 = vsel %vm402_vm1, %v1477_v55, 0 }
 0x307   : > { %2186 = vmatpush3.bf16.msra.mxu0 %v1335_v56  ;;  %2204 = vmatpush3.bf16.msra.mxu1 %v1482_v57 }
 0x308   : > { %2197 = vmatprep.subr.bf16.mxu0 %v2404_v51  ;;  %2215 = vmatprep.subr.bf16.mxu1 %v2404_v51 }
 0x309   : > { %v1426_v60 = vpop.permute.xlu0 %1425  ;;  %v1528_v62 = vpop.permute.xlu1 %1527 }
 0x30a   : > { %v1431_v61 = vsel %vm402_vm1, %v1426_v60, 0  ;;  %2188 = vmatmul.mubr.msk.bf16.vlgmr.msra.gmra.mrb[0].mxu0 %vm398_vm2, %v1998_v58  ;;  %2206 = vmatmul.mubr.msk.bf16.vlgmr.msra.gmra.mrb[4].mxu1 %vm398_vm2, %v2004_v59  ;;  %v1533_v3 = vsel %vm402_vm1, %v1528_v62, 0 }
 0x30b   : > { %2198 = vmatpush3.bf16.msra.mxu0 %v1431_v61  ;;  %2199 = vmatprep.mubr.msk.bf16.mxu0 %vm2405_vm5, %v2404_v51 }
 0x30c   : > { %2209 = vmatprep.subr.bf16.mxu0 %v2404_v51  ;;  %2217 = vmatprep.mubr.msk.bf16.mxu1 %vm2405_vm5, %v2404_v51 }
 0x30d   : > { %v1579_v63 = vpop.permute.xlu0 %1578  ;;  %v1630_v6 = vpop.permute.xlu1 %1629 }
 0x30e   : > { %v1584_v0 = vsel %vm402_vm1, %v1579_v63, 0  ;;  %v1635_v9 = vsel %vm402_vm1, %v1630_v6, 0 }
 0x30f   : > { %2216 = vmatpush3.bf16.msra.mxu1 %v1584_v0 }
 0x310   : > { %2227 = vmatprep.subr.bf16.mxu1 %v2404_v51 }
 0x311   : > { %v1681_v4 = vpop.permute.xlu0 %1680  ;;  %v1732_v10 = vpop.permute.xlu1 %1731 }
 0x312   : > { %2200 = vmatmul.mubr.msk.bf16.vlgmr.msra.gmra.mrb[4].mxu0 %vm398_vm2, %v2002_v1  ;;  %2218 = vmatmul.mubr.msk.bf16.vlgmr.msra.gmra.mrb[8].mxu1 %vm398_vm2, %v2008_v2  ;;  %v1686_v5 = vsel %vm402_vm1, %v1681_v4, 0  ;;  %v1737_v12 = vsel %vm402_vm1, %v1732_v10, 0 }
 0x313   : > { %2210 = vmatpush3.bf16.msra.mxu0 %v1533_v3  ;;  %2211 = vmatprep.mubr.msk.bf16.mxu0 %vm2405_vm5, %v2404_v51 }
 0x314   : > { %2221 = vmatprep.subr.bf16.mxu0 %v2404_v51  ;;  %2228 = vmatpush3.bf16.msra.mxu1 %v1686_v5 }
 0x315   : > { %2229 = vmatprep.mubr.msk.bf16.mxu1 %vm2405_vm5, %v2404_v51 }
 0x31a   : > { %2212 = vmatmul.mubr.msk.bf16.vlgmr.msra.gmra.mrb[8].mxu0 %vm398_vm2, %v2006_v7  ;;  %2230 = vmatmul.mubr.msk.bf16.vlgmr.msra.gmra.mrb[12].mxu1 %vm398_vm2, %v2012_v8 }
 0x31b   : > { %2222 = vmatpush3.bf16.msra.mxu0 %v1635_v9  ;;  %2223 = vmatprep.mubr.msk.bf16.mxu0 %vm2405_vm5, %v2404_v51 }
 0x31c   : > { %2233 = vmatprep.subr.bf16.mxu0 %v2404_v51 }
 0x322   : > { %2224 = vmatmul.mubr.msk.bf16.vlgmr.msra.gmra.mrb[12].mxu0 %vm398_vm2, %v2010_v11 }
 0x323   : > { %2234 = vmatpush3.bf16.msra.mxu0 %v1737_v12  ;;  %2235 = vmatprep.mubr.msk.bf16.mxu0 %vm2405_vm5, %v2404_v51 }
 0x32a   : > { %2236 = vmatmul.mubr.msk.bf16.vlgmr.msra.gmra.mrb[16].mxu0 %vm398_vm2, %v2014_v13 }
 0x368   : > { %v1417_v14 = vpop.f32.mrb[0].mxu1 }
 0x369   : > { %v2195_v15 = vpop.f32.mrb[1].mxu1 }
 0x36a   : > { %v1420_v16 = vpop.f32.mrb[2].mxu1 }
 0x36b   : > { %v2196_v17 = vpop.f32.mrb[3].mxu1 }
 0x3dd   : > { %v1371_v18 = vpop.f32.mrb[0].mxu0  ;;  %v1518_v19 = vpop.f32.mrb[4].mxu1 }
 0x3de   : > { %v2189_v20 = vpop.f32.mrb[1].mxu0  ;;  %v1418_v21 = vadd.f32 %v1417_v14, %v1371_v18  ;;  %v2207_v22 = vpop.f32.mrb[5].mxu1 }
 0x3df   : > { %v1374_v23 = vpop.f32.mrb[2].mxu0  ;;  %v1521_v24 = vpop.f32.mrb[6].mxu1 }
 0x3e0   : > { %v2190_v25 = vpop.f32.mrb[3].mxu0  ;;  %v2208_v26 = vpop.f32.mrb[7].mxu1 }
 0x3e5   : > { %v1467_v27 = vpop.f32.mrb[4].mxu0  ;;  %v1620_v28 = vpop.f32.mrb[8].mxu1 }
 0x3e6   : > { %v1473_v29 = vadd.f32 %v1467_v27, %v1418_v21  ;;  %v2201_v30 = vpop.f32.mrb[5].mxu0  ;;  %v2219_v31 = vpop.f32.mrb[9].mxu1 }
 0x3e7   : > { %v1470_v32 = vpop.f32.mrb[6].mxu0  ;;  %v1623_v33 = vpop.f32.mrb[10].mxu1 }
 0x3e8   : > { %v1524_v34 = vadd.f32 %v1518_v19, %v1473_v29  ;;  %v2202_v35 = vpop.f32.mrb[7].mxu0  ;;  %v2220_v36 = vpop.f32.mrb[11].mxu1 }
 0x3ed   : > { %v1569_v37 = vpop.f32.mrb[8].mxu0  ;;  %v1722_v38 = vpop.f32.mrb[12].mxu1 }
 0x3ee   : > { %v1575_v39 = vadd.f32 %v1569_v37, %v1524_v34  ;;  %v2213_v40 = vpop.f32.mrb[9].mxu0  ;;  %v2231_v41 = vpop.f32.mrb[13].mxu1 }
 0x3ef   : > { %v1572_v42 = vpop.f32.mrb[10].mxu0  ;;  %v1725_v43 = vpop.f32.mrb[14].mxu1 }
 0x3f0   : > { %v1626_v44 = vadd.f32 %v1620_v28, %v1575_v39  ;;  %v2214_v45 = vpop.f32.mrb[11].mxu0  ;;  %v2232_v46 = vpop.f32.mrb[15].mxu1 }
 0x3f5   : > { %v1671_v47 = vpop.f32.mrb[12].mxu0 }
 0x3f6   : > { %v1677_v48 = vadd.f32 %v1671_v47, %v1626_v44  ;;  %v2225_v49 = vpop.f32.mrb[13].mxu0 }
 0x3f7   : > { %v1674_v50 = vpop.f32.mrb[14].mxu0 }
 0x3f8   : > { %v1728_v51 = vadd.f32 %v1722_v38, %v1677_v48  ;;  %v2226_v52 = vpop.f32.mrb[15].mxu0 }
 0x3fd   : > { %v1773_v54 = vpop.f32.mrb[16].mxu0 }
 0x3fe   : > { %v1779_v55 = vadd.f32 %v1773_v54, %v1728_v51  ;;  %v2237_v56 = vpop.f32.mrb[17].mxu0 }
 0x3ff   : > { %v1776_v57 = vpop.f32.mrb[18].mxu0 }
 0x400   : > { %v1780_v58 = vadd.f32 %v1779_v55, %v1320_v53  ;;  %v2238_v59 = vpop.f32.mrb[19].mxu0 }
 0x402   : > { %1781 = vst.msk [vmem:[#allocation2] sm:$0xff] %vm849_vm3, %v1780_v58 }
 0x403 PF: > { %v1783_v60 = vld [vmem:[%s2769_s4] sm:$0xff]  ;;  %v2414_v61 = vmov 0   ;;  %vm1799_vm6 = vcmask 84992   ;;  %s2415_s28 = smov 11   ;;  %vm1808_vm7 = vcmask 740440   ;;  %vm1810_vm8 = vcmask 1044184  }
 0x404   : > { %2343 = vset.pattern.permute.xlu0 %v2414_v61  ;;  %1800 = vst.msk [vmem:[%s2503_s16] sm:$0xf] %vm1799_vm6, %v2414_v61  ;;  %v2016_v1 = vld [vmem:[%s2770_s5] ss:$0 sm:$0xff] }
 0x405   : > { %1786 = vperm.xlu0 %2343, %v1783_v60  }
 0x409   : > { %v1782_v62 = vld [vmem:[#allocation2] sm:$0xff] }
 0x484   : > { %v1787_v63 = vpop.permute.xlu0 %1786 }
 0x485   : > { %v1789_v0 = vadd.f32 %v1787_v63, %v1782_v62 }
 0x487   : > { %v1790_v2 = vmax.f32 %v1789_v0, 0.0 }
 0x489   : > { %v1798_v3 = vmul.f32 %v2016_v1, %v1790_v2 }
 0x48b   : > { %v2022_v4 = vpack.c.bf16 %v1798_v3, %v1798_v3 }
 0x48d   : > { %1805 = vrot.lane.b32.xlu0 %v2022_v4, %s2415_s28 }
 0x4ff   : > { %v1806_v5 = vpop.permute.xlu0 %1805 }
 0x500   : > { %1809 = vst.msk [vmem:[%s2503_s16] sm:$0xf] %vm1808_vm7, %v1806_v5 }
 0x501   : > { %1811 = vst.msk [vmem:[%s2503_s16] sm:$0xf] %vm1810_vm8, %v2414_v61 }
 0x502 PF: > { %s16_s25 = sadd.s32 1, %s2382_s25   ;;  %s2773_s21 = smov %s2374_s23 }
 0x503   : > { %p13_p12 = scmp.ge.s32.totalorder %s16_s25, 10   ;;  %s2774_s22 = smov %s2378_s24 }
 0x504   : > { %s2775_s23 = smov %s2778_s26  ;;  %s2776_s24 = smov %s2782_s27 }
 0x505   :  { %15 = sbr.rel (!%p13_p12) target bundleno = 3 (0x3), region = 114 }

// kernel: down_forward.2
= control target key start
LH: loop header
LB: loop body
LE: loop exit
PB: predicated region body
PF: predicated region fallthrough
CT: control target
= control target key end

     0   :  { %s2672_s21 = smov 0   ;;  %s2674_s22 = smov 0   ;;  %s2993_s0 = inlined_call_operand.vmem [shape: bf16[2,4,4,128], index: 0, kind: input, shape index: {}, may-alias: {0,1,2}]   ;;  %s2994_s1 = inlined_call_operand.vmem [shape: bf16[2,4,4,128], index: 1, kind: input, shape index: {}, may-alias: {0,1,2}]   ;;  %s2995_s2 = inlined_call_operand.vmem [shape: bf16[2,4,4,128], index: 2, kind: input, shape index: {}, may-alias: {0,1,2}]   ;;  %s2996_s3 = inlined_call_operand.vmem [shape: bf16[3,3,3,8,4], index: 3, kind: input, shape index: {}]   ;;  %s2997_s4 = inlined_call_operand.vmem [shape: f32[8,1], index: 4, kind: input, shape index: {}]   ;;  %s2998_s5 = inlined_call_operand.vmem [shape: f32[1,80], index: 5, kind: input, shape index: {}]   ;;  %s2999_s6 = inlined_call_operand.vmem [shape: bf16[2,4,8,128], index: 6, kind: output, shape index: {}]  }
   0x1   :  { %s2676_s23 = smov 0   ;;  %s2678_s24 = smov 0  }
   0x2   :  { %s2680_s25 = smov 0  }
   0x3 LB: > { %s25_s26 = sadd.s32 1, %s2594_s23  ;;  %s28_s27 = sadd.s32 1, %s2598_s24  ;;  %s2602_s25 = sphi %s2680_s25, %s16_s25   ;;  %s2598_s24 = sphi %s2678_s24, %s3004_s24   ;;  %s2594_s23 = sphi %s2676_s23, %s3003_s23   ;;  %s2590_s22 = sphi %s2674_s22, %s3002_s22   ;;  %s2586_s21 = sphi %s2672_s21, %s3001_s21  }
   0x4   : > { %p26_p0 = scmp.ge.s32.totalorder %s25_s26, 4  ;;  %p2144_p1 = scmp.ge.s32.totalorder %s2602_s25, 1 }
   0x5   : > { %p285_p2 = scmp.lt.s32.totalorder %s2602_s25, 9 }
   0x6   : > { %s3006_s26 = smov (%p26_p0, %s25_s26), 0  ;;  %s3008_s27 = smov (!%p26_p0, %s28_s27), %s2598_s24 }
   0x7   : > { %p286_p3 = pnand %p2144_p1, %p285_p2  ;;  %p30_p4 = scmp.ge.s32.totalorder %s3008_s27, 2 }
   0x8   : > { %p346_p5 = scmp.lt.s32.totalorder (!%p286_p3), %s2590_s22, 1  ;;  %p359_p6 = scmp.lt.s32.totalorder (!%p286_p3), %s2586_s21, 3  ;;  %v397_v0 = vlaneseq (!%p286_p3)  ;;  %v2604_v1 = vmov (!%p286_p3), 1983009808   ;;  %v2605_v3 = vmov (!%p286_p3), 0.0   ;;  %vm2606_vm0 = vmmov (!%p286_p3), 0  }
   0x9   : > { %s3010_s27 = smov (%p30_p4, %s3008_s27), 0  ;;  %289 = sbr.rel (%p286_p3) target bundleno = 1280 (0x500), region = 44 }
   0xa   : > { %s365_s28 = sadd.s32 (!%p286_p3), 1, %s2586_s21  ;;  %v395_v2 = vunpack.c.l.s4 (!%p286_p3), %v2604_v1  ;;  %2323 = vmatprep.subr.bf16.mxu0 (!%p286_p3), %v2605_v3  ;;  %2299 = vmatprep.subr.bf16.mxu1 (!%p286_p3), %v2605_v3  ;;  %v398_v4 = vshrl.u32 (!%p286_p3), %v397_v0, 7  ;;  %s2145_s9 = sadd.s32 (!%p286_p3), 4294967295, %s2586_s21  ;;  %vm407_vm1 = vcmask (!%p286_p3), 1041408   ;;  %vm403_vm2 = vcmask (!%p286_p3), 31744  }
   0xb   : > { %2325 = vmatprep.mubr.msk.bf16.mxu0 (!%p286_p3), %vm2606_vm0, %v2605_v3  ;;  %2301 = vmatprep.mubr.msk.bf16.mxu1 (!%p286_p3), %vm2606_vm0, %v2605_v3  ;;  %p2715_p7 = scmp.lt.s32.totalorder (!%p286_p3), %s365_s28, 3  ;;  %s2607_s18 = smov (!%p286_p3), 117   ;;  %v2172_v12 = vld [vmem:[%s2996_s3 + $0x34] sm:$0xf] (!%p286_p3)  ;;  %v2163_v17 = vld [vmem:[%s2996_s3 + $0x28] sm:$0xf] (!%p286_p3) }
   0xc   : > { %v396_v5 = vunpack.c.0.s8 (!%p286_p3), %v395_v2  ;;  %p344_p8 = scmp.gt.s32.totalorder (!%p286_p3), %s2145_s9, 0  ;;  %p2146_p9 = scmp.lt.s32.totalorder (!%p286_p3), %s2145_s9, 3  ;;  %v2175_v20 = vld [vmem:[%s2996_s3 + $0x38] sm:$0xf] (!%p286_p3)  ;;  %v2162_v23 = vld [vmem:[%s2996_s3 + $0x24] sm:$0xf] (!%p286_p3) }
   0xd   : > { %s2610_s13 = smov (!%p286_p3), 108   ;;  %v2178_v26 = vld [vmem:[%s2996_s3 + $0x3c] sm:$0xf] (!%p286_p3)  ;;  %v2166_v29 = vld [vmem:[%s2996_s3 + $0x2c] sm:$0xf] (!%p286_p3)  ;;  %vm917_vm3 = vcmask (!%p286_p3), 654336  }
   0xe   : > { %v2721_v6 = vsub.s32 (!%p286_p3), %v396_v5, %v398_v4  ;;  %v2181_v32 = vld [vmem:[%s2996_s3 + $0x40] sm:$0xf] (!%p286_p3)  ;;  %v2169_v34 = vld [vmem:[%s2996_s3 + $0x30] sm:$0xf] (!%p286_p3)  ;;  %v2184_v35 = vld [vmem:[%s2996_s3 + $0x44] sm:$0xf] (!%p286_p3) }
   0xf   : > { %p2187_p10 = scmp.le.s32.totalorder (!%p286_p3), %s2586_s21, 0 }
  0x10   : > { %s3012_s22 = smov (!%p346_p5, %s2590_s22), 1  ;;  %s3014_s28 = smov (!%p2715_p7, %s365_s28), 3 }
  0x11   : > { %s360_s29 = scalar_select %p359_p6, %s2586_s21, 3 }
  0x12   : > { %s2713_s30 = sshll.u32 %s3012_s22, 2  ;;  %s3016_s28 = smov (!%p2715_p7, %s3014_s28), 3  ;;  %v2615_v48 = vmov (!%p2187_p10), 0.0   ;;  %vm2617_vm4 = vmmov (!%p2187_p10), 0   ;;  %v925_v50 = vld [vmem:[%s2996_s3] sm:$0xf] (!%p2187_p10) }
  0x13   : > { %s362_s8 = sadd.s32 %s2713_s30, %s360_s29  ;;  %s3018_s9 = smov (!%p344_p8, %s2145_s9), 0  ;;  %v2194_v55 = vld [vmem:[%s2996_s3 + $0xc] sm:$0xf] (!%p2187_p10)  ;;  %v2188_v56 = vld [vmem:[%s2996_s3 + $0x4] sm:$0xf] (!%p2187_p10) }
  0x14   : > { %s2154_s10 = sshll.u32 %s362_s8, 1  ;;  %s2161_s11 = sshll.u32 %s362_s8, 2  ;;  %v2191_v62 = vld [vmem:[%s2996_s3 + $0x8] sm:$0xf] (!%p2187_p10)  ;;  %v2200_v63 = vld [vmem:[%s2996_s3 + $0x14] sm:$0xf] (!%p2187_p10) }
  0x15   : > { %s364_s14 = scalar_lea.vmem %s2994_s1, %s2154_s10  ;;  %s2729_s17 = scalar_lea.vmem %s2999_s6, %s2161_s11  ;;  %v2197_v4 = vld [vmem:[%s2996_s3 + $0x10] sm:$0xf] (!%p2187_p10)  ;;  %v2206_v5 = vld [vmem:[%s2996_s3 + $0x1c] sm:$0xf] (!%p2187_p10) }
  0x16   : > { %v2173_v7 = vld.sshfl [vmem:[%s364_s14] sm:$0x3 pattern:$0x76325410]  ;;  %s373_s19 = sadd.s32 %s2713_s30, %s3016_s28  ;;  %s2608_s22 = smov 116  }
  0x17   : > { %628 = vrot.lane.b32.xlu0 %v2173_v7, %s2607_s18  ;;  %v388_v8 = vld [vmem:[%s364_s14] sm:$0x3]  ;;  %s2159_s20 = sshll.u32 %s373_s19, 1  ;;  %688 = vrot.lane.b32.xlu1 %v2173_v7, %s2608_s22  ;;  %s2609_s11 = smov 127  }
  0x18   : > { %v400_v9 = vrot.slane %v388_v8, %v2721_v6  ;;  %s2740_s10 = scalar_lea.vmem %s2995_s2, %s2159_s20  ;;  %s3020_s9 = smov (!%p2146_p9, %s3018_s9), 3  ;;  %v455_v18 = vsel %vm407_vm1, %v388_v8, 0 }
  0x19   : > { %s351_s12 = sadd.s32 %s3020_s9, %s2713_s30  ;;  %s2611_s14 = smov 126  }
  0x1a   : > { %s2152_s7 = sshll.u32 %s351_s12, 1  ;;  %s2612_s18 = smov 107  }
  0x1b   : > { %401 = vrot.lane.b32.xlu0 %v400_v9, %s2609_s11  ;;  %748 = vrot.lane.b32.xlu1 %v2173_v7, %s2610_s13  ;;  %s2746_s28 = scalar_lea.vmem %s2993_s0, %s2152_s7  ;;  %s2613_s19 = smov 118   ;;  %v2203_v9 = vld [vmem:[%s2996_s3 + $0x18] sm:$0xf] (!%p2187_p10) }
  0x1c   : > { %s2614_s20 = smov 106   ;;  %v924_v45 = vld [vmem:[%s2746_s28] sm:$0x3] (!%p2187_p10)  ;;  %s2616_s29 = smov (!%p2187_p10), 118  }
  0x1d   : > { %v935_v46 = vrot.slane (!%p2187_p10), %v924_v45, %v2721_v6  ;;  %v2192_v47 = vld.sshfl [vmem:[%s2746_s28] sm:$0x3 pattern:$0x76325410] (!%p2187_p10)  ;;  %v988_v49 = vsel (!%p2187_p10), %vm407_vm1, %v924_v45, 0  ;;  %s2618_s8 = smov (!%p2187_p10), 127  }
  0x1e   : > { %s2619_s28 = smov (!%p2187_p10), 117   ;;  %s2620_s13 = smov (!%p2187_p10), 126  }
  0x1f   : > { %508 = vrot.lane.b32.xlu0 %v2173_v7, %s2611_s14  ;;  %808 = vrot.lane.b32.xlu1 %v2173_v7, %s2612_s18  ;;  %s2621_s7 = smov (!%p2187_p10), 108   ;;  %s2622_s14 = smov (!%p2187_p10), 116  }
  0x20   : > { %s2623_s15 = smov (!%p2187_p10), 106   ;;  %s2624_s16 = smov (!%p2187_p10), 107  }
  0x23   : > { %568 = vrot.lane.b32.xlu0 %v2173_v7, %s2613_s19  ;;  %868 = vrot.lane.b32.xlu1 %v2173_v7, %s2614_s20 }
  0x27   : > { %1101 = vrot.lane.b32.xlu1 (!%p2187_p10), %v2192_v47, %s2616_s29  ;;  %936 = vrot.lane.b32.xlu0 (!%p2187_p10), %v935_v46, %s2618_s8 }
  0x2b   : > { %1161 = vrot.lane.b32.xlu1 (!%p2187_p10), %v2192_v47, %s2619_s28  ;;  %1041 = vrot.lane.b32.xlu0 (!%p2187_p10), %v2192_v47, %s2620_s13 }
  0x2f   : > { %1281 = vrot.lane.b32.xlu1 (!%p2187_p10), %v2192_v47, %s2621_s7  ;;  %1221 = vrot.lane.b32.xlu0 (!%p2187_p10), %v2192_v47, %s2622_s14 }
  0x33   : > { %1401 = vrot.lane.b32.xlu1 (!%p2187_p10), %v2192_v47, %s2623_s15  ;;  %1341 = vrot.lane.b32.xlu0 (!%p2187_p10), %v2192_v47, %s2624_s16 }
  0x89   : > { %v629_v10 = vpop.permute.xlu0 %628  ;;  %v689_v13 = vpop.permute.xlu1 %688 }
  0x8a   : > { %v634_v11 = vsel %vm407_vm1, %v629_v10, 0  ;;  %v694_v14 = vsel %vm407_vm1, %v689_v13, 0 }
  0x8b   : > { %2324 = vmatpush3.bf16.msra.mxu0 %v634_v11  ;;  %v2209_v11 = vld [vmem:[%s2996_s3 + $0x20] sm:$0xf] (!%p2187_p10) }
  0x8c   : > { %2329 = vmatprep.subr.bf16.mxu0 %v2605_v3 }
  0x8d   : > { %v402_v15 = vpop.permute.xlu0 %401  ;;  %v749_v19 = vpop.permute.xlu1 %748 }
  0x8e   : > { %2326 = vmatmul.mubr.msk.bf16.vlgmr.msra.gmra.mrb[0].mxu0 %vm403_vm2, %v2172_v12  ;;  %v409_v16 = vsel %vm407_vm1, %v402_v15, 0  ;;  %v754_v21 = vsel %vm407_vm1, %v749_v19, 0 }
  0x8f   : > { %2330 = vmatpush3.bf16.msra.mxu0 %v694_v14  ;;  %2331 = vmatprep.mubr.msk.bf16.mxu0 %vm2606_vm0, %v2605_v3 }
  0x90   : > { %2300 = vmatpush3.bf16.msra.mxu1 %v409_v16  ;;  %2335 = vmatprep.subr.bf16.mxu0 %v2605_v3 }
  0x91   : > { %2305 = vmatprep.subr.bf16.mxu1 %v2605_v3  ;;  %v509_v22 = vpop.permute.xlu0 %508  ;;  %v809_v25 = vpop.permute.xlu1 %808 }
  0x92   : > { %v514_v24 = vsel %vm407_vm1, %v509_v22, 0  ;;  %v814_v27 = vsel %vm407_vm1, %v809_v25, 0 }
  0x93   : > { %2302 = vmatmul.mubr.msk.bf16.vlgmr.msra.gmra.mrb[0].mxu1 %vm403_vm2, %v2163_v17 }
  0x94   : > { %2306 = vmatpush3.bf16.msra.mxu1 %v455_v18  ;;  %2307 = vmatprep.mubr.msk.bf16.mxu1 %vm2606_vm0, %v2605_v3 }
  0x95   : > { %2311 = vmatprep.subr.bf16.mxu1 %v2605_v3  ;;  %v569_v28 = vpop.permute.xlu0 %568  ;;  %v869_v31 = vpop.permute.xlu1 %868 }
  0x96   : > { %v574_v30 = vsel %vm407_vm1, %v569_v28, 0  ;;  %v874_v33 = vsel %vm407_vm1, %v869_v31, 0 }
  0x99   : > { %v1102_v51 = vpop.permute.xlu1 (!%p2187_p10), %1101  ;;  %v937_v52 = vpop.permute.xlu0 (!%p2187_p10), %936 }
  0x9a   : > { %2332 = vmatmul.mubr.msk.bf16.vlgmr.msra.gmra.mrb[0].mxu0 %vm403_vm2, %v2175_v20  ;;  %v1107_v53 = vsel (!%p2187_p10), %vm407_vm1, %v1102_v51, 0  ;;  %v942_v54 = vsel (!%p2187_p10), %vm407_vm1, %v937_v52, 0 }
  0x9b   : > { %2336 = vmatpush3.bf16.msra.mxu0 %v754_v21  ;;  %2337 = vmatprep.mubr.msk.bf16.mxu0 %vm2606_vm0, %v2605_v3 }
  0x9c   : > { %2341 = vmatprep.subr.bf16.mxu0 %v2605_v3 }
  0x9d   : > { %v1042_v57 = vpop.permute.xlu0 (!%p2187_p10), %1041  ;;  %v1162_v59 = vpop.permute.xlu1 (!%p2187_p10), %1161 }
  0x9e   : > { %v1047_v58 = vsel (!%p2187_p10), %vm407_vm1, %v1042_v57, 0  ;;  %v1167_v0 = vsel (!%p2187_p10), %vm407_vm1, %v1162_v59, 0 }
  0x9f   : > { %2308 = vmatmul.mubr.msk.bf16.vlgmr.msra.gmra.mrb[0].mxu1 %vm403_vm2, %v2162_v23 }
  0xa0   : > { %2312 = vmatpush3.bf16.msra.mxu1 %v514_v24  ;;  %2313 = vmatprep.mubr.msk.bf16.mxu1 %vm2606_vm0, %v2605_v3 }
  0xa1   : > { %2317 = vmatprep.subr.bf16.mxu1 %v2605_v3  ;;  %v1222_v60 = vpop.permute.xlu0 (!%p2187_p10), %1221 }
  0xa2   : > { %v1227_v61 = vsel (!%p2187_p10), %vm407_vm1, %v1222_v60, 0 }
  0xa5   : > { %v1342_v1 = vpop.permute.xlu0 (!%p2187_p10), %1341 }
  0xa6   : > { %2338 = vmatmul.mubr.msk.bf16.vlgmr.msra.gmra.mrb[0].mxu0 %vm403_vm2, %v2178_v26  ;;  %v1347_v2 = vsel (!%p2187_p10), %vm407_vm1, %v1342_v1, 0 }
  0xa7   : > { %2342 = vmatpush3.bf16.msra.mxu0 %v814_v27  ;;  %2343 = vmatprep.mubr.msk.bf16.mxu0 %vm2606_vm0, %v2605_v3 }
  0xa8   : > { %2347 = vmatprep.subr.bf16.mxu0 %v2605_v3 }
  0xab   : > { %2314 = vmatmul.mubr.msk.bf16.vlgmr.msra.gmra.mrb[0].mxu1 %vm403_vm2, %v2166_v29 }
  0xac   : > { %2318 = vmatpush3.bf16.msra.mxu1 %v574_v30  ;;  %2319 = vmatprep.mubr.msk.bf16.mxu1 %vm2606_vm0, %v2605_v3 }
  0xad   : > { %2359 = vmatprep.subr.bf16.mxu1 (!%p2187_p10), %v2615_v48 }
  0xb2   : > { %2344 = vmatmul.mubr.msk.bf16.vlgmr.msra.gmra.mrb[0].mxu0 %vm403_vm2, %v2181_v32 }
  0xb3   : > { %2348 = vmatpush3.bf16.msra.mxu0 %v874_v33  ;;  %2349 = vmatprep.mubr.msk.bf16.mxu0 %vm2606_vm0, %v2605_v3  ;;  %v1282_v3 = vpop.permute.xlu1 (!%p2187_p10), %1281 }
  0xb4   : > { %2353 = vmatprep.subr.bf16.mxu0 (!%p2187_p10), %v2615_v48  ;;  %v1287_v7 = vsel (!%p2187_p10), %vm407_vm1, %v1282_v3, 0 }
  0xb7   : > { %2320 = vmatmul.mubr.msk.bf16.vlgmr.msra.gmra.mrb[0].mxu1 %vm403_vm2, %v2169_v34  ;;  %v1402_v8 = vpop.permute.xlu1 (!%p2187_p10), %1401 }
  0xb8   : > { %2360 = vmatpush3.bf16.msra.mxu1 (!%p2187_p10), %v988_v49  ;;  %2361 = vmatprep.mubr.msk.bf16.mxu1 (!%p2187_p10), %vm2617_vm4, %v2615_v48  ;;  %v1407_v10 = vsel (!%p2187_p10), %vm407_vm1, %v1402_v8, 0 }
  0xb9   : > { %2371 = vmatprep.subr.bf16.mxu1 (!%p2187_p10), %v2615_v48 }
  0xbe   : > { %2350 = vmatmul.mubr.msk.bf16.vlgmr.msra.gmra.mrb[0].mxu0 %vm403_vm2, %v2184_v35 }
  0xbf   : > { %2355 = vmatprep.mubr.msk.bf16.mxu0 (!%p2187_p10), %vm2617_vm4, %v2615_v48  ;;  %2354 = vmatpush3.bf16.msra.mxu0 (!%p2187_p10), %v942_v54 }
  0xc0   : > { %2365 = vmatprep.subr.bf16.mxu0 (!%p2187_p10), %v2615_v48 }
 0x18a   : > { %v610_v36 = vpop.f32.mrb[0].mxu1 }
 0x18b   : > { %v2321_v37 = vpop.f32.mrb[1].mxu1 }
 0x18c   : > { %v613_v38 = vpop.f32.mrb[2].mxu1 }
 0x18d   : > { %v2322_v39 = vpop.f32.mrb[3].mxu1  ;;  %2362 = vmatmul.mubr.msk.bf16.vlgmr.msra.gmra.mrb[0].mxu1 (!%p2187_p10), %vm403_vm2, %v925_v50 }
 0x18e   : > { %922 = sbr.rel (%p2187_p10) target bundleno = 653 (0x28d), region = 48  ;;  %2373 = vmatprep.mubr.msk.bf16.mxu1 (!%p2187_p10), %vm2617_vm4, %v2615_v48  ;;  %2372 = vmatpush3.bf16.msra.mxu1 (!%p2187_p10), %v1107_v53 }
 0x18f   : > { %2383 = vmatprep.subr.bf16.mxu1 (!%p2187_p10), %v2615_v48 }
 0x191   : > { %v910_v40 = vpop.f32.mrb[0].mxu0 }
 0x192   : > { %v2461_v41 = vadd.f32 %v910_v40, %v610_v36  ;;  %v2351_v42 = vpop.f32.mrb[1].mxu0 }
 0x193   : > { %v913_v43 = vpop.f32.mrb[2].mxu0 }
 0x194   : > { %918 = vst.msk [vmem:[#allocation2] sm:$0xff] %vm917_vm3, %v2461_v41  ;;  %v2352_v44 = vpop.f32.mrb[3].mxu0  ;;  %2356 = vmatmul.mubr.msk.bf16.vlgmr.msra.gmra.mrb[0].mxu0 (!%p2187_p10), %vm403_vm2, %v2188_v56 }
 0x195   : > { %2374 = vmatmul.mubr.msk.bf16.vlgmr.msra.gmra.mrb[4].mxu1 %vm403_vm2, %v2194_v55  ;;  %2366 = vmatpush3.bf16.msra.mxu0 %v1047_v58 }
 0x196   : > { %2385 = vmatprep.mubr.msk.bf16.mxu1 %vm2617_vm4, %v2615_v48  ;;  %2367 = vmatprep.mubr.msk.bf16.mxu0 %vm2617_vm4, %v2615_v48 }
 0x197   : > { %2377 = vmatprep.subr.bf16.mxu0 %v2615_v48  ;;  %2384 = vmatpush3.bf16.msra.mxu1 %v1227_v61 }
 0x198   : > { %2395 = vmatprep.subr.bf16.mxu1 %v2615_v48 }
 0x19b   : > { %v923_v51 = vld [vmem:[#allocation2] sm:$0xff] }
 0x19c   : > { %2368 = vmatmul.mubr.msk.bf16.vlgmr.msra.gmra.mrb[4].mxu0 %vm403_vm2, %v2191_v62 }
 0x19d   : > { %2386 = vmatmul.mubr.msk.bf16.vlgmr.msra.gmra.mrb[8].mxu1 %vm403_vm2, %v2200_v63  ;;  %2378 = vmatpush3.bf16.msra.mxu0 %v1167_v0 }
 0x19e   : > { %2379 = vmatprep.mubr.msk.bf16.mxu0 %vm2617_vm4, %v2615_v48  ;;  %2389 = vmatprep.subr.bf16.mxu0 %v2615_v48 }
 0x19f   : > { %2396 = vmatpush3.bf16.msra.mxu1 %v1347_v2  ;;  %2397 = vmatprep.mubr.msk.bf16.mxu1 %vm2617_vm4, %v2615_v48 }
 0x1a4   : > { %2380 = vmatmul.mubr.msk.bf16.vlgmr.msra.gmra.mrb[8].mxu0 %vm403_vm2, %v2197_v4 }
 0x1a5   : > { %2398 = vmatmul.mubr.msk.bf16.vlgmr.msra.gmra.mrb[12].mxu1 %vm403_vm2, %v2206_v5  ;;  %2390 = vmatpush3.bf16.msra.mxu0 %v1287_v7 }
 0x1a6   : > { %2391 = vmatprep.mubr.msk.bf16.mxu0 %vm2617_vm4, %v2615_v48  ;;  %2401 = vmatprep.subr.bf16.mxu0 %v2615_v48 }
 0x1ac   : > { %2392 = vmatmul.mubr.msk.bf16.vlgmr.msra.gmra.mrb[12].mxu0 %vm403_vm2, %v2203_v9 }
 0x1ad   : > { %2402 = vmatpush3.bf16.msra.mxu0 %v1407_v10  ;;  %2403 = vmatprep.mubr.msk.bf16.mxu0 %vm2617_vm4, %v2615_v48 }
 0x1b4   : > { %2404 = vmatmul.mubr.msk.bf16.vlgmr.msra.gmra.mrb[16].mxu0 %vm403_vm2, %v2209_v11 }
 0x260   : > { %v1024_v12 = vpop.f32.mrb[0].mxu1 }
 0x261   : > { %v2363_v13 = vpop.f32.mrb[1].mxu1 }
 0x262   : > { %v1027_v14 = vpop.f32.mrb[2].mxu1 }
 0x263   : > { %v2364_v15 = vpop.f32.mrb[3].mxu1 }
 0x267   : > { %v978_v17 = vpop.f32.mrb[0].mxu0 }
 0x268   : > { %v1143_v16 = vpop.f32.mrb[4].mxu1  ;;  %v2357_v19 = vpop.f32.mrb[1].mxu0  ;;  %v1025_v20 = vadd.f32 %v1024_v12, %v978_v17 }
 0x269   : > { %v2375_v18 = vpop.f32.mrb[5].mxu1  ;;  %v981_v22 = vpop.f32.mrb[2].mxu0 }
 0x26a   : > { %v1146_v21 = vpop.f32.mrb[6].mxu1  ;;  %v2358_v24 = vpop.f32.mrb[3].mxu0 }
 0x26b   : > { %v2376_v23 = vpop.f32.mrb[7].mxu1 }
 0x26f   : > { %v1083_v25 = vpop.f32.mrb[4].mxu0 }
 0x270   : > { %v1263_v26 = vpop.f32.mrb[8].mxu1  ;;  %v1089_v27 = vadd.f32 %v1083_v25, %v1025_v20  ;;  %v2369_v28 = vpop.f32.mrb[5].mxu0 }
 0x271   : > { %v2387_v29 = vpop.f32.mrb[9].mxu1  ;;  %v1086_v30 = vpop.f32.mrb[6].mxu0 }
 0x272   : > { %v1266_v31 = vpop.f32.mrb[10].mxu1  ;;  %v1149_v32 = vadd.f32 %v1143_v16, %v1089_v27  ;;  %v2370_v33 = vpop.f32.mrb[7].mxu0 }
 0x273   : > { %v2388_v34 = vpop.f32.mrb[11].mxu1 }
 0x277   : > { %v1203_v35 = vpop.f32.mrb[8].mxu0 }
 0x278   : > { %v1383_v36 = vpop.f32.mrb[12].mxu1  ;;  %v1209_v37 = vadd.f32 %v1203_v35, %v1149_v32  ;;  %v2381_v38 = vpop.f32.mrb[9].mxu0 }
 0x279   : > { %v2399_v39 = vpop.f32.mrb[13].mxu1  ;;  %v1206_v40 = vpop.f32.mrb[10].mxu0 }
 0x27a   : > { %v1386_v41 = vpop.f32.mrb[14].mxu1  ;;  %v1269_v42 = vadd.f32 %v1263_v26, %v1209_v37  ;;  %v2382_v43 = vpop.f32.mrb[11].mxu0 }
 0x27b   : > { %v2400_v44 = vpop.f32.mrb[15].mxu1 }
 0x27f   : > { %v1323_v45 = vpop.f32.mrb[12].mxu0 }
 0x280   : > { %v1329_v46 = vadd.f32 %v1323_v45, %v1269_v42  ;;  %v2393_v47 = vpop.f32.mrb[13].mxu0 }
 0x281   : > { %v1326_v48 = vpop.f32.mrb[14].mxu0 }
 0x282   : > { %v1389_v49 = vadd.f32 %v1383_v36, %v1329_v46  ;;  %v2394_v50 = vpop.f32.mrb[15].mxu0 }
 0x287   : > { %v1443_v52 = vpop.f32.mrb[16].mxu0 }
 0x288   : > { %v1449_v53 = vadd.f32 %v1443_v52, %v1389_v49  ;;  %v2405_v54 = vpop.f32.mrb[17].mxu0 }
 0x289   : > { %v1446_v55 = vpop.f32.mrb[18].mxu0 }
 0x28a   : > { %v1450_v56 = vadd.f32 %v1449_v53, %v923_v51  ;;  %v2406_v57 = vpop.f32.mrb[19].mxu0 }
 0x28c   : > { %1451 = vst.msk [vmem:[#allocation2] sm:$0xff] %vm917_vm3, %v1450_v56 }
 0x28d PF: > { %p2212_p11 = scmp.ge.s32.totalorder %s2586_s21, 3 }
 0x28e   : > { %v1457_v58 = vld [vmem:[%s2740_s10] sm:$0x3] (!%p2212_p11)  ;;  %v2625_v61 = vmov (!%p2212_p11), 0.0   ;;  %s2626_s18 = smov (!%p2212_p11), 118   ;;  %vm2627_vm5 = vmmov (!%p2212_p11), 0   ;;  %s2628_s21 = smov (!%p2212_p11), 127  }
 0x28f   : > { %1455 = sbr.rel (%p2212_p11) target bundleno = 1025 (0x401), region = 52  ;;  %v1469_v59 = vrot.slane (!%p2212_p11), %v1457_v58, %v2721_v6  ;;  %v2218_v60 = vld.sshfl [vmem:[%s2740_s10] sm:$0x3 pattern:$0x76325410] (!%p2212_p11)  ;;  %2407 = vmatprep.subr.bf16.mxu0 (!%p2212_p11), %v2625_v61  ;;  %2413 = vmatprep.subr.bf16.mxu1 (!%p2212_p11), %v2625_v61  ;;  %v1522_v62 = vsel (!%p2212_p11), %vm407_vm1, %v1457_v58, 0 }
 0x290   : > { %1635 = vrot.lane.b32.xlu1 (!%p2212_p11), %v2218_v60, %s2626_s18  ;;  %2409 = vmatprep.mubr.msk.bf16.mxu0 (!%p2212_p11), %vm2627_vm5, %v2625_v61  ;;  %v2213_v6 = vld [vmem:[%s2996_s3 + $0x48] sm:$0xf] (!%p2212_p11)  ;;  %s2629_s10 = smov (!%p2212_p11), 117   ;;  %s2630_s30 = smov (!%p2212_p11), 126   ;;  %v2220_v3 = vld [vmem:[%s2996_s3 + $0x54] sm:$0xf] (!%p2212_p11) }
 0x291   : > { %1470 = vrot.lane.b32.xlu0 (!%p2212_p11), %v1469_v59, %s2628_s21  ;;  %2414 = vmatpush3.bf16.msra.mxu1 (!%p2212_p11), %v1522_v62  ;;  %s2631_s9 = smov (!%p2212_p11), 108   ;;  %s2632_s22 = smov (!%p2212_p11), 116   ;;  %v2214_v4 = vld [vmem:[%s2996_s3 + $0x4c] sm:$0xf] (!%p2212_p11)  ;;  %v2217_v11 = vld [vmem:[%s2996_s3 + $0x50] sm:$0xf] (!%p2212_p11) }
 0x292   : > { %2415 = vmatprep.mubr.msk.bf16.mxu1 (!%p2212_p11), %vm2627_vm5, %v2625_v61  ;;  %2425 = vmatprep.subr.bf16.mxu1 (!%p2212_p11), %v2625_v61  ;;  %s2633_s29 = smov (!%p2212_p11), 106   ;;  %s2634_s8 = smov (!%p2212_p11), 107   ;;  %v2226_v12 = vld [vmem:[%s2996_s3 + $0x5c] sm:$0xf] (!%p2212_p11)  ;;  %v2223_v17 = vld [vmem:[%s2996_s3 + $0x58] sm:$0xf] (!%p2212_p11) }
 0x293   : > { %v2232_v18 = vld [vmem:[%s2996_s3 + $0x64] sm:$0xf] (!%p2212_p11)  ;;  %v2229_v21 = vld [vmem:[%s2996_s3 + $0x60] sm:$0xf] (!%p2212_p11)  ;;  %v2235_v23 = vld [vmem:[%s2996_s3 + $0x68] sm:$0xf] (!%p2212_p11) }
 0x294   : > { %1695 = vrot.lane.b32.xlu1 (!%p2212_p11), %v2218_v60, %s2629_s10  ;;  %2416 = vmatmul.mubr.msk.bf16.vlgmr.msra.gmra.mrb[0].mxu1 (!%p2212_p11), %vm403_vm2, %v2213_v6  ;;  %v1456_v6 = vld [vmem:[#allocation2] sm:$0xff] (!%p2212_p11) }
 0x295   : > { %1575 = vrot.lane.b32.xlu0 (!%p2212_p11), %v2218_v60, %s2630_s30  ;;  %2427 = vmatprep.mubr.msk.bf16.mxu1 (!%p2212_p11), %vm2627_vm5, %v2625_v61 }
 0x298   : > { %1815 = vrot.lane.b32.xlu1 %v2218_v60, %s2631_s9 }
 0x299   : > { %1755 = vrot.lane.b32.xlu0 %v2218_v60, %s2632_s22 }
 0x29c   : > { %1935 = vrot.lane.b32.xlu1 %v2218_v60, %s2633_s29 }
 0x29d   : > { %1875 = vrot.lane.b32.xlu0 %v2218_v60, %s2634_s8 }
 0x302   : > { %v1636_v63 = vpop.permute.xlu1 %1635 }
 0x303   : > { %v1471_v0 = vpop.permute.xlu0 %1470  ;;  %v1641_v1 = vsel %vm407_vm1, %v1636_v63, 0 }
 0x304   : > { %v1476_v2 = vsel %vm407_vm1, %v1471_v0, 0  ;;  %2426 = vmatpush3.bf16.msra.mxu1 %v1641_v1 }
 0x305   : > { %2408 = vmatpush3.bf16.msra.mxu0 %v1476_v2  ;;  %2437 = vmatprep.subr.bf16.mxu1 %v2625_v61 }
 0x306   : > { %2419 = vmatprep.subr.bf16.mxu0 %v2625_v61  ;;  %v1696_v8 = vpop.permute.xlu1 %1695 }
 0x307   : > { %v1576_v5 = vpop.permute.xlu0 %1575  ;;  %2428 = vmatmul.mubr.msk.bf16.vlgmr.msra.gmra.mrb[4].mxu1 %vm403_vm2, %v2220_v3  ;;  %v1701_v13 = vsel %vm407_vm1, %v1696_v8, 0 }
 0x308   : > { %v1581_v7 = vsel %vm407_vm1, %v1576_v5, 0  ;;  %2410 = vmatmul.mubr.msk.bf16.vlgmr.msra.gmra.mrb[0].mxu0 %vm403_vm2, %v2214_v4  ;;  %2439 = vmatprep.mubr.msk.bf16.mxu1 %vm2627_vm5, %v2625_v61 }
 0x309   : > { %2420 = vmatpush3.bf16.msra.mxu0 %v1581_v7  ;;  %2421 = vmatprep.mubr.msk.bf16.mxu0 %vm2627_vm5, %v2625_v61 }
 0x30a   : > { %2431 = vmatprep.subr.bf16.mxu0 %v2625_v61  ;;  %v1816_v16 = vpop.permute.xlu1 %1815 }
 0x30b   : > { %v1756_v9 = vpop.permute.xlu0 %1755  ;;  %v1821_v19 = vsel %vm407_vm1, %v1816_v16, 0 }
 0x30c   : > { %v1761_v10 = vsel %vm407_vm1, %v1756_v9, 0 }
 0x30d   : > { %2438 = vmatpush3.bf16.msra.mxu1 %v1761_v10 }
 0x30e   : > { %2449 = vmatprep.subr.bf16.mxu1 %v2625_v61  ;;  %v1936_v20 = vpop.permute.xlu1 %1935 }
 0x30f   : > { %v1876_v14 = vpop.permute.xlu0 %1875  ;;  %v1941_v22 = vsel %vm407_vm1, %v1936_v20, 0 }
 0x310   : > { %2422 = vmatmul.mubr.msk.bf16.vlgmr.msra.gmra.mrb[4].mxu0 %vm403_vm2, %v2217_v11  ;;  %2440 = vmatmul.mubr.msk.bf16.vlgmr.msra.gmra.mrb[8].mxu1 %vm403_vm2, %v2226_v12  ;;  %v1881_v15 = vsel %vm407_vm1, %v1876_v14, 0 }
 0x311   : > { %2432 = vmatpush3.bf16.msra.mxu0 %v1701_v13  ;;  %2433 = vmatprep.mubr.msk.bf16.mxu0 %vm2627_vm5, %v2625_v61 }
 0x312   : > { %2443 = vmatprep.subr.bf16.mxu0 %v2625_v61  ;;  %2450 = vmatpush3.bf16.msra.mxu1 %v1881_v15 }
 0x313   : > { %2451 = vmatprep.mubr.msk.bf16.mxu1 %vm2627_vm5, %v2625_v61 }
 0x318   : > { %2434 = vmatmul.mubr.msk.bf16.vlgmr.msra.gmra.mrb[8].mxu0 %vm403_vm2, %v2223_v17  ;;  %2452 = vmatmul.mubr.msk.bf16.vlgmr.msra.gmra.mrb[12].mxu1 %vm403_vm2, %v2232_v18 }
 0x319   : > { %2444 = vmatpush3.bf16.msra.mxu0 %v1821_v19  ;;  %2445 = vmatprep.mubr.msk.bf16.mxu0 %vm2627_vm5, %v2625_v61 }
 0x31a   : > { %2455 = vmatprep.subr.bf16.mxu0 %v2625_v61 }
 0x320   : > { %2446 = vmatmul.mubr.msk.bf16.vlgmr.msra.gmra.mrb[12].mxu0 %vm403_vm2, %v2229_v21 }
 0x321   : > { %2456 = vmatpush3.bf16.msra.mxu0 %v1941_v22  ;;  %2457 = vmatprep.mubr.msk.bf16.mxu0 %vm2627_vm5, %v2625_v61 }
 0x328   : > { %2458 = vmatmul.mubr.msk.bf16.vlgmr.msra.gmra.mrb[16].mxu0 %vm403_vm2, %v2235_v23 }
 0x367   : > { %v1558_v24 = vpop.f32.mrb[0].mxu1 }
 0x368   : > { %v2417_v25 = vpop.f32.mrb[1].mxu1 }
 0x369   : > { %v1561_v26 = vpop.f32.mrb[2].mxu1 }
 0x36a   : > { %v2418_v27 = vpop.f32.mrb[3].mxu1 }
 0x3da   : > { %v1677_v28 = vpop.f32.mrb[4].mxu1 }
 0x3db   : > { %v1512_v29 = vpop.f32.mrb[0].mxu0  ;;  %v2429_v30 = vpop.f32.mrb[5].mxu1 }
 0x3dc   : > { %v2411_v31 = vpop.f32.mrb[1].mxu0  ;;  %v1559_v32 = vadd.f32 %v1558_v24, %v1512_v29  ;;  %v1680_v33 = vpop.f32.mrb[6].mxu1 }
 0x3dd   : > { %v1515_v34 = vpop.f32.mrb[2].mxu0  ;;  %v2430_v35 = vpop.f32.mrb[7].mxu1 }
 0x3de   : > { %v2412_v36 = vpop.f32.mrb[3].mxu0 }
 0x3e3   : > { %v1617_v37 = vpop.f32.mrb[4].mxu0  ;;  %v1797_v38 = vpop.f32.mrb[8].mxu1 }
 0x3e4   : > { %v1623_v39 = vadd.f32 %v1617_v37, %v1559_v32  ;;  %v2423_v40 = vpop.f32.mrb[5].mxu0  ;;  %v2441_v41 = vpop.f32.mrb[9].mxu1 }
 0x3e5   : > { %v1620_v42 = vpop.f32.mrb[6].mxu0  ;;  %v1800_v43 = vpop.f32.mrb[10].mxu1 }
 0x3e6   : > { %v1683_v44 = vadd.f32 %v1677_v28, %v1623_v39  ;;  %v2424_v45 = vpop.f32.mrb[7].mxu0  ;;  %v2442_v46 = vpop.f32.mrb[11].mxu1 }
 0x3eb   : > { %v1737_v47 = vpop.f32.mrb[8].mxu0  ;;  %v1917_v48 = vpop.f32.mrb[12].mxu1 }
 0x3ec   : > { %v1743_v49 = vadd.f32 %v1737_v47, %v1683_v44  ;;  %v2435_v50 = vpop.f32.mrb[9].mxu0  ;;  %v2453_v51 = vpop.f32.mrb[13].mxu1 }
 0x3ed   : > { %v1740_v52 = vpop.f32.mrb[10].mxu0  ;;  %v1920_v53 = vpop.f32.mrb[14].mxu1 }
 0x3ee   : > { %v1803_v54 = vadd.f32 %v1797_v38, %v1743_v49  ;;  %v2436_v55 = vpop.f32.mrb[11].mxu0  ;;  %v2454_v56 = vpop.f32.mrb[15].mxu1 }
 0x3f3   : > { %v1857_v57 = vpop.f32.mrb[12].mxu0 }
 0x3f4   : > { %v1863_v58 = vadd.f32 %v1857_v57, %v1803_v54  ;;  %v2447_v59 = vpop.f32.mrb[13].mxu0 }
 0x3f5   : > { %v1860_v60 = vpop.f32.mrb[14].mxu0 }
 0x3f6   : > { %v1923_v61 = vadd.f32 %v1917_v48, %v1863_v58  ;;  %v2448_v62 = vpop.f32.mrb[15].mxu0 }
 0x3fb   : > { %v1977_v63 = vpop.f32.mrb[16].mxu0 }
 0x3fc   : > { %v1983_v0 = vadd.f32 %v1977_v63, %v1923_v61  ;;  %v2459_v1 = vpop.f32.mrb[17].mxu0 }
 0x3fd   : > { %v1980_v2 = vpop.f32.mrb[18].mxu0 }
 0x3fe   : > { %v1984_v3 = vadd.f32 %v1983_v0, %v1456_v6  ;;  %v2460_v4 = vpop.f32.mrb[19].mxu0 }
 0x400   : > { %1985 = vst.msk [vmem:[#allocation2] sm:$0xff] %vm917_vm3, %v1984_v3 }
 0x401 PF: > { %v1987_v5 = vld [vmem:[%s2997_s4] sm:$0xff]  ;;  %v2635_v7 = vmov 0   ;;  %vm2003_vm6 = vcmask 84992   ;;  %s2636_s28 = smov 11   ;;  %vm2012_vm7 = vcmask 740440   ;;  %vm2014_vm8 = vcmask 1044184  }
 0x402   : > { %2563 = vset.pattern.permute.xlu0 %v2635_v7  ;;  %2004 = vst.msk [vmem:[%s2729_s17] sm:$0xf] %vm2003_vm6, %v2635_v7  ;;  %v2238_v11 = vld [vmem:[%s2998_s5] ss:$0 sm:$0xff] }
 0x403   : > { %1990 = vperm.xlu0 %2563, %v1987_v5  }
 0x407   : > { %v1986_v8 = vld [vmem:[#allocation2] sm:$0xff] }
 0x482   : > { %v1991_v9 = vpop.permute.xlu0 %1990 }
 0x483   : > { %v1993_v10 = vadd.f32 %v1991_v9, %v1986_v8 }
 0x485   : > { %v1994_v12 = vmax.f32 %v1993_v10, 0.0 }
 0x487   : > { %v2002_v13 = vmul.f32 %v2238_v11, %v1994_v12 }
 0x489   : > { %v2244_v14 = vpack.c.bf16 %v2002_v13, %v2002_v13 }
 0x48b   : > { %2009 = vrot.lane.b32.xlu0 %v2244_v14, %s2636_s28 }
 0x4fd   : > { %v2010_v15 = vpop.permute.xlu0 %2009 }
 0x4fe   : > { %2013 = vst.msk [vmem:[%s2729_s17] sm:$0xf] %vm2012_vm7, %v2010_v15 }
 0x4ff   : > { %2015 = vst.msk [vmem:[%s2729_s17] sm:$0xf] %vm2014_vm8, %v2635_v7 }
 0x500 PF: > { %s16_s25 = sadd.s32 1, %s2602_s25   ;;  %s3001_s21 = smov %s2594_s23 }
 0x501   : > { %p13_p12 = scmp.ge.s32.totalorder %s16_s25, 10   ;;  %s3002_s22 = smov %s2598_s24 }
 0x502   : > { %s3003_s23 = smov %s3006_s26  ;;  %s3004_s24 = smov %s3010_s27 }
 0x503   :  { %15 = sbr.rel (!%p13_p12) target bundleno = 3 (0x3), region = 114 }

</bundles_post_ra>
